<compile_context>
chip_gen: v5e
topology: v5e:2x2
jax: 0.10.0
libtpu: 0.0.40
codegen_flags: <defaults>
</compile_context>

<pallas_src>
import functools
import math

import jax
import jax.numpy as jnp
from jax.experimental import pallas as pl
from jax.experimental.pallas import tpu as pltpu


def decoder_layer_kernel(
    x_ref, mem_ref, tgt_mask_ref, src_mask_ref,
    ln_a_ref, ln_b_ref,
    self_wqkv_ref, self_bqkv_ref, self_wo_ref, self_bo_ref,
    src_wqkv_ref, src_bqkv_ref, src_wo_ref, src_bo_ref,
    ffn_w1_ref, ffn_b1_ref, ffn_w2_ref, ffn_b2_ref,
    out_ref, *, num_heads, eps):
    """One batch-block per grid step; all intermediates stay in VMEM/vregs."""
    bb, t, d = x_ref.shape
    s_len = mem_ref.shape[1]
    d_k = d // num_heads
    inv_sqrt_dk = jnp.float32(1.0 / math.sqrt(d_k))
    neg_big = jnp.float32(-1e9)

    # Flatten the batch-block onto the matmul M dimension for all row-wise work.
    x = x_ref[...].reshape(bb * t, d).astype(jnp.float32)          # (bb*T, D)
    mem = mem_ref[...].reshape(bb * s_len, d).astype(jnp.float32)  # (bb*S, D)
    tgt_mask = tgt_mask_ref[...]      # (1|bb, 1|T, T)   0/1 f32
    src_mask = src_mask_ref[...]      # (1|bb, 1|T, S)

    def layer_norm(v, idx):
        # Spec LayerNorm: unbiased std (divide by D-1), normalize by (std + eps).
        a = ln_a_ref[idx:idx + 1, :]                               # (1, D)
        b = ln_b_ref[idx:idx + 1, :]
        mean = jnp.mean(v, axis=-1, keepdims=True)
        diff = v - mean
        var = jnp.sum(diff * diff, axis=-1, keepdims=True) * jnp.float32(1.0 / (d - 1))
        std = jnp.sqrt(var)
        return a * (diff * pl.reciprocal(std + eps)) + b

    def mha(q_in, kv_in, mask, wqkv_ref, bqkv_ref, wo_ref, bo_ref):
        # q_in: (bb*Tq, D) f32; kv_in: (bb*Tk, D) f32; mask broadcastable to (bb, Tq, Tk).
        m_q = q_in.shape[0]
        n_k = kv_in.shape[0] // bb
        q_b = q_in.astype(jnp.bfloat16)
        kv_b = kv_in.astype(jnp.bfloat16)
        o_acc = jnp.zeros((m_q, d), jnp.float32)
        for h in range(num_heads):                                 # static, small head loop
            iq, ik, iv = h, num_heads + h, 2 * num_heads + h
            qh = (jnp.dot(q_b, wqkv_ref[iq], preferred_element_type=jnp.float32)
                  + bqkv_ref[iq:iq + 1, :])                        # (bb*Tq, dk)
            kh = (jnp.dot(kv_b, wqkv_ref[ik], preferred_element_type=jnp.float32)
                  + bqkv_ref[ik:ik + 1, :])
            vh = (jnp.dot(kv_b, wqkv_ref[iv], preferred_element_type=jnp.float32)
                  + bqkv_ref[iv:iv + 1, :])
            qh = qh.reshape(bb, t, d_k).astype(jnp.bfloat16)
            kh = kh.reshape(bb, n_k, d_k).astype(jnp.bfloat16)
            vh = vh.reshape(bb, n_k, d_k).astype(jnp.bfloat16)
            # scores: batched over the batch-block, contract on d_k.
            s = jax.lax.dot_general(qh, kh, (((2,), (2,)), ((0,), (0,))),
                                    preferred_element_type=jnp.float32) * inv_sqrt_dk
            s = jnp.where(mask != 0.0, s, neg_big)                 # masked_fill(mask==0,-1e9)
            s_max = jnp.max(s, axis=-1, keepdims=True)
            e = jnp.exp(s - s_max)
            p = e * pl.reciprocal(jnp.sum(e, axis=-1, keepdims=True), approx=True)
            ctx = jax.lax.dot_general(p.astype(jnp.bfloat16), vh,
                                      (((2,), (1,)), ((0,), (0,))),
                                      preferred_element_type=jnp.float32)  # (bb, Tq, dk)
            ctx = ctx.reshape(m_q, d_k).astype(jnp.bfloat16)
            # Accumulate this head straight into the output projection (no lane concat).
            o_acc = o_acc + jnp.dot(ctx, wo_ref[h], preferred_element_type=jnp.float32)
        return o_acc + bo_ref[...]

    # Sublayer 0: masked self-attention (pre-norm + residual).
    nx = layer_norm(x, 0)
    x = x + mha(nx, nx, tgt_mask, self_wqkv_ref, self_bqkv_ref, self_wo_ref, self_bo_ref)

    # Sublayer 1: cross-attention over encoder memory (keys/values are raw memory).
    nx = layer_norm(x, 1)
    x = x + mha(nx, mem, src_mask, src_wqkv_ref, src_bqkv_ref, src_wo_ref, src_bo_ref)

    # Sublayer 2: position-wise feed-forward.
    nx = layer_norm(x, 2)
    h1 = jnp.maximum(
        jnp.dot(nx.astype(jnp.bfloat16), ffn_w1_ref[...],
                preferred_element_type=jnp.float32) + ffn_b1_ref[...], 0.0)
    ff = (jnp.dot(h1.astype(jnp.bfloat16), ffn_w2_ref[...],
                  preferred_element_type=jnp.float32) + ffn_b2_ref[...])

    out_ref[...] = (x + ff).reshape(bb, t, d)


def decoder_layer_forward(x, memory, src_mask, tgt_mask, params, *,
                          num_heads, eps=1e-6, batch_block=None):
    """Pallas equivalent of DecoderLayer.forward(x, memory, src_mask, tgt_mask).

    x:        (B, T, D) f32
    memory:   (B, S, D) f32
    src_mask: broadcastable to (B, T, S); nonzero = keep
    tgt_mask: broadcastable to (B, T, T); nonzero = keep
    returns   (B, T, D) f32
    """
    B, T, D = x.shape
    S = memory.shape[1]
    d_ff = params["ffn_w1"].shape[-1]
    assert D % num_heads == 0
    d_k = D // num_heads

    # Batch-block: put several batch elements onto the matmul M dimension per grid step.
    # (For larger B the grid still provides multiple "parallel" steps for v7x's 2 TCs.)
    if batch_block is None:
        batch_block = 1
        for cand in range(min(B, max(1, 256 // T)), 0, -1):
            if B % cand == 0:
                batch_block = cand
                break
    assert B % batch_block == 0
    num_blocks = B // batch_block

    def norm_mask(mask, rows, cols):
        # Keep the mask in its compact broadcastable form (no HBM broadcast over batch/rows).
        m = jnp.asarray(mask, jnp.float32)
        while m.ndim < 3:
            m = m[None]
        if m.ndim == 4:              # explicit head dim -> drop it
            m = m[:, 0]
        bm, rm, cm = m.shape
        assert bm in (1, B) and rm in (1, rows) and cm in (1, cols)
        if cm != cols:
            m = jnp.broadcast_to(m, (bm, rm, cols))
        return m

    tgt_m = norm_mask(tgt_mask, T, T)
    src_m = norm_mask(src_mask, T, S)

    def mask_spec(m):
        bm, rm, cm = m.shape
        if bm == 1:                  # shared across batch: DMA'd once (constant index_map)
            return pl.BlockSpec((1, rm, cm), lambda i: (0, 0, 0))
        return pl.BlockSpec((batch_block, rm, cm), lambda i: (i, 0, 0))

    def const_spec(a):
        zeros = (0,) * a.ndim        # full-array block, VMEM-resident across grid steps
        return pl.BlockSpec(a.shape, lambda i, z=zeros: z)

    def prep_attn(wqkv, bqkv, wo, bo):
        # Per-head weight layout so the kernel needs no lane slicing: (3H, D, dk), (H, dk, D).
        wqkv_h = (wqkv.reshape(3, D, num_heads, d_k)
                  .transpose(0, 2, 1, 3)
                  .reshape(3 * num_heads, D, d_k)
                  .astype(jnp.bfloat16))
        bqkv_h = bqkv.reshape(3 * num_heads, d_k).astype(jnp.float32)
        wo_h = wo.reshape(num_heads, d_k, D).astype(jnp.bfloat16)
        bo_r = bo.reshape(1, D).astype(jnp.float32)
        return wqkv_h, bqkv_h, wo_h, bo_r

    self_w = prep_attn(params["self_wqkv"], params["self_bqkv"],
                       params["self_wo"], params["self_bo"])
    src_w = prep_attn(params["src_wqkv"], params["src_bqkv"],
                      params["src_wo"], params["src_bo"])

    ln_a = params["ln_a"].astype(jnp.float32)
    ln_b = params["ln_b"].astype(jnp.float32)
    ffn_w1 = params["ffn_w1"].astype(jnp.bfloat16)
    ffn_b1 = params["ffn_b1"].reshape(1, d_ff).astype(jnp.float32)
    ffn_w2 = params["ffn_w2"].astype(jnp.bfloat16)
    ffn_b2 = params["ffn_b2"].reshape(1, D).astype(jnp.float32)

    operands = [x.astype(jnp.float32), memory.astype(jnp.float32), tgt_m, src_m,
                ln_a, ln_b, *self_w, *src_w, ffn_w1, ffn_b1, ffn_w2, ffn_b2]

    in_specs = [
        pl.BlockSpec((batch_block, T, D), lambda i: (i, 0, 0)),   # x
        pl.BlockSpec((batch_block, S, D), lambda i: (i, 0, 0)),   # memory
        mask_spec(tgt_m), mask_spec(src_m),
        const_spec(ln_a), const_spec(ln_b),
        *(const_spec(a) for a in self_w),
        *(const_spec(a) for a in src_w),
        const_spec(ffn_w1), const_spec(ffn_b1), const_spec(ffn_w2), const_spec(ffn_b2),
    ]

    # Advisory cost estimate so XLA schedules the custom call against surrounding ops.
    macs = B * (4 * T * D * D + 2 * T * T * D                      # self-attn
                + 2 * T * D * D + 2 * S * D * D + 2 * T * S * D    # cross-attn
                + 2 * T * D * d_ff)                                # ffn
    bytes_accessed = int(sum(op.size * op.dtype.itemsize for op in operands)
                         + B * T * D * 4)
    cost = pl.CostEstimate(flops=2 * macs,
                           transcendentals=B * num_heads * T * (T + S),
                           bytes_accessed=bytes_accessed)

    kernel = functools.partial(decoder_layer_kernel, num_heads=num_heads, eps=eps)

    grid_spec = pltpu.PrefetchScalarGridSpec(
        num_scalar_prefetch=0,
        grid=(num_blocks,),
        in_specs=in_specs,
        out_specs=pl.BlockSpec((batch_block, T, D), lambda i: (i, 0, 0)),
    )

    return pl.pallas_call(
        kernel,
        out_shape=jax.ShapeDtypeStruct((B, T, D), jnp.float32),
        grid_spec=grid_spec,
        compiler_params=pltpu.CompilerParams(
            dimension_semantics=("parallel",),
            vmem_limit_bytes=32 * 1024 * 1024,
        ),
        cost_estimate=cost,
    )(*operands)


def reference_decoder_layer(x, memory, src_mask, tgt_mask, p, *, num_heads, eps=1e-6):
    """Pure-JAX f32 reference with the exact PyTorch semantics (eval mode)."""
    B, T, D = x.shape
    S = memory.shape[1]
    d_k = D // num_heads
    hp = jax.lax.Precision.HIGHEST

    def layer_norm(v, a, b):
        mean = v.mean(-1, keepdims=True)
        var = ((v - mean) ** 2).sum(-1, keepdims=True) / (D - 1)   # unbiased (torch.std)
        std = jnp.sqrt(var)
        return a * (v - mean) / (std + eps) + b

    def mha(q_in, k_in, v_in, mask, wqkv, bqkv, wo, bo):
        Tq, Tk = q_in.shape[1], k_in.shape[1]
        q = jnp.dot(q_in, wqkv[0], precision=hp) + bqkv[0]
        k = jnp.dot(k_in, wqkv[1], precision=hp) + bqkv[1]
        v = jnp.dot(v_in, wqkv[2], precision=hp) + bqkv[2]
        q = q.reshape(B, Tq, num_heads, d_k).transpose(0, 2, 1, 3)
        k = k.reshape(B, Tk, num_heads, d_k).transpose(0, 2, 1, 3)
        v = v.reshape(B, Tk, num_heads, d_k).transpose(0, 2, 1, 3)
        s = jnp.einsum("bhqd,bhkd->bhqk", q, k, precision=hp) / math.sqrt(d_k)
        s = jnp.where(mask[:, None] != 0, s, -1e9)
        attn = jax.nn.softmax(s, axis=-1)
        ctx = jnp.einsum("bhqk,bhkd->bhqd", attn, v, precision=hp)
        ctx = ctx.transpose(0, 2, 1, 3).reshape(B, Tq, D)
        return jnp.dot(ctx, wo, precision=hp) + bo

    tgt_m = jnp.broadcast_to(tgt_mask.astype(jnp.float32), (B, T, T))
    src_m = jnp.broadcast_to(src_mask.astype(jnp.float32), (B, T, S))

    nx = layer_norm(x, p["ln_a"][0], p["ln_b"][0])
    x = x + mha(nx, nx, nx, tgt_m, p["self_wqkv"], p["self_bqkv"], p["self_wo"], p["self_bo"])
    nx = layer_norm(x, p["ln_a"][1], p["ln_b"][1])
    x = x + mha(nx, memory, memory, src_m,
                p["src_wqkv"], p["src_bqkv"], p["src_wo"], p["src_bo"])
    nx = layer_norm(x, p["ln_a"][2], p["ln_b"][2])
    ff = jnp.dot(jnp.maximum(jnp.dot(nx, p["ffn_w1"], precision=hp) + p["ffn_b1"], 0.0),
                 p["ffn_w2"], precision=hp) + p["ffn_b2"]
    return x + ff


if __name__ == "__main__":
    B, T, S = 2, 8, 16            # batch, target seq, source (memory) seq
    D, H, D_FF = 128, 4, 256      # d_model (lane-dense), heads, ffn hidden

    key = jax.random.PRNGKey(0)
    keys = jax.random.split(key, 16)

    def linear_w(k, fan_in, shape):
        return jax.random.uniform(k, shape, jnp.float32, -1.0, 1.0) / math.sqrt(fan_in)

    params = dict(
        ln_a=1.0 + 0.1 * jax.random.normal(keys[0], (3, D), jnp.float32),
        ln_b=0.1 * jax.random.normal(keys[1], (3, D), jnp.float32),
        self_wqkv=linear_w(keys[2], D, (3, D, D)),
        self_bqkv=linear_w(keys[3], D, (3, D)),
        self_wo=linear_w(keys[4], D, (D, D)),
        self_bo=linear_w(keys[5], D, (1, D)),
        src_wqkv=linear_w(keys[6], D, (3, D, D)),
        src_bqkv=linear_w(keys[7], D, (3, D)),
        src_wo=linear_w(keys[8], D, (D, D)),
        src_bo=linear_w(keys[9], D, (1, D)),
        ffn_w1=linear_w(keys[10], D, (D, D_FF)),
        ffn_b1=linear_w(keys[11], D, (1, D_FF)),
        ffn_w2=linear_w(keys[12], D_FF, (D_FF, D)),
        ffn_b2=linear_w(keys[13], D_FF, (1, D)),
    )

    x = jax.random.normal(keys[14], (B, T, D), jnp.float32)
    memory = jax.random.normal(keys[15], (B, S, D), jnp.float32)

    # Compact masks: causal target mask shared across batch (1,T,T); per-batch source
    # padding mask (B,1,S).  No (B,T,T)/(B,T,S) broadcast is ever materialized in HBM.
    tgt_mask = jnp.tril(jnp.ones((T, T), jnp.float32))[None]
    src_mask = jnp.ones((B, 1, S), jnp.float32).at[1, :, S - 4:].set(0.0)

    out = decoder_layer_forward(x, memory, src_mask, tgt_mask, params, num_heads=H)
    out = jax.block_until_ready(out)

    ref = reference_decoder_layer(x, memory, src_mask, tgt_mask, params, num_heads=H)
    max_diff = float(jnp.max(jnp.abs(out - ref)))

    assert out.shape == (B, T, D)
    assert out.dtype == jnp.float32
    # Tolerance reflects bf16 MXU operands (f32 accumulation) vs. the f32 reference.
    assert jnp.allclose(out, ref, rtol=3e-2, atol=3e-2), f"mismatch vs reference: {max_diff}"

    print("KERNEL_OK")
</pallas_src>

<mosaic_0001>
module attributes {stable_mosaic.version = 11 : i64} {
  func.func @decoder_layer_kernel(%arg0: i32, %arg1: memref<2x8x128xf32, #tpu.memory_space<vmem>>, %arg2: memref<2x16x128xf32, #tpu.memory_space<vmem>>, %arg3: memref<1x8x8xf32, #tpu.memory_space<vmem>>, %arg4: memref<2x1x16xf32, #tpu.memory_space<vmem>>, %arg5: memref<3x128xf32, #tpu.memory_space<vmem>>, %arg6: memref<3x128xf32, #tpu.memory_space<vmem>>, %arg7: memref<12x128x32xbf16, #tpu.memory_space<vmem>>, %arg8: memref<12x32xf32, #tpu.memory_space<vmem>>, %arg9: memref<4x32x128xbf16, #tpu.memory_space<vmem>>, %arg10: memref<1x128xf32, #tpu.memory_space<vmem>>, %arg11: memref<12x128x32xbf16, #tpu.memory_space<vmem>>, %arg12: memref<12x32xf32, #tpu.memory_space<vmem>>, %arg13: memref<4x32x128xbf16, #tpu.memory_space<vmem>>, %arg14: memref<1x128xf32, #tpu.memory_space<vmem>>, %arg15: memref<128x256xbf16, #tpu.memory_space<vmem>>, %arg16: memref<1x256xf32, #tpu.memory_space<vmem>>, %arg17: memref<256x128xbf16, #tpu.memory_space<vmem>>, %arg18: memref<1x128xf32, #tpu.memory_space<vmem>>, %arg19: memref<2x8x128xf32, #tpu.memory_space<vmem>>) attributes {dimension_semantics = [#tpu.dimension_semantics<parallel>], iteration_bounds = array<i64: 1>, scalar_prefetch = 0 : i64, scratch_operands = 0 : i64, tpu.core_type = #tpu.core_type<tc>, window_params = [{transform_indices = @transform_0, window_bounds = array<i64: 2, 8, 128>}, {transform_indices = @transform_1, window_bounds = array<i64: 2, 16, 128>}, {pipeline_mode = #tpu.pipeline_mode<synchronous>, transform_indices = @transform_2, window_bounds = array<i64: 1, 8, 8>}, {transform_indices = @transform_3, window_bounds = array<i64: 2, 1, 16>}, {pipeline_mode = #tpu.pipeline_mode<synchronous>, transform_indices = @transform_4, window_bounds = array<i64: 3, 128>}, {pipeline_mode = #tpu.pipeline_mode<synchronous>, transform_indices = @transform_5, window_bounds = array<i64: 3, 128>}, {pipeline_mode = #tpu.pipeline_mode<synchronous>, transform_indices = @transform_6, window_bounds = array<i64: 12, 128, 32>}, {pipeline_mode = #tpu.pipeline_mode<synchronous>, transform_indices = @transform_7, window_bounds = array<i64: 12, 32>}, {pipeline_mode = #tpu.pipeline_mode<synchronous>, transform_indices = @transform_8, window_bounds = array<i64: 4, 32, 128>}, {pipeline_mode = #tpu.pipeline_mode<synchronous>, transform_indices = @transform_9, window_bounds = array<i64: 1, 128>}, {pipeline_mode = #tpu.pipeline_mode<synchronous>, transform_indices = @transform_10, window_bounds = array<i64: 12, 128, 32>}, {pipeline_mode = #tpu.pipeline_mode<synchronous>, transform_indices = @transform_11, window_bounds = array<i64: 12, 32>}, {pipeline_mode = #tpu.pipeline_mode<synchronous>, transform_indices = @transform_12, window_bounds = array<i64: 4, 32, 128>}, {pipeline_mode = #tpu.pipeline_mode<synchronous>, transform_indices = @transform_13, window_bounds = array<i64: 1, 128>}, {pipeline_mode = #tpu.pipeline_mode<synchronous>, transform_indices = @transform_14, window_bounds = array<i64: 128, 256>}, {pipeline_mode = #tpu.pipeline_mode<synchronous>, transform_indices = @transform_15, window_bounds = array<i64: 1, 256>}, {pipeline_mode = #tpu.pipeline_mode<synchronous>, transform_indices = @transform_16, window_bounds = array<i64: 256, 128>}, {pipeline_mode = #tpu.pipeline_mode<synchronous>, transform_indices = @transform_17, window_bounds = array<i64: 1, 128>}, {transform_indices = @transform_18, window_bounds = array<i64: 2, 8, 128>}]} {
    %c0 = arith.constant 0 : index
    %c0_0 = arith.constant 0 : index
    %c0_1 = arith.constant 0 : index
    %0 = vector.load %arg1[%c0, %c0_0, %c0_1] : memref<2x8x128xf32, #tpu.memory_space<vmem>>, vector<2x8x128xf32>
    %1 = vector.shape_cast %0 : vector<2x8x128xf32> to vector<16x128xf32>
    %c0_2 = arith.constant 0 : index
    %c0_3 = arith.constant 0 : index
    %c0_4 = arith.constant 0 : index
    %2 = vector.load %arg2[%c0_2, %c0_3, %c0_4] : memref<2x16x128xf32, #tpu.memory_space<vmem>>, vector<2x16x128xf32>
    %3 = vector.shape_cast %2 : vector<2x16x128xf32> to vector<32x128xf32>
    %c0_5 = arith.constant 0 : index
    %c0_6 = arith.constant 0 : index
    %c0_7 = arith.constant 0 : index
    %4 = vector.load %arg3[%c0_5, %c0_6, %c0_7] : memref<1x8x8xf32, #tpu.memory_space<vmem>>, vector<1x8x8xf32>
    %c0_8 = arith.constant 0 : index
    %c0_9 = arith.constant 0 : index
    %c0_10 = arith.constant 0 : index
    %5 = vector.load %arg4[%c0_8, %c0_9, %c0_10] : memref<2x1x16xf32, #tpu.memory_space<vmem>>, vector<2x1x16xf32>
    %c0_11 = arith.constant 0 : index
    %c0_12 = arith.constant 0 : index
    %6 = vector.load %arg5[%c0_11, %c0_12] : memref<3x128xf32, #tpu.memory_space<vmem>>, vector<1x128xf32>
    %c0_13 = arith.constant 0 : index
    %c0_14 = arith.constant 0 : index
    %7 = vector.load %arg6[%c0_13, %c0_14] : memref<3x128xf32, #tpu.memory_space<vmem>>, vector<1x128xf32>
    %cst = arith.constant dense<0.000000e+00> : vector<16xf32>
    %8 = vector.multi_reduction <add>, %1, %cst [1] : vector<16x128xf32> to vector<16xf32>
    %9 = vector.shape_cast %8 : vector<16xf32> to vector<16x1xf32>
    %cst_15 = arith.constant 1.280000e+02 : f32
    %10 = vector.broadcast %cst_15 : f32 to vector<16x1xf32>
    %11 = arith.divf %9, %10 : vector<16x1xf32>
    %12 = vector.broadcast %11 : vector<16x1xf32> to vector<16x128xf32>
    %13 = arith.subf %1, %12 : vector<16x128xf32>
    %14 = arith.mulf %13, %13 : vector<16x128xf32>
    %cst_16 = arith.constant dense<0.000000e+00> : vector<16xf32>
    %15 = vector.multi_reduction <add>, %14, %cst_16 [1] : vector<16x128xf32> to vector<16xf32>
    %16 = vector.shape_cast %15 : vector<16xf32> to vector<16x1xf32>
    %cst_17 = arith.constant 0.00787401571 : f32
    %17 = vector.broadcast %cst_17 : f32 to vector<16x1xf32>
    %18 = arith.mulf %16, %17 : vector<16x1xf32>
    %19 = math.sqrt %18 : vector<16x1xf32>
    %cst_18 = arith.constant 9.99999997E-7 : f32
    %20 = vector.broadcast %cst_18 : f32 to vector<16x1xf32>
    %21 = arith.addf %19, %20 : vector<16x1xf32>
    %22 = tpu.reciprocal %21 : vector<16x1xf32> -> vector<16x1xf32>
    %23 = vector.broadcast %22 : vector<16x1xf32> to vector<16x128xf32>
    %24 = arith.mulf %13, %23 : vector<16x128xf32>
    %25 = vector.broadcast %6 : vector<1x128xf32> to vector<16x128xf32>
    %26 = arith.mulf %25, %24 : vector<16x128xf32>
    %27 = vector.broadcast %7 : vector<1x128xf32> to vector<16x128xf32>
    %28 = arith.addf %26, %27 : vector<16x128xf32>
    %29 = arith.truncf %28 : vector<16x128xf32> to vector<16x128xbf16>
    %30 = arith.truncf %28 : vector<16x128xf32> to vector<16x128xbf16>
    %cst_19 = arith.constant 0.000000e+00 : f32
    %31 = vector.broadcast %cst_19 : f32 to vector<16x128xf32>
    %c0_20 = arith.constant 0 : index
    %c0_21 = arith.constant 0 : index
    %c0_22 = arith.constant 0 : index
    %32 = vector.load %arg7[%c0_20, %c0_21, %c0_22] : memref<12x128x32xbf16, #tpu.memory_space<vmem>>, vector<1x128x32xbf16>
    %33 = vector.shape_cast %32 : vector<1x128x32xbf16> to vector<128x32xbf16>
    %cst_23 = arith.constant dense<0.000000e+00> : vector<16x32xf32>
    %34 = tpu.matmul %29, %33, %cst_23 {dimension_numbers = #tpu.dot_dimension_numbers<[1], [0], [0], [1], [0, 0, 1, 1], [], []>} : vector<16x128xbf16>, vector<128x32xbf16>, vector<16x32xf32> -> vector<16x32xf32>
    %c0_24 = arith.constant 0 : index
    %c0_25 = arith.constant 0 : index
    %35 = vector.load %arg8[%c0_24, %c0_25] : memref<12x32xf32, #tpu.memory_space<vmem>>, vector<1x32xf32>
    %36 = vector.broadcast %35 : vector<1x32xf32> to vector<16x32xf32>
    %37 = arith.addf %34, %36 : vector<16x32xf32>
    %c4 = arith.constant 4 : index
    %c0_26 = arith.constant 0 : index
    %c0_27 = arith.constant 0 : index
    %38 = vector.load %arg7[%c4, %c0_26, %c0_27] : memref<12x128x32xbf16, #tpu.memory_space<vmem>>, vector<1x128x32xbf16>
    %39 = vector.shape_cast %38 : vector<1x128x32xbf16> to vector<128x32xbf16>
    %cst_28 = arith.constant dense<0.000000e+00> : vector<16x32xf32>
    %40 = tpu.matmul %30, %39, %cst_28 {dimension_numbers = #tpu.dot_dimension_numbers<[1], [0], [0], [1], [0, 0, 1, 1], [], []>} : vector<16x128xbf16>, vector<128x32xbf16>, vector<16x32xf32> -> vector<16x32xf32>
    %c4_29 = arith.constant 4 : index
    %c0_30 = arith.constant 0 : index
    %41 = vector.load %arg8[%c4_29, %c0_30] : memref<12x32xf32, #tpu.memory_space<vmem>>, vector<1x32xf32>
    %42 = vector.broadcast %41 : vector<1x32xf32> to vector<16x32xf32>
    %43 = arith.addf %40, %42 : vector<16x32xf32>
    %c8 = arith.constant 8 : index
    %c0_31 = arith.constant 0 : index
    %c0_32 = arith.constant 0 : index
    %44 = vector.load %arg7[%c8, %c0_31, %c0_32] : memref<12x128x32xbf16, #tpu.memory_space<vmem>>, vector<1x128x32xbf16>
    %45 = vector.shape_cast %44 : vector<1x128x32xbf16> to vector<128x32xbf16>
    %cst_33 = arith.constant dense<0.000000e+00> : vector<16x32xf32>
    %46 = tpu.matmul %30, %45, %cst_33 {dimension_numbers = #tpu.dot_dimension_numbers<[1], [0], [0], [1], [0, 0, 1, 1], [], []>} : vector<16x128xbf16>, vector<128x32xbf16>, vector<16x32xf32> -> vector<16x32xf32>
    %c8_34 = arith.constant 8 : index
    %c0_35 = arith.constant 0 : index
    %47 = vector.load %arg8[%c8_34, %c0_35] : memref<12x32xf32, #tpu.memory_space<vmem>>, vector<1x32xf32>
    %48 = vector.broadcast %47 : vector<1x32xf32> to vector<16x32xf32>
    %49 = arith.addf %46, %48 : vector<16x32xf32>
    %50 = vector.shape_cast %37 : vector<16x32xf32> to vector<2x8x32xf32>
    %51 = arith.truncf %50 : vector<2x8x32xf32> to vector<2x8x32xbf16>
    %52 = vector.shape_cast %43 : vector<16x32xf32> to vector<2x8x32xf32>
    %53 = arith.truncf %52 : vector<2x8x32xf32> to vector<2x8x32xbf16>
    %54 = vector.shape_cast %49 : vector<16x32xf32> to vector<2x8x32xf32>
    %55 = arith.truncf %54 : vector<2x8x32xf32> to vector<2x8x32xbf16>
    %cst_36 = arith.constant dense<0.000000e+00> : vector<2x8x8xf32>
    %56 = tpu.matmul %51, %53, %cst_36 {dimension_numbers = #tpu.dot_dimension_numbers<[2], [2], [1], [1], [0, 0, 0, 1, 1, 1], [0], [0]>} : vector<2x8x32xbf16>, vector<2x8x32xbf16>, vector<2x8x8xf32> -> vector<2x8x8xf32>
    %cst_37 = arith.constant 0.176776692 : f32
    %57 = vector.broadcast %cst_37 : f32 to vector<2x8x8xf32>
    %58 = arith.mulf %56, %57 : vector<2x8x8xf32>
    %cst_38 = arith.constant 0.000000e+00 : f32
    %59 = vector.broadcast %cst_38 : f32 to vector<1x8x8xf32>
    %60 = arith.cmpf one, %4, %59 : vector<1x8x8xf32>
    %cst_39 = arith.constant -1.000000e+09 : f32
    %61 = vector.shape_cast %60 : vector<1x8x8xi1> to vector<1x8x8xi1>
    %62 = vector.broadcast %61 : vector<1x8x8xi1> to vector<2x8x8xi1>
    %63 = vector.broadcast %cst_39 : f32 to vector<2x8x8xf32>
    %64 = arith.select %62, %58, %63 : vector<2x8x8xi1>, vector<2x8x8xf32>
    %cst_40 = arith.constant dense<0xFF800000> : vector<2x8xf32>
    %65 = vector.multi_reduction <maximumf>, %64, %cst_40 [2] : vector<2x8x8xf32> to vector<2x8xf32>
    %66 = vector.shape_cast %65 : vector<2x8xf32> to vector<2x8x1xf32>
    %67 = vector.broadcast %66 : vector<2x8x1xf32> to vector<2x8x8xf32>
    %68 = arith.subf %64, %67 : vector<2x8x8xf32>
    %69 = math.exp %68 : vector<2x8x8xf32>
    %cst_41 = arith.constant dense<0.000000e+00> : vector<2x8xf32>
    %70 = vector.multi_reduction <add>, %69, %cst_41 [2] : vector<2x8x8xf32> to vector<2x8xf32>
    %71 = vector.shape_cast %70 : vector<2x8xf32> to vector<2x8x1xf32>
    %72 = tpu.reciprocal %71 {approx = true} : vector<2x8x1xf32> -> vector<2x8x1xf32>
    %73 = vector.broadcast %72 : vector<2x8x1xf32> to vector<2x8x8xf32>
    %74 = arith.mulf %69, %73 : vector<2x8x8xf32>
    %75 = arith.truncf %74 : vector<2x8x8xf32> to vector<2x8x8xbf16>
    %cst_42 = arith.constant dense<0.000000e+00> : vector<2x8x32xf32>
    %76 = tpu.matmul %75, %55, %cst_42 {dimension_numbers = #tpu.dot_dimension_numbers<[2], [1], [1], [2], [0, 0, 0, 1, 1, 2], [0], [0]>} : vector<2x8x8xbf16>, vector<2x8x32xbf16>, vector<2x8x32xf32> -> vector<2x8x32xf32>
    %77 = vector.shape_cast %76 : vector<2x8x32xf32> to vector<16x32xf32>
    %78 = arith.truncf %77 : vector<16x32xf32> to vector<16x32xbf16>
    %c0_43 = arith.constant 0 : index
    %c0_44 = arith.constant 0 : index
    %c0_45 = arith.constant 0 : index
    %79 = vector.load %arg9[%c0_43, %c0_44, %c0_45] : memref<4x32x128xbf16, #tpu.memory_space<vmem>>, vector<1x32x128xbf16>
    %80 = vector.shape_cast %79 : vector<1x32x128xbf16> to vector<32x128xbf16>
    %cst_46 = arith.constant dense<0.000000e+00> : vector<16x128xf32>
    %81 = tpu.matmul %78, %80, %cst_46 {dimension_numbers = #tpu.dot_dimension_numbers<[1], [0], [0], [1], [0, 0, 1, 1], [], []>} : vector<16x32xbf16>, vector<32x128xbf16>, vector<16x128xf32> -> vector<16x128xf32>
    %82 = arith.addf %31, %81 : vector<16x128xf32>
    %c1 = arith.constant 1 : index
    %c0_47 = arith.constant 0 : index
    %c0_48 = arith.constant 0 : index
    %83 = vector.load %arg7[%c1, %c0_47, %c0_48] : memref<12x128x32xbf16, #tpu.memory_space<vmem>>, vector<1x128x32xbf16>
    %84 = vector.shape_cast %83 : vector<1x128x32xbf16> to vector<128x32xbf16>
    %cst_49 = arith.constant dense<0.000000e+00> : vector<16x32xf32>
    %85 = tpu.matmul %29, %84, %cst_49 {dimension_numbers = #tpu.dot_dimension_numbers<[1], [0], [0], [1], [0, 0, 1, 1], [], []>} : vector<16x128xbf16>, vector<128x32xbf16>, vector<16x32xf32> -> vector<16x32xf32>
    %c1_50 = arith.constant 1 : index
    %c0_51 = arith.constant 0 : index
    %86 = vector.load %arg8[%c1_50, %c0_51] : memref<12x32xf32, #tpu.memory_space<vmem>>, vector<1x32xf32>
    %87 = vector.broadcast %86 : vector<1x32xf32> to vector<16x32xf32>
    %88 = arith.addf %85, %87 : vector<16x32xf32>
    %c5 = arith.constant 5 : index
    %c0_52 = arith.constant 0 : index
    %c0_53 = arith.constant 0 : index
    %89 = vector.load %arg7[%c5, %c0_52, %c0_53] : memref<12x128x32xbf16, #tpu.memory_space<vmem>>, vector<1x128x32xbf16>
    %90 = vector.shape_cast %89 : vector<1x128x32xbf16> to vector<128x32xbf16>
    %cst_54 = arith.constant dense<0.000000e+00> : vector<16x32xf32>
    %91 = tpu.matmul %30, %90, %cst_54 {dimension_numbers = #tpu.dot_dimension_numbers<[1], [0], [0], [1], [0, 0, 1, 1], [], []>} : vector<16x128xbf16>, vector<128x32xbf16>, vector<16x32xf32> -> vector<16x32xf32>
    %c5_55 = arith.constant 5 : index
    %c0_56 = arith.constant 0 : index
    %92 = vector.load %arg8[%c5_55, %c0_56] : memref<12x32xf32, #tpu.memory_space<vmem>>, vector<1x32xf32>
    %93 = vector.broadcast %92 : vector<1x32xf32> to vector<16x32xf32>
    %94 = arith.addf %91, %93 : vector<16x32xf32>
    %c9 = arith.constant 9 : index
    %c0_57 = arith.constant 0 : index
    %c0_58 = arith.constant 0 : index
    %95 = vector.load %arg7[%c9, %c0_57, %c0_58] : memref<12x128x32xbf16, #tpu.memory_space<vmem>>, vector<1x128x32xbf16>
    %96 = vector.shape_cast %95 : vector<1x128x32xbf16> to vector<128x32xbf16>
    %cst_59 = arith.constant dense<0.000000e+00> : vector<16x32xf32>
    %97 = tpu.matmul %30, %96, %cst_59 {dimension_numbers = #tpu.dot_dimension_numbers<[1], [0], [0], [1], [0, 0, 1, 1], [], []>} : vector<16x128xbf16>, vector<128x32xbf16>, vector<16x32xf32> -> vector<16x32xf32>
    %c9_60 = arith.constant 9 : index
    %c0_61 = arith.constant 0 : index
    %98 = vector.load %arg8[%c9_60, %c0_61] : memref<12x32xf32, #tpu.memory_space<vmem>>, vector<1x32xf32>
    %99 = vector.broadcast %98 : vector<1x32xf32> to vector<16x32xf32>
    %100 = arith.addf %97, %99 : vector<16x32xf32>
    %101 = vector.shape_cast %88 : vector<16x32xf32> to vector<2x8x32xf32>
    %102 = arith.truncf %101 : vector<2x8x32xf32> to vector<2x8x32xbf16>
    %103 = vector.shape_cast %94 : vector<16x32xf32> to vector<2x8x32xf32>
    %104 = arith.truncf %103 : vector<2x8x32xf32> to vector<2x8x32xbf16>
    %105 = vector.shape_cast %100 : vector<16x32xf32> to vector<2x8x32xf32>
    %106 = arith.truncf %105 : vector<2x8x32xf32> to vector<2x8x32xbf16>
    %cst_62 = arith.constant dense<0.000000e+00> : vector<2x8x8xf32>
    %107 = tpu.matmul %102, %104, %cst_62 {dimension_numbers = #tpu.dot_dimension_numbers<[2], [2], [1], [1], [0, 0, 0, 1, 1, 1], [0], [0]>} : vector<2x8x32xbf16>, vector<2x8x32xbf16>, vector<2x8x8xf32> -> vector<2x8x8xf32>
    %cst_63 = arith.constant 0.176776692 : f32
    %108 = vector.broadcast %cst_63 : f32 to vector<2x8x8xf32>
    %109 = arith.mulf %107, %108 : vector<2x8x8xf32>
    %cst_64 = arith.constant 0.000000e+00 : f32
    %110 = vector.broadcast %cst_64 : f32 to vector<1x8x8xf32>
    %111 = arith.cmpf one, %4, %110 : vector<1x8x8xf32>
    %cst_65 = arith.constant -1.000000e+09 : f32
    %112 = vector.shape_cast %111 : vector<1x8x8xi1> to vector<1x8x8xi1>
    %113 = vector.broadcast %112 : vector<1x8x8xi1> to vector<2x8x8xi1>
    %114 = vector.broadcast %cst_65 : f32 to vector<2x8x8xf32>
    %115 = arith.select %113, %109, %114 : vector<2x8x8xi1>, vector<2x8x8xf32>
    %cst_66 = arith.constant dense<0xFF800000> : vector<2x8xf32>
    %116 = vector.multi_reduction <maximumf>, %115, %cst_66 [2] : vector<2x8x8xf32> to vector<2x8xf32>
    %117 = vector.shape_cast %116 : vector<2x8xf32> to vector<2x8x1xf32>
    %118 = vector.broadcast %117 : vector<2x8x1xf32> to vector<2x8x8xf32>
    %119 = arith.subf %115, %118 : vector<2x8x8xf32>
    %120 = math.exp %119 : vector<2x8x8xf32>
    %cst_67 = arith.constant dense<0.000000e+00> : vector<2x8xf32>
    %121 = vector.multi_reduction <add>, %120, %cst_67 [2] : vector<2x8x8xf32> to vector<2x8xf32>
    %122 = vector.shape_cast %121 : vector<2x8xf32> to vector<2x8x1xf32>
    %123 = tpu.reciprocal %122 {approx = true} : vector<2x8x1xf32> -> vector<2x8x1xf32>
    %124 = vector.broadcast %123 : vector<2x8x1xf32> to vector<2x8x8xf32>
    %125 = arith.mulf %120, %124 : vector<2x8x8xf32>
    %126 = arith.truncf %125 : vector<2x8x8xf32> to vector<2x8x8xbf16>
    %cst_68 = arith.constant dense<0.000000e+00> : vector<2x8x32xf32>
    %127 = tpu.matmul %126, %106, %cst_68 {dimension_numbers = #tpu.dot_dimension_numbers<[2], [1], [1], [2], [0, 0, 0, 1, 1, 2], [0], [0]>} : vector<2x8x8xbf16>, vector<2x8x32xbf16>, vector<2x8x32xf32> -> vector<2x8x32xf32>
    %128 = vector.shape_cast %127 : vector<2x8x32xf32> to vector<16x32xf32>
    %129 = arith.truncf %128 : vector<16x32xf32> to vector<16x32xbf16>
    %c1_69 = arith.constant 1 : index
    %c0_70 = arith.constant 0 : index
    %c0_71 = arith.constant 0 : index
    %130 = vector.load %arg9[%c1_69, %c0_70, %c0_71] : memref<4x32x128xbf16, #tpu.memory_space<vmem>>, vector<1x32x128xbf16>
    %131 = vector.shape_cast %130 : vector<1x32x128xbf16> to vector<32x128xbf16>
    %cst_72 = arith.constant dense<0.000000e+00> : vector<16x128xf32>
    %132 = tpu.matmul %129, %131, %cst_72 {dimension_numbers = #tpu.dot_dimension_numbers<[1], [0], [0], [1], [0, 0, 1, 1], [], []>} : vector<16x32xbf16>, vector<32x128xbf16>, vector<16x128xf32> -> vector<16x128xf32>
    %133 = arith.addf %82, %132 : vector<16x128xf32>
    %c2 = arith.constant 2 : index
    %c0_73 = arith.constant 0 : index
    %c0_74 = arith.constant 0 : index
    %134 = vector.load %arg7[%c2, %c0_73, %c0_74] : memref<12x128x32xbf16, #tpu.memory_space<vmem>>, vector<1x128x32xbf16>
    %135 = vector.shape_cast %134 : vector<1x128x32xbf16> to vector<128x32xbf16>
    %cst_75 = arith.constant dense<0.000000e+00> : vector<16x32xf32>
    %136 = tpu.matmul %29, %135, %cst_75 {dimension_numbers = #tpu.dot_dimension_numbers<[1], [0], [0], [1], [0, 0, 1, 1], [], []>} : vector<16x128xbf16>, vector<128x32xbf16>, vector<16x32xf32> -> vector<16x32xf32>
    %c2_76 = arith.constant 2 : index
    %c0_77 = arith.constant 0 : index
    %137 = vector.load %arg8[%c2_76, %c0_77] : memref<12x32xf32, #tpu.memory_space<vmem>>, vector<1x32xf32>
    %138 = vector.broadcast %137 : vector<1x32xf32> to vector<16x32xf32>
    %139 = arith.addf %136, %138 : vector<16x32xf32>
    %c6 = arith.constant 6 : index
    %c0_78 = arith.constant 0 : index
    %c0_79 = arith.constant 0 : index
    %140 = vector.load %arg7[%c6, %c0_78, %c0_79] : memref<12x128x32xbf16, #tpu.memory_space<vmem>>, vector<1x128x32xbf16>
    %141 = vector.shape_cast %140 : vector<1x128x32xbf16> to vector<128x32xbf16>
    %cst_80 = arith.constant dense<0.000000e+00> : vector<16x32xf32>
    %142 = tpu.matmul %30, %141, %cst_80 {dimension_numbers = #tpu.dot_dimension_numbers<[1], [0], [0], [1], [0, 0, 1, 1], [], []>} : vector<16x128xbf16>, vector<128x32xbf16>, vector<16x32xf32> -> vector<16x32xf32>
    %c6_81 = arith.constant 6 : index
    %c0_82 = arith.constant 0 : index
    %143 = vector.load %arg8[%c6_81, %c0_82] : memref<12x32xf32, #tpu.memory_space<vmem>>, vector<1x32xf32>
    %144 = vector.broadcast %143 : vector<1x32xf32> to vector<16x32xf32>
    %145 = arith.addf %142, %144 : vector<16x32xf32>
    %c10 = arith.constant 10 : index
    %c0_83 = arith.constant 0 : index
    %c0_84 = arith.constant 0 : index
    %146 = vector.load %arg7[%c10, %c0_83, %c0_84] : memref<12x128x32xbf16, #tpu.memory_space<vmem>>, vector<1x128x32xbf16>
    %147 = vector.shape_cast %146 : vector<1x128x32xbf16> to vector<128x32xbf16>
    %cst_85 = arith.constant dense<0.000000e+00> : vector<16x32xf32>
    %148 = tpu.matmul %30, %147, %cst_85 {dimension_numbers = #tpu.dot_dimension_numbers<[1], [0], [0], [1], [0, 0, 1, 1], [], []>} : vector<16x128xbf16>, vector<128x32xbf16>, vector<16x32xf32> -> vector<16x32xf32>
    %c10_86 = arith.constant 10 : index
    %c0_87 = arith.constant 0 : index
    %149 = vector.load %arg8[%c10_86, %c0_87] : memref<12x32xf32, #tpu.memory_space<vmem>>, vector<1x32xf32>
    %150 = vector.broadcast %149 : vector<1x32xf32> to vector<16x32xf32>
    %151 = arith.addf %148, %150 : vector<16x32xf32>
    %152 = vector.shape_cast %139 : vector<16x32xf32> to vector<2x8x32xf32>
    %153 = arith.truncf %152 : vector<2x8x32xf32> to vector<2x8x32xbf16>
    %154 = vector.shape_cast %145 : vector<16x32xf32> to vector<2x8x32xf32>
    %155 = arith.truncf %154 : vector<2x8x32xf32> to vector<2x8x32xbf16>
    %156 = vector.shape_cast %151 : vector<16x32xf32> to vector<2x8x32xf32>
    %157 = arith.truncf %156 : vector<2x8x32xf32> to vector<2x8x32xbf16>
    %cst_88 = arith.constant dense<0.000000e+00> : vector<2x8x8xf32>
    %158 = tpu.matmul %153, %155, %cst_88 {dimension_numbers = #tpu.dot_dimension_numbers<[2], [2], [1], [1], [0, 0, 0, 1, 1, 1], [0], [0]>} : vector<2x8x32xbf16>, vector<2x8x32xbf16>, vector<2x8x8xf32> -> vector<2x8x8xf32>
    %cst_89 = arith.constant 0.176776692 : f32
    %159 = vector.broadcast %cst_89 : f32 to vector<2x8x8xf32>
    %160 = arith.mulf %158, %159 : vector<2x8x8xf32>
    %cst_90 = arith.constant 0.000000e+00 : f32
    %161 = vector.broadcast %cst_90 : f32 to vector<1x8x8xf32>
    %162 = arith.cmpf one, %4, %161 : vector<1x8x8xf32>
    %cst_91 = arith.constant -1.000000e+09 : f32
    %163 = vector.shape_cast %162 : vector<1x8x8xi1> to vector<1x8x8xi1>
    %164 = vector.broadcast %163 : vector<1x8x8xi1> to vector<2x8x8xi1>
    %165 = vector.broadcast %cst_91 : f32 to vector<2x8x8xf32>
    %166 = arith.select %164, %160, %165 : vector<2x8x8xi1>, vector<2x8x8xf32>
    %cst_92 = arith.constant dense<0xFF800000> : vector<2x8xf32>
    %167 = vector.multi_reduction <maximumf>, %166, %cst_92 [2] : vector<2x8x8xf32> to vector<2x8xf32>
    %168 = vector.shape_cast %167 : vector<2x8xf32> to vector<2x8x1xf32>
    %169 = vector.broadcast %168 : vector<2x8x1xf32> to vector<2x8x8xf32>
    %170 = arith.subf %166, %169 : vector<2x8x8xf32>
    %171 = math.exp %170 : vector<2x8x8xf32>
    %cst_93 = arith.constant dense<0.000000e+00> : vector<2x8xf32>
    %172 = vector.multi_reduction <add>, %171, %cst_93 [2] : vector<2x8x8xf32> to vector<2x8xf32>
    %173 = vector.shape_cast %172 : vector<2x8xf32> to vector<2x8x1xf32>
    %174 = tpu.reciprocal %173 {approx = true} : vector<2x8x1xf32> -> vector<2x8x1xf32>
    %175 = vector.broadcast %174 : vector<2x8x1xf32> to vector<2x8x8xf32>
    %176 = arith.mulf %171, %175 : vector<2x8x8xf32>
    %177 = arith.truncf %176 : vector<2x8x8xf32> to vector<2x8x8xbf16>
    %cst_94 = arith.constant dense<0.000000e+00> : vector<2x8x32xf32>
    %178 = tpu.matmul %177, %157, %cst_94 {dimension_numbers = #tpu.dot_dimension_numbers<[2], [1], [1], [2], [0, 0, 0, 1, 1, 2], [0], [0]>} : vector<2x8x8xbf16>, vector<2x8x32xbf16>, vector<2x8x32xf32> -> vector<2x8x32xf32>
    %179 = vector.shape_cast %178 : vector<2x8x32xf32> to vector<16x32xf32>
    %180 = arith.truncf %179 : vector<16x32xf32> to vector<16x32xbf16>
    %c2_95 = arith.constant 2 : index
    %c0_96 = arith.constant 0 : index
    %c0_97 = arith.constant 0 : index
    %181 = vector.load %arg9[%c2_95, %c0_96, %c0_97] : memref<4x32x128xbf16, #tpu.memory_space<vmem>>, vector<1x32x128xbf16>
    %182 = vector.shape_cast %181 : vector<1x32x128xbf16> to vector<32x128xbf16>
    %cst_98 = arith.constant dense<0.000000e+00> : vector<16x128xf32>
    %183 = tpu.matmul %180, %182, %cst_98 {dimension_numbers = #tpu.dot_dimension_numbers<[1], [0], [0], [1], [0, 0, 1, 1], [], []>} : vector<16x32xbf16>, vector<32x128xbf16>, vector<16x128xf32> -> vector<16x128xf32>
    %184 = arith.addf %133, %183 : vector<16x128xf32>
    %c3 = arith.constant 3 : index
    %c0_99 = arith.constant 0 : index
    %c0_100 = arith.constant 0 : index
    %185 = vector.load %arg7[%c3, %c0_99, %c0_100] : memref<12x128x32xbf16, #tpu.memory_space<vmem>>, vector<1x128x32xbf16>
    %186 = vector.shape_cast %185 : vector<1x128x32xbf16> to vector<128x32xbf16>
    %cst_101 = arith.constant dense<0.000000e+00> : vector<16x32xf32>
    %187 = tpu.matmul %29, %186, %cst_101 {dimension_numbers = #tpu.dot_dimension_numbers<[1], [0], [0], [1], [0, 0, 1, 1], [], []>} : vector<16x128xbf16>, vector<128x32xbf16>, vector<16x32xf32> -> vector<16x32xf32>
    %c3_102 = arith.constant 3 : index
    %c0_103 = arith.constant 0 : index
    %188 = vector.load %arg8[%c3_102, %c0_103] : memref<12x32xf32, #tpu.memory_space<vmem>>, vector<1x32xf32>
    %189 = vector.broadcast %188 : vector<1x32xf32> to vector<16x32xf32>
    %190 = arith.addf %187, %189 : vector<16x32xf32>
    %c7 = arith.constant 7 : index
    %c0_104 = arith.constant 0 : index
    %c0_105 = arith.constant 0 : index
    %191 = vector.load %arg7[%c7, %c0_104, %c0_105] : memref<12x128x32xbf16, #tpu.memory_space<vmem>>, vector<1x128x32xbf16>
    %192 = vector.shape_cast %191 : vector<1x128x32xbf16> to vector<128x32xbf16>
    %cst_106 = arith.constant dense<0.000000e+00> : vector<16x32xf32>
    %193 = tpu.matmul %30, %192, %cst_106 {dimension_numbers = #tpu.dot_dimension_numbers<[1], [0], [0], [1], [0, 0, 1, 1], [], []>} : vector<16x128xbf16>, vector<128x32xbf16>, vector<16x32xf32> -> vector<16x32xf32>
    %c7_107 = arith.constant 7 : index
    %c0_108 = arith.constant 0 : index
    %194 = vector.load %arg8[%c7_107, %c0_108] : memref<12x32xf32, #tpu.memory_space<vmem>>, vector<1x32xf32>
    %195 = vector.broadcast %194 : vector<1x32xf32> to vector<16x32xf32>
    %196 = arith.addf %193, %195 : vector<16x32xf32>
    %c11 = arith.constant 11 : index
    %c0_109 = arith.constant 0 : index
    %c0_110 = arith.constant 0 : index
    %197 = vector.load %arg7[%c11, %c0_109, %c0_110] : memref<12x128x32xbf16, #tpu.memory_space<vmem>>, vector<1x128x32xbf16>
    %198 = vector.shape_cast %197 : vector<1x128x32xbf16> to vector<128x32xbf16>
    %cst_111 = arith.constant dense<0.000000e+00> : vector<16x32xf32>
    %199 = tpu.matmul %30, %198, %cst_111 {dimension_numbers = #tpu.dot_dimension_numbers<[1], [0], [0], [1], [0, 0, 1, 1], [], []>} : vector<16x128xbf16>, vector<128x32xbf16>, vector<16x32xf32> -> vector<16x32xf32>
    %c11_112 = arith.constant 11 : index
    %c0_113 = arith.constant 0 : index
    %200 = vector.load %arg8[%c11_112, %c0_113] : memref<12x32xf32, #tpu.memory_space<vmem>>, vector<1x32xf32>
    %201 = vector.broadcast %200 : vector<1x32xf32> to vector<16x32xf32>
    %202 = arith.addf %199, %201 : vector<16x32xf32>
    %203 = vector.shape_cast %190 : vector<16x32xf32> to vector<2x8x32xf32>
    %204 = arith.truncf %203 : vector<2x8x32xf32> to vector<2x8x32xbf16>
    %205 = vector.shape_cast %196 : vector<16x32xf32> to vector<2x8x32xf32>
    %206 = arith.truncf %205 : vector<2x8x32xf32> to vector<2x8x32xbf16>
    %207 = vector.shape_cast %202 : vector<16x32xf32> to vector<2x8x32xf32>
    %208 = arith.truncf %207 : vector<2x8x32xf32> to vector<2x8x32xbf16>
    %cst_114 = arith.constant dense<0.000000e+00> : vector<2x8x8xf32>
    %209 = tpu.matmul %204, %206, %cst_114 {dimension_numbers = #tpu.dot_dimension_numbers<[2], [2], [1], [1], [0, 0, 0, 1, 1, 1], [0], [0]>} : vector<2x8x32xbf16>, vector<2x8x32xbf16>, vector<2x8x8xf32> -> vector<2x8x8xf32>
    %cst_115 = arith.constant 0.176776692 : f32
    %210 = vector.broadcast %cst_115 : f32 to vector<2x8x8xf32>
    %211 = arith.mulf %209, %210 : vector<2x8x8xf32>
    %cst_116 = arith.constant 0.000000e+00 : f32
    %212 = vector.broadcast %cst_116 : f32 to vector<1x8x8xf32>
    %213 = arith.cmpf one, %4, %212 : vector<1x8x8xf32>
    %cst_117 = arith.constant -1.000000e+09 : f32
    %214 = vector.shape_cast %213 : vector<1x8x8xi1> to vector<1x8x8xi1>
    %215 = vector.broadcast %214 : vector<1x8x8xi1> to vector<2x8x8xi1>
    %216 = vector.broadcast %cst_117 : f32 to vector<2x8x8xf32>
    %217 = arith.select %215, %211, %216 : vector<2x8x8xi1>, vector<2x8x8xf32>
    %cst_118 = arith.constant dense<0xFF800000> : vector<2x8xf32>
    %218 = vector.multi_reduction <maximumf>, %217, %cst_118 [2] : vector<2x8x8xf32> to vector<2x8xf32>
    %219 = vector.shape_cast %218 : vector<2x8xf32> to vector<2x8x1xf32>
    %220 = vector.broadcast %219 : vector<2x8x1xf32> to vector<2x8x8xf32>
    %221 = arith.subf %217, %220 : vector<2x8x8xf32>
    %222 = math.exp %221 : vector<2x8x8xf32>
    %cst_119 = arith.constant dense<0.000000e+00> : vector<2x8xf32>
    %223 = vector.multi_reduction <add>, %222, %cst_119 [2] : vector<2x8x8xf32> to vector<2x8xf32>
    %224 = vector.shape_cast %223 : vector<2x8xf32> to vector<2x8x1xf32>
    %225 = tpu.reciprocal %224 {approx = true} : vector<2x8x1xf32> -> vector<2x8x1xf32>
    %226 = vector.broadcast %225 : vector<2x8x1xf32> to vector<2x8x8xf32>
    %227 = arith.mulf %222, %226 : vector<2x8x8xf32>
    %228 = arith.truncf %227 : vector<2x8x8xf32> to vector<2x8x8xbf16>
    %cst_120 = arith.constant dense<0.000000e+00> : vector<2x8x32xf32>
    %229 = tpu.matmul %228, %208, %cst_120 {dimension_numbers = #tpu.dot_dimension_numbers<[2], [1], [1], [2], [0, 0, 0, 1, 1, 2], [0], [0]>} : vector<2x8x8xbf16>, vector<2x8x32xbf16>, vector<2x8x32xf32> -> vector<2x8x32xf32>
    %230 = vector.shape_cast %229 : vector<2x8x32xf32> to vector<16x32xf32>
    %231 = arith.truncf %230 : vector<16x32xf32> to vector<16x32xbf16>
    %c3_121 = arith.constant 3 : index
    %c0_122 = arith.constant 0 : index
    %c0_123 = arith.constant 0 : index
    %232 = vector.load %arg9[%c3_121, %c0_122, %c0_123] : memref<4x32x128xbf16, #tpu.memory_space<vmem>>, vector<1x32x128xbf16>
    %233 = vector.shape_cast %232 : vector<1x32x128xbf16> to vector<32x128xbf16>
    %cst_124 = arith.constant dense<0.000000e+00> : vector<16x128xf32>
    %234 = tpu.matmul %231, %233, %cst_124 {dimension_numbers = #tpu.dot_dimension_numbers<[1], [0], [0], [1], [0, 0, 1, 1], [], []>} : vector<16x32xbf16>, vector<32x128xbf16>, vector<16x128xf32> -> vector<16x128xf32>
    %235 = arith.addf %184, %234 : vector<16x128xf32>
    %c0_125 = arith.constant 0 : index
    %c0_126 = arith.constant 0 : index
    %236 = vector.load %arg10[%c0_125, %c0_126] : memref<1x128xf32, #tpu.memory_space<vmem>>, vector<1x128xf32>
    %237 = vector.broadcast %236 : vector<1x128xf32> to vector<16x128xf32>
    %238 = arith.addf %235, %237 : vector<16x128xf32>
    %239 = arith.addf %1, %238 : vector<16x128xf32>
    %c1_127 = arith.constant 1 : index
    %c0_128 = arith.constant 0 : index
    %240 = vector.load %arg5[%c1_127, %c0_128] : memref<3x128xf32, #tpu.memory_space<vmem>>, vector<1x128xf32>
    %c1_129 = arith.constant 1 : index
    %c0_130 = arith.constant 0 : index
    %241 = vector.load %arg6[%c1_129, %c0_130] : memref<3x128xf32, #tpu.memory_space<vmem>>, vector<1x128xf32>
    %cst_131 = arith.constant dense<0.000000e+00> : vector<16xf32>
    %242 = vector.multi_reduction <add>, %239, %cst_131 [1] : vector<16x128xf32> to vector<16xf32>
    %243 = vector.shape_cast %242 : vector<16xf32> to vector<16x1xf32>
    %cst_132 = arith.constant 1.280000e+02 : f32
    %244 = vector.broadcast %cst_132 : f32 to vector<16x1xf32>
    %245 = arith.divf %243, %244 : vector<16x1xf32>
    %246 = vector.broadcast %245 : vector<16x1xf32> to vector<16x128xf32>
    %247 = arith.subf %239, %246 : vector<16x128xf32>
    %248 = arith.mulf %247, %247 : vector<16x128xf32>
    %cst_133 = arith.constant dense<0.000000e+00> : vector<16xf32>
    %249 = vector.multi_reduction <add>, %248, %cst_133 [1] : vector<16x128xf32> to vector<16xf32>
    %250 = vector.shape_cast %249 : vector<16xf32> to vector<16x1xf32>
    %cst_134 = arith.constant 0.00787401571 : f32
    %251 = vector.broadcast %cst_134 : f32 to vector<16x1xf32>
    %252 = arith.mulf %250, %251 : vector<16x1xf32>
    %253 = math.sqrt %252 : vector<16x1xf32>
    %cst_135 = arith.constant 9.99999997E-7 : f32
    %254 = vector.broadcast %cst_135 : f32 to vector<16x1xf32>
    %255 = arith.addf %253, %254 : vector<16x1xf32>
    %256 = tpu.reciprocal %255 : vector<16x1xf32> -> vector<16x1xf32>
    %257 = vector.broadcast %256 : vector<16x1xf32> to vector<16x128xf32>
    %258 = arith.mulf %247, %257 : vector<16x128xf32>
    %259 = vector.broadcast %240 : vector<1x128xf32> to vector<16x128xf32>
    %260 = arith.mulf %259, %258 : vector<16x128xf32>
    %261 = vector.broadcast %241 : vector<1x128xf32> to vector<16x128xf32>
    %262 = arith.addf %260, %261 : vector<16x128xf32>
    %263 = arith.truncf %262 : vector<16x128xf32> to vector<16x128xbf16>
    %264 = arith.truncf %3 : vector<32x128xf32> to vector<32x128xbf16>
    %cst_136 = arith.constant 0.000000e+00 : f32
    %265 = vector.broadcast %cst_136 : f32 to vector<16x128xf32>
    %c0_137 = arith.constant 0 : index
    %c0_138 = arith.constant 0 : index
    %c0_139 = arith.constant 0 : index
    %266 = vector.load %arg11[%c0_137, %c0_138, %c0_139] : memref<12x128x32xbf16, #tpu.memory_space<vmem>>, vector<1x128x32xbf16>
    %267 = vector.shape_cast %266 : vector<1x128x32xbf16> to vector<128x32xbf16>
    %cst_140 = arith.constant dense<0.000000e+00> : vector<16x32xf32>
    %268 = tpu.matmul %263, %267, %cst_140 {dimension_numbers = #tpu.dot_dimension_numbers<[1], [0], [0], [1], [0, 0, 1, 1], [], []>} : vector<16x128xbf16>, vector<128x32xbf16>, vector<16x32xf32> -> vector<16x32xf32>
    %c0_141 = arith.constant 0 : index
    %c0_142 = arith.constant 0 : index
    %269 = vector.load %arg12[%c0_141, %c0_142] : memref<12x32xf32, #tpu.memory_space<vmem>>, vector<1x32xf32>
    %270 = vector.broadcast %269 : vector<1x32xf32> to vector<16x32xf32>
    %271 = arith.addf %268, %270 : vector<16x32xf32>
    %c4_143 = arith.constant 4 : index
    %c0_144 = arith.constant 0 : index
    %c0_145 = arith.constant 0 : index
    %272 = vector.load %arg11[%c4_143, %c0_144, %c0_145] : memref<12x128x32xbf16, #tpu.memory_space<vmem>>, vector<1x128x32xbf16>
    %273 = vector.shape_cast %272 : vector<1x128x32xbf16> to vector<128x32xbf16>
    %cst_146 = arith.constant dense<0.000000e+00> : vector<32x32xf32>
    %274 = tpu.matmul %264, %273, %cst_146 {dimension_numbers = #tpu.dot_dimension_numbers<[1], [0], [0], [1], [0, 0, 1, 1], [], []>} : vector<32x128xbf16>, vector<128x32xbf16>, vector<32x32xf32> -> vector<32x32xf32>
    %c4_147 = arith.constant 4 : index
    %c0_148 = arith.constant 0 : index
    %275 = vector.load %arg12[%c4_147, %c0_148] : memref<12x32xf32, #tpu.memory_space<vmem>>, vector<1x32xf32>
    %276 = vector.broadcast %275 : vector<1x32xf32> to vector<32x32xf32>
    %277 = arith.addf %274, %276 : vector<32x32xf32>
    %c8_149 = arith.constant 8 : index
    %c0_150 = arith.constant 0 : index
    %c0_151 = arith.constant 0 : index
    %278 = vector.load %arg11[%c8_149, %c0_150, %c0_151] : memref<12x128x32xbf16, #tpu.memory_space<vmem>>, vector<1x128x32xbf16>
    %279 = vector.shape_cast %278 : vector<1x128x32xbf16> to vector<128x32xbf16>
    %cst_152 = arith.constant dense<0.000000e+00> : vector<32x32xf32>
    %280 = tpu.matmul %264, %279, %cst_152 {dimension_numbers = #tpu.dot_dimension_numbers<[1], [0], [0], [1], [0, 0, 1, 1], [], []>} : vector<32x128xbf16>, vector<128x32xbf16>, vector<32x32xf32> -> vector<32x32xf32>
    %c8_153 = arith.constant 8 : index
    %c0_154 = arith.constant 0 : index
    %281 = vector.load %arg12[%c8_153, %c0_154] : memref<12x32xf32, #tpu.memory_space<vmem>>, vector<1x32xf32>
    %282 = vector.broadcast %281 : vector<1x32xf32> to vector<32x32xf32>
    %283 = arith.addf %280, %282 : vector<32x32xf32>
    %284 = vector.shape_cast %271 : vector<16x32xf32> to vector<2x8x32xf32>
    %285 = arith.truncf %284 : vector<2x8x32xf32> to vector<2x8x32xbf16>
    %286 = vector.shape_cast %277 : vector<32x32xf32> to vector<2x16x32xf32>
    %287 = arith.truncf %286 : vector<2x16x32xf32> to vector<2x16x32xbf16>
    %288 = vector.shape_cast %283 : vector<32x32xf32> to vector<2x16x32xf32>
    %289 = arith.truncf %288 : vector<2x16x32xf32> to vector<2x16x32xbf16>
    %cst_155 = arith.constant dense<0.000000e+00> : vector<2x8x16xf32>
    %290 = tpu.matmul %285, %287, %cst_155 {dimension_numbers = #tpu.dot_dimension_numbers<[2], [2], [1], [1], [0, 0, 0, 1, 1, 1], [0], [0]>} : vector<2x8x32xbf16>, vector<2x16x32xbf16>, vector<2x8x16xf32> -> vector<2x8x16xf32>
    %cst_156 = arith.constant 0.176776692 : f32
    %291 = vector.broadcast %cst_156 : f32 to vector<2x8x16xf32>
    %292 = arith.mulf %290, %291 : vector<2x8x16xf32>
    %cst_157 = arith.constant 0.000000e+00 : f32
    %293 = vector.broadcast %cst_157 : f32 to vector<2x1x16xf32>
    %294 = arith.cmpf one, %5, %293 : vector<2x1x16xf32>
    %cst_158 = arith.constant -1.000000e+09 : f32
    %295 = vector.shape_cast %294 : vector<2x1x16xi1> to vector<2x1x16xi1>
    %296 = vector.broadcast %295 : vector<2x1x16xi1> to vector<2x8x16xi1>
    %297 = vector.broadcast %cst_158 : f32 to vector<2x8x16xf32>
    %298 = arith.select %296, %292, %297 : vector<2x8x16xi1>, vector<2x8x16xf32>
    %cst_159 = arith.constant dense<0xFF800000> : vector<2x8xf32>
    %299 = vector.multi_reduction <maximumf>, %298, %cst_159 [2] : vector<2x8x16xf32> to vector<2x8xf32>
    %300 = vector.shape_cast %299 : vector<2x8xf32> to vector<2x8x1xf32>
    %301 = vector.broadcast %300 : vector<2x8x1xf32> to vector<2x8x16xf32>
    %302 = arith.subf %298, %301 : vector<2x8x16xf32>
    %303 = math.exp %302 : vector<2x8x16xf32>
    %cst_160 = arith.constant dense<0.000000e+00> : vector<2x8xf32>
    %304 = vector.multi_reduction <add>, %303, %cst_160 [2] : vector<2x8x16xf32> to vector<2x8xf32>
    %305 = vector.shape_cast %304 : vector<2x8xf32> to vector<2x8x1xf32>
    %306 = tpu.reciprocal %305 {approx = true} : vector<2x8x1xf32> -> vector<2x8x1xf32>
    %307 = vector.broadcast %306 : vector<2x8x1xf32> to vector<2x8x16xf32>
    %308 = arith.mulf %303, %307 : vector<2x8x16xf32>
    %309 = arith.truncf %308 : vector<2x8x16xf32> to vector<2x8x16xbf16>
    %cst_161 = arith.constant dense<0.000000e+00> : vector<2x8x32xf32>
    %310 = tpu.matmul %309, %289, %cst_161 {dimension_numbers = #tpu.dot_dimension_numbers<[2], [1], [1], [2], [0, 0, 0, 1, 1, 2], [0], [0]>} : vector<2x8x16xbf16>, vector<2x16x32xbf16>, vector<2x8x32xf32> -> vector<2x8x32xf32>
    %311 = vector.shape_cast %310 : vector<2x8x32xf32> to vector<16x32xf32>
    %312 = arith.truncf %311 : vector<16x32xf32> to vector<16x32xbf16>
    %c0_162 = arith.constant 0 : index
    %c0_163 = arith.constant 0 : index
    %c0_164 = arith.constant 0 : index
    %313 = vector.load %arg13[%c0_162, %c0_163, %c0_164] : memref<4x32x128xbf16, #tpu.memory_space<vmem>>, vector<1x32x128xbf16>
    %314 = vector.shape_cast %313 : vector<1x32x128xbf16> to vector<32x128xbf16>
    %cst_165 = arith.constant dense<0.000000e+00> : vector<16x128xf32>
    %315 = tpu.matmul %312, %314, %cst_165 {dimension_numbers = #tpu.dot_dimension_numbers<[1], [0], [0], [1], [0, 0, 1, 1], [], []>} : vector<16x32xbf16>, vector<32x128xbf16>, vector<16x128xf32> -> vector<16x128xf32>
    %316 = arith.addf %265, %315 : vector<16x128xf32>
    %c1_166 = arith.constant 1 : index
    %c0_167 = arith.constant 0 : index
    %c0_168 = arith.constant 0 : index
    %317 = vector.load %arg11[%c1_166, %c0_167, %c0_168] : memref<12x128x32xbf16, #tpu.memory_space<vmem>>, vector<1x128x32xbf16>
    %318 = vector.shape_cast %317 : vector<1x128x32xbf16> to vector<128x32xbf16>
    %cst_169 = arith.constant dense<0.000000e+00> : vector<16x32xf32>
    %319 = tpu.matmul %263, %318, %cst_169 {dimension_numbers = #tpu.dot_dimension_numbers<[1], [0], [0], [1], [0, 0, 1, 1], [], []>} : vector<16x128xbf16>, vector<128x32xbf16>, vector<16x32xf32> -> vector<16x32xf32>
    %c1_170 = arith.constant 1 : index
    %c0_171 = arith.constant 0 : index
    %320 = vector.load %arg12[%c1_170, %c0_171] : memref<12x32xf32, #tpu.memory_space<vmem>>, vector<1x32xf32>
    %321 = vector.broadcast %320 : vector<1x32xf32> to vector<16x32xf32>
    %322 = arith.addf %319, %321 : vector<16x32xf32>
    %c5_172 = arith.constant 5 : index
    %c0_173 = arith.constant 0 : index
    %c0_174 = arith.constant 0 : index
    %323 = vector.load %arg11[%c5_172, %c0_173, %c0_174] : memref<12x128x32xbf16, #tpu.memory_space<vmem>>, vector<1x128x32xbf16>
    %324 = vector.shape_cast %323 : vector<1x128x32xbf16> to vector<128x32xbf16>
    %cst_175 = arith.constant dense<0.000000e+00> : vector<32x32xf32>
    %325 = tpu.matmul %264, %324, %cst_175 {dimension_numbers = #tpu.dot_dimension_numbers<[1], [0], [0], [1], [0, 0, 1, 1], [], []>} : vector<32x128xbf16>, vector<128x32xbf16>, vector<32x32xf32> -> vector<32x32xf32>
    %c5_176 = arith.constant 5 : index
    %c0_177 = arith.constant 0 : index
    %326 = vector.load %arg12[%c5_176, %c0_177] : memref<12x32xf32, #tpu.memory_space<vmem>>, vector<1x32xf32>
    %327 = vector.broadcast %326 : vector<1x32xf32> to vector<32x32xf32>
    %328 = arith.addf %325, %327 : vector<32x32xf32>
    %c9_178 = arith.constant 9 : index
    %c0_179 = arith.constant 0 : index
    %c0_180 = arith.constant 0 : index
    %329 = vector.load %arg11[%c9_178, %c0_179, %c0_180] : memref<12x128x32xbf16, #tpu.memory_space<vmem>>, vector<1x128x32xbf16>
    %330 = vector.shape_cast %329 : vector<1x128x32xbf16> to vector<128x32xbf16>
    %cst_181 = arith.constant dense<0.000000e+00> : vector<32x32xf32>
    %331 = tpu.matmul %264, %330, %cst_181 {dimension_numbers = #tpu.dot_dimension_numbers<[1], [0], [0], [1], [0, 0, 1, 1], [], []>} : vector<32x128xbf16>, vector<128x32xbf16>, vector<32x32xf32> -> vector<32x32xf32>
    %c9_182 = arith.constant 9 : index
    %c0_183 = arith.constant 0 : index
    %332 = vector.load %arg12[%c9_182, %c0_183] : memref<12x32xf32, #tpu.memory_space<vmem>>, vector<1x32xf32>
    %333 = vector.broadcast %332 : vector<1x32xf32> to vector<32x32xf32>
    %334 = arith.addf %331, %333 : vector<32x32xf32>
    %335 = vector.shape_cast %322 : vector<16x32xf32> to vector<2x8x32xf32>
    %336 = arith.truncf %335 : vector<2x8x32xf32> to vector<2x8x32xbf16>
    %337 = vector.shape_cast %328 : vector<32x32xf32> to vector<2x16x32xf32>
    %338 = arith.truncf %337 : vector<2x16x32xf32> to vector<2x16x32xbf16>
    %339 = vector.shape_cast %334 : vector<32x32xf32> to vector<2x16x32xf32>
    %340 = arith.truncf %339 : vector<2x16x32xf32> to vector<2x16x32xbf16>
    %cst_184 = arith.constant dense<0.000000e+00> : vector<2x8x16xf32>
    %341 = tpu.matmul %336, %338, %cst_184 {dimension_numbers = #tpu.dot_dimension_numbers<[2], [2], [1], [1], [0, 0, 0, 1, 1, 1], [0], [0]>} : vector<2x8x32xbf16>, vector<2x16x32xbf16>, vector<2x8x16xf32> -> vector<2x8x16xf32>
    %cst_185 = arith.constant 0.176776692 : f32
    %342 = vector.broadcast %cst_185 : f32 to vector<2x8x16xf32>
    %343 = arith.mulf %341, %342 : vector<2x8x16xf32>
    %cst_186 = arith.constant 0.000000e+00 : f32
    %344 = vector.broadcast %cst_186 : f32 to vector<2x1x16xf32>
    %345 = arith.cmpf one, %5, %344 : vector<2x1x16xf32>
    %cst_187 = arith.constant -1.000000e+09 : f32
    %346 = vector.shape_cast %345 : vector<2x1x16xi1> to vector<2x1x16xi1>
    %347 = vector.broadcast %346 : vector<2x1x16xi1> to vector<2x8x16xi1>
    %348 = vector.broadcast %cst_187 : f32 to vector<2x8x16xf32>
    %349 = arith.select %347, %343, %348 : vector<2x8x16xi1>, vector<2x8x16xf32>
    %cst_188 = arith.constant dense<0xFF800000> : vector<2x8xf32>
    %350 = vector.multi_reduction <maximumf>, %349, %cst_188 [2] : vector<2x8x16xf32> to vector<2x8xf32>
    %351 = vector.shape_cast %350 : vector<2x8xf32> to vector<2x8x1xf32>
    %352 = vector.broadcast %351 : vector<2x8x1xf32> to vector<2x8x16xf32>
    %353 = arith.subf %349, %352 : vector<2x8x16xf32>
    %354 = math.exp %353 : vector<2x8x16xf32>
    %cst_189 = arith.constant dense<0.000000e+00> : vector<2x8xf32>
    %355 = vector.multi_reduction <add>, %354, %cst_189 [2] : vector<2x8x16xf32> to vector<2x8xf32>
    %356 = vector.shape_cast %355 : vector<2x8xf32> to vector<2x8x1xf32>
    %357 = tpu.reciprocal %356 {approx = true} : vector<2x8x1xf32> -> vector<2x8x1xf32>
    %358 = vector.broadcast %357 : vector<2x8x1xf32> to vector<2x8x16xf32>
    %359 = arith.mulf %354, %358 : vector<2x8x16xf32>
    %360 = arith.truncf %359 : vector<2x8x16xf32> to vector<2x8x16xbf16>
    %cst_190 = arith.constant dense<0.000000e+00> : vector<2x8x32xf32>
    %361 = tpu.matmul %360, %340, %cst_190 {dimension_numbers = #tpu.dot_dimension_numbers<[2], [1], [1], [2], [0, 0, 0, 1, 1, 2], [0], [0]>} : vector<2x8x16xbf16>, vector<2x16x32xbf16>, vector<2x8x32xf32> -> vector<2x8x32xf32>
    %362 = vector.shape_cast %361 : vector<2x8x32xf32> to vector<16x32xf32>
    %363 = arith.truncf %362 : vector<16x32xf32> to vector<16x32xbf16>
    %c1_191 = arith.constant 1 : index
    %c0_192 = arith.constant 0 : index
    %c0_193 = arith.constant 0 : index
    %364 = vector.load %arg13[%c1_191, %c0_192, %c0_193] : memref<4x32x128xbf16, #tpu.memory_space<vmem>>, vector<1x32x128xbf16>
    %365 = vector.shape_cast %364 : vector<1x32x128xbf16> to vector<32x128xbf16>
    %cst_194 = arith.constant dense<0.000000e+00> : vector<16x128xf32>
    %366 = tpu.matmul %363, %365, %cst_194 {dimension_numbers = #tpu.dot_dimension_numbers<[1], [0], [0], [1], [0, 0, 1, 1], [], []>} : vector<16x32xbf16>, vector<32x128xbf16>, vector<16x128xf32> -> vector<16x128xf32>
    %367 = arith.addf %316, %366 : vector<16x128xf32>
    %c2_195 = arith.constant 2 : index
    %c0_196 = arith.constant 0 : index
    %c0_197 = arith.constant 0 : index
    %368 = vector.load %arg11[%c2_195, %c0_196, %c0_197] : memref<12x128x32xbf16, #tpu.memory_space<vmem>>, vector<1x128x32xbf16>
    %369 = vector.shape_cast %368 : vector<1x128x32xbf16> to vector<128x32xbf16>
    %cst_198 = arith.constant dense<0.000000e+00> : vector<16x32xf32>
    %370 = tpu.matmul %263, %369, %cst_198 {dimension_numbers = #tpu.dot_dimension_numbers<[1], [0], [0], [1], [0, 0, 1, 1], [], []>} : vector<16x128xbf16>, vector<128x32xbf16>, vector<16x32xf32> -> vector<16x32xf32>
    %c2_199 = arith.constant 2 : index
    %c0_200 = arith.constant 0 : index
    %371 = vector.load %arg12[%c2_199, %c0_200] : memref<12x32xf32, #tpu.memory_space<vmem>>, vector<1x32xf32>
    %372 = vector.broadcast %371 : vector<1x32xf32> to vector<16x32xf32>
    %373 = arith.addf %370, %372 : vector<16x32xf32>
    %c6_201 = arith.constant 6 : index
    %c0_202 = arith.constant 0 : index
    %c0_203 = arith.constant 0 : index
    %374 = vector.load %arg11[%c6_201, %c0_202, %c0_203] : memref<12x128x32xbf16, #tpu.memory_space<vmem>>, vector<1x128x32xbf16>
    %375 = vector.shape_cast %374 : vector<1x128x32xbf16> to vector<128x32xbf16>
    %cst_204 = arith.constant dense<0.000000e+00> : vector<32x32xf32>
    %376 = tpu.matmul %264, %375, %cst_204 {dimension_numbers = #tpu.dot_dimension_numbers<[1], [0], [0], [1], [0, 0, 1, 1], [], []>} : vector<32x128xbf16>, vector<128x32xbf16>, vector<32x32xf32> -> vector<32x32xf32>
    %c6_205 = arith.constant 6 : index
    %c0_206 = arith.constant 0 : index
    %377 = vector.load %arg12[%c6_205, %c0_206] : memref<12x32xf32, #tpu.memory_space<vmem>>, vector<1x32xf32>
    %378 = vector.broadcast %377 : vector<1x32xf32> to vector<32x32xf32>
    %379 = arith.addf %376, %378 : vector<32x32xf32>
    %c10_207 = arith.constant 10 : index
    %c0_208 = arith.constant 0 : index
    %c0_209 = arith.constant 0 : index
    %380 = vector.load %arg11[%c10_207, %c0_208, %c0_209] : memref<12x128x32xbf16, #tpu.memory_space<vmem>>, vector<1x128x32xbf16>
    %381 = vector.shape_cast %380 : vector<1x128x32xbf16> to vector<128x32xbf16>
    %cst_210 = arith.constant dense<0.000000e+00> : vector<32x32xf32>
    %382 = tpu.matmul %264, %381, %cst_210 {dimension_numbers = #tpu.dot_dimension_numbers<[1], [0], [0], [1], [0, 0, 1, 1], [], []>} : vector<32x128xbf16>, vector<128x32xbf16>, vector<32x32xf32> -> vector<32x32xf32>
    %c10_211 = arith.constant 10 : index
    %c0_212 = arith.constant 0 : index
    %383 = vector.load %arg12[%c10_211, %c0_212] : memref<12x32xf32, #tpu.memory_space<vmem>>, vector<1x32xf32>
    %384 = vector.broadcast %383 : vector<1x32xf32> to vector<32x32xf32>
    %385 = arith.addf %382, %384 : vector<32x32xf32>
    %386 = vector.shape_cast %373 : vector<16x32xf32> to vector<2x8x32xf32>
    %387 = arith.truncf %386 : vector<2x8x32xf32> to vector<2x8x32xbf16>
    %388 = vector.shape_cast %379 : vector<32x32xf32> to vector<2x16x32xf32>
    %389 = arith.truncf %388 : vector<2x16x32xf32> to vector<2x16x32xbf16>
    %390 = vector.shape_cast %385 : vector<32x32xf32> to vector<2x16x32xf32>
    %391 = arith.truncf %390 : vector<2x16x32xf32> to vector<2x16x32xbf16>
    %cst_213 = arith.constant dense<0.000000e+00> : vector<2x8x16xf32>
    %392 = tpu.matmul %387, %389, %cst_213 {dimension_numbers = #tpu.dot_dimension_numbers<[2], [2], [1], [1], [0, 0, 0, 1, 1, 1], [0], [0]>} : vector<2x8x32xbf16>, vector<2x16x32xbf16>, vector<2x8x16xf32> -> vector<2x8x16xf32>
    %cst_214 = arith.constant 0.176776692 : f32
    %393 = vector.broadcast %cst_214 : f32 to vector<2x8x16xf32>
    %394 = arith.mulf %392, %393 : vector<2x8x16xf32>
    %cst_215 = arith.constant 0.000000e+00 : f32
    %395 = vector.broadcast %cst_215 : f32 to vector<2x1x16xf32>
    %396 = arith.cmpf one, %5, %395 : vector<2x1x16xf32>
    %cst_216 = arith.constant -1.000000e+09 : f32
    %397 = vector.shape_cast %396 : vector<2x1x16xi1> to vector<2x1x16xi1>
    %398 = vector.broadcast %397 : vector<2x1x16xi1> to vector<2x8x16xi1>
    %399 = vector.broadcast %cst_216 : f32 to vector<2x8x16xf32>
    %400 = arith.select %398, %394, %399 : vector<2x8x16xi1>, vector<2x8x16xf32>
    %cst_217 = arith.constant dense<0xFF800000> : vector<2x8xf32>
    %401 = vector.multi_reduction <maximumf>, %400, %cst_217 [2] : vector<2x8x16xf32> to vector<2x8xf32>
    %402 = vector.shape_cast %401 : vector<2x8xf32> to vector<2x8x1xf32>
    %403 = vector.broadcast %402 : vector<2x8x1xf32> to vector<2x8x16xf32>
    %404 = arith.subf %400, %403 : vector<2x8x16xf32>
    %405 = math.exp %404 : vector<2x8x16xf32>
    %cst_218 = arith.constant dense<0.000000e+00> : vector<2x8xf32>
    %406 = vector.multi_reduction <add>, %405, %cst_218 [2] : vector<2x8x16xf32> to vector<2x8xf32>
    %407 = vector.shape_cast %406 : vector<2x8xf32> to vector<2x8x1xf32>
    %408 = tpu.reciprocal %407 {approx = true} : vector<2x8x1xf32> -> vector<2x8x1xf32>
    %409 = vector.broadcast %408 : vector<2x8x1xf32> to vector<2x8x16xf32>
    %410 = arith.mulf %405, %409 : vector<2x8x16xf32>
    %411 = arith.truncf %410 : vector<2x8x16xf32> to vector<2x8x16xbf16>
    %cst_219 = arith.constant dense<0.000000e+00> : vector<2x8x32xf32>
    %412 = tpu.matmul %411, %391, %cst_219 {dimension_numbers = #tpu.dot_dimension_numbers<[2], [1], [1], [2], [0, 0, 0, 1, 1, 2], [0], [0]>} : vector<2x8x16xbf16>, vector<2x16x32xbf16>, vector<2x8x32xf32> -> vector<2x8x32xf32>
    %413 = vector.shape_cast %412 : vector<2x8x32xf32> to vector<16x32xf32>
    %414 = arith.truncf %413 : vector<16x32xf32> to vector<16x32xbf16>
    %c2_220 = arith.constant 2 : index
    %c0_221 = arith.constant 0 : index
    %c0_222 = arith.constant 0 : index
    %415 = vector.load %arg13[%c2_220, %c0_221, %c0_222] : memref<4x32x128xbf16, #tpu.memory_space<vmem>>, vector<1x32x128xbf16>
    %416 = vector.shape_cast %415 : vector<1x32x128xbf16> to vector<32x128xbf16>
    %cst_223 = arith.constant dense<0.000000e+00> : vector<16x128xf32>
    %417 = tpu.matmul %414, %416, %cst_223 {dimension_numbers = #tpu.dot_dimension_numbers<[1], [0], [0], [1], [0, 0, 1, 1], [], []>} : vector<16x32xbf16>, vector<32x128xbf16>, vector<16x128xf32> -> vector<16x128xf32>
    %418 = arith.addf %367, %417 : vector<16x128xf32>
    %c3_224 = arith.constant 3 : index
    %c0_225 = arith.constant 0 : index
    %c0_226 = arith.constant 0 : index
    %419 = vector.load %arg11[%c3_224, %c0_225, %c0_226] : memref<12x128x32xbf16, #tpu.memory_space<vmem>>, vector<1x128x32xbf16>
    %420 = vector.shape_cast %419 : vector<1x128x32xbf16> to vector<128x32xbf16>
    %cst_227 = arith.constant dense<0.000000e+00> : vector<16x32xf32>
    %421 = tpu.matmul %263, %420, %cst_227 {dimension_numbers = #tpu.dot_dimension_numbers<[1], [0], [0], [1], [0, 0, 1, 1], [], []>} : vector<16x128xbf16>, vector<128x32xbf16>, vector<16x32xf32> -> vector<16x32xf32>
    %c3_228 = arith.constant 3 : index
    %c0_229 = arith.constant 0 : index
    %422 = vector.load %arg12[%c3_228, %c0_229] : memref<12x32xf32, #tpu.memory_space<vmem>>, vector<1x32xf32>
    %423 = vector.broadcast %422 : vector<1x32xf32> to vector<16x32xf32>
    %424 = arith.addf %421, %423 : vector<16x32xf32>
    %c7_230 = arith.constant 7 : index
    %c0_231 = arith.constant 0 : index
    %c0_232 = arith.constant 0 : index
    %425 = vector.load %arg11[%c7_230, %c0_231, %c0_232] : memref<12x128x32xbf16, #tpu.memory_space<vmem>>, vector<1x128x32xbf16>
    %426 = vector.shape_cast %425 : vector<1x128x32xbf16> to vector<128x32xbf16>
    %cst_233 = arith.constant dense<0.000000e+00> : vector<32x32xf32>
    %427 = tpu.matmul %264, %426, %cst_233 {dimension_numbers = #tpu.dot_dimension_numbers<[1], [0], [0], [1], [0, 0, 1, 1], [], []>} : vector<32x128xbf16>, vector<128x32xbf16>, vector<32x32xf32> -> vector<32x32xf32>
    %c7_234 = arith.constant 7 : index
    %c0_235 = arith.constant 0 : index
    %428 = vector.load %arg12[%c7_234, %c0_235] : memref<12x32xf32, #tpu.memory_space<vmem>>, vector<1x32xf32>
    %429 = vector.broadcast %428 : vector<1x32xf32> to vector<32x32xf32>
    %430 = arith.addf %427, %429 : vector<32x32xf32>
    %c11_236 = arith.constant 11 : index
    %c0_237 = arith.constant 0 : index
    %c0_238 = arith.constant 0 : index
    %431 = vector.load %arg11[%c11_236, %c0_237, %c0_238] : memref<12x128x32xbf16, #tpu.memory_space<vmem>>, vector<1x128x32xbf16>
    %432 = vector.shape_cast %431 : vector<1x128x32xbf16> to vector<128x32xbf16>
    %cst_239 = arith.constant dense<0.000000e+00> : vector<32x32xf32>
    %433 = tpu.matmul %264, %432, %cst_239 {dimension_numbers = #tpu.dot_dimension_numbers<[1], [0], [0], [1], [0, 0, 1, 1], [], []>} : vector<32x128xbf16>, vector<128x32xbf16>, vector<32x32xf32> -> vector<32x32xf32>
    %c11_240 = arith.constant 11 : index
    %c0_241 = arith.constant 0 : index
    %434 = vector.load %arg12[%c11_240, %c0_241] : memref<12x32xf32, #tpu.memory_space<vmem>>, vector<1x32xf32>
    %435 = vector.broadcast %434 : vector<1x32xf32> to vector<32x32xf32>
    %436 = arith.addf %433, %435 : vector<32x32xf32>
    %437 = vector.shape_cast %424 : vector<16x32xf32> to vector<2x8x32xf32>
    %438 = arith.truncf %437 : vector<2x8x32xf32> to vector<2x8x32xbf16>
    %439 = vector.shape_cast %430 : vector<32x32xf32> to vector<2x16x32xf32>
    %440 = arith.truncf %439 : vector<2x16x32xf32> to vector<2x16x32xbf16>
    %441 = vector.shape_cast %436 : vector<32x32xf32> to vector<2x16x32xf32>
    %442 = arith.truncf %441 : vector<2x16x32xf32> to vector<2x16x32xbf16>
    %cst_242 = arith.constant dense<0.000000e+00> : vector<2x8x16xf32>
    %443 = tpu.matmul %438, %440, %cst_242 {dimension_numbers = #tpu.dot_dimension_numbers<[2], [2], [1], [1], [0, 0, 0, 1, 1, 1], [0], [0]>} : vector<2x8x32xbf16>, vector<2x16x32xbf16>, vector<2x8x16xf32> -> vector<2x8x16xf32>
    %cst_243 = arith.constant 0.176776692 : f32
    %444 = vector.broadcast %cst_243 : f32 to vector<2x8x16xf32>
    %445 = arith.mulf %443, %444 : vector<2x8x16xf32>
    %cst_244 = arith.constant 0.000000e+00 : f32
    %446 = vector.broadcast %cst_244 : f32 to vector<2x1x16xf32>
    %447 = arith.cmpf one, %5, %446 : vector<2x1x16xf32>
    %cst_245 = arith.constant -1.000000e+09 : f32
    %448 = vector.shape_cast %447 : vector<2x1x16xi1> to vector<2x1x16xi1>
    %449 = vector.broadcast %448 : vector<2x1x16xi1> to vector<2x8x16xi1>
    %450 = vector.broadcast %cst_245 : f32 to vector<2x8x16xf32>
    %451 = arith.select %449, %445, %450 : vector<2x8x16xi1>, vector<2x8x16xf32>
    %cst_246 = arith.constant dense<0xFF800000> : vector<2x8xf32>
    %452 = vector.multi_reduction <maximumf>, %451, %cst_246 [2] : vector<2x8x16xf32> to vector<2x8xf32>
    %453 = vector.shape_cast %452 : vector<2x8xf32> to vector<2x8x1xf32>
    %454 = vector.broadcast %453 : vector<2x8x1xf32> to vector<2x8x16xf32>
    %455 = arith.subf %451, %454 : vector<2x8x16xf32>
    %456 = math.exp %455 : vector<2x8x16xf32>
    %cst_247 = arith.constant dense<0.000000e+00> : vector<2x8xf32>
    %457 = vector.multi_reduction <add>, %456, %cst_247 [2] : vector<2x8x16xf32> to vector<2x8xf32>
    %458 = vector.shape_cast %457 : vector<2x8xf32> to vector<2x8x1xf32>
    %459 = tpu.reciprocal %458 {approx = true} : vector<2x8x1xf32> -> vector<2x8x1xf32>
    %460 = vector.broadcast %459 : vector<2x8x1xf32> to vector<2x8x16xf32>
    %461 = arith.mulf %456, %460 : vector<2x8x16xf32>
    %462 = arith.truncf %461 : vector<2x8x16xf32> to vector<2x8x16xbf16>
    %cst_248 = arith.constant dense<0.000000e+00> : vector<2x8x32xf32>
    %463 = tpu.matmul %462, %442, %cst_248 {dimension_numbers = #tpu.dot_dimension_numbers<[2], [1], [1], [2], [0, 0, 0, 1, 1, 2], [0], [0]>} : vector<2x8x16xbf16>, vector<2x16x32xbf16>, vector<2x8x32xf32> -> vector<2x8x32xf32>
    %464 = vector.shape_cast %463 : vector<2x8x32xf32> to vector<16x32xf32>
    %465 = arith.truncf %464 : vector<16x32xf32> to vector<16x32xbf16>
    %c3_249 = arith.constant 3 : index
    %c0_250 = arith.constant 0 : index
    %c0_251 = arith.constant 0 : index
    %466 = vector.load %arg13[%c3_249, %c0_250, %c0_251] : memref<4x32x128xbf16, #tpu.memory_space<vmem>>, vector<1x32x128xbf16>
    %467 = vector.shape_cast %466 : vector<1x32x128xbf16> to vector<32x128xbf16>
    %cst_252 = arith.constant dense<0.000000e+00> : vector<16x128xf32>
    %468 = tpu.matmul %465, %467, %cst_252 {dimension_numbers = #tpu.dot_dimension_numbers<[1], [0], [0], [1], [0, 0, 1, 1], [], []>} : vector<16x32xbf16>, vector<32x128xbf16>, vector<16x128xf32> -> vector<16x128xf32>
    %469 = arith.addf %418, %468 : vector<16x128xf32>
    %c0_253 = arith.constant 0 : index
    %c0_254 = arith.constant 0 : index
    %470 = vector.load %arg14[%c0_253, %c0_254] : memref<1x128xf32, #tpu.memory_space<vmem>>, vector<1x128xf32>
    %471 = vector.broadcast %470 : vector<1x128xf32> to vector<16x128xf32>
    %472 = arith.addf %469, %471 : vector<16x128xf32>
    %473 = arith.addf %239, %472 : vector<16x128xf32>
    %c2_255 = arith.constant 2 : index
    %c0_256 = arith.constant 0 : index
    %474 = vector.load %arg5[%c2_255, %c0_256] : memref<3x128xf32, #tpu.memory_space<vmem>>, vector<1x128xf32>
    %c2_257 = arith.constant 2 : index
    %c0_258 = arith.constant 0 : index
    %475 = vector.load %arg6[%c2_257, %c0_258] : memref<3x128xf32, #tpu.memory_space<vmem>>, vector<1x128xf32>
    %cst_259 = arith.constant dense<0.000000e+00> : vector<16xf32>
    %476 = vector.multi_reduction <add>, %473, %cst_259 [1] : vector<16x128xf32> to vector<16xf32>
    %477 = vector.shape_cast %476 : vector<16xf32> to vector<16x1xf32>
    %cst_260 = arith.constant 1.280000e+02 : f32
    %478 = vector.broadcast %cst_260 : f32 to vector<16x1xf32>
    %479 = arith.divf %477, %478 : vector<16x1xf32>
    %480 = vector.broadcast %479 : vector<16x1xf32> to vector<16x128xf32>
    %481 = arith.subf %473, %480 : vector<16x128xf32>
    %482 = arith.mulf %481, %481 : vector<16x128xf32>
    %cst_261 = arith.constant dense<0.000000e+00> : vector<16xf32>
    %483 = vector.multi_reduction <add>, %482, %cst_261 [1] : vector<16x128xf32> to vector<16xf32>
    %484 = vector.shape_cast %483 : vector<16xf32> to vector<16x1xf32>
    %cst_262 = arith.constant 0.00787401571 : f32
    %485 = vector.broadcast %cst_262 : f32 to vector<16x1xf32>
    %486 = arith.mulf %484, %485 : vector<16x1xf32>
    %487 = math.sqrt %486 : vector<16x1xf32>
    %cst_263 = arith.constant 9.99999997E-7 : f32
    %488 = vector.broadcast %cst_263 : f32 to vector<16x1xf32>
    %489 = arith.addf %487, %488 : vector<16x1xf32>
    %490 = tpu.reciprocal %489 : vector<16x1xf32> -> vector<16x1xf32>
    %491 = vector.broadcast %490 : vector<16x1xf32> to vector<16x128xf32>
    %492 = arith.mulf %481, %491 : vector<16x128xf32>
    %493 = vector.broadcast %474 : vector<1x128xf32> to vector<16x128xf32>
    %494 = arith.mulf %493, %492 : vector<16x128xf32>
    %495 = vector.broadcast %475 : vector<1x128xf32> to vector<16x128xf32>
    %496 = arith.addf %494, %495 : vector<16x128xf32>
    %497 = arith.truncf %496 : vector<16x128xf32> to vector<16x128xbf16>
    %c0_264 = arith.constant 0 : index
    %c0_265 = arith.constant 0 : index
    %498 = vector.load %arg15[%c0_264, %c0_265] : memref<128x256xbf16, #tpu.memory_space<vmem>>, vector<128x256xbf16>
    %cst_266 = arith.constant dense<0.000000e+00> : vector<16x256xf32>
    %499 = tpu.matmul %497, %498, %cst_266 {dimension_numbers = #tpu.dot_dimension_numbers<[1], [0], [0], [1], [0, 0, 1, 1], [], []>} : vector<16x128xbf16>, vector<128x256xbf16>, vector<16x256xf32> -> vector<16x256xf32>
    %c0_267 = arith.constant 0 : index
    %c0_268 = arith.constant 0 : index
    %500 = vector.load %arg16[%c0_267, %c0_268] : memref<1x256xf32, #tpu.memory_space<vmem>>, vector<1x256xf32>
    %501 = vector.broadcast %500 : vector<1x256xf32> to vector<16x256xf32>
    %502 = arith.addf %499, %501 : vector<16x256xf32>
    %cst_269 = arith.constant 0.000000e+00 : f32
    %503 = vector.broadcast %cst_269 : f32 to vector<16x256xf32>
    %504 = arith.maximumf %502, %503 : vector<16x256xf32>
    %505 = arith.truncf %504 : vector<16x256xf32> to vector<16x256xbf16>
    %c0_270 = arith.constant 0 : index
    %c0_271 = arith.constant 0 : index
    %506 = vector.load %arg17[%c0_270, %c0_271] : memref<256x128xbf16, #tpu.memory_space<vmem>>, vector<256x128xbf16>
    %cst_272 = arith.constant dense<0.000000e+00> : vector<16x128xf32>
    %507 = tpu.matmul %505, %506, %cst_272 {dimension_numbers = #tpu.dot_dimension_numbers<[1], [0], [0], [1], [0, 0, 1, 1], [], []>} : vector<16x256xbf16>, vector<256x128xbf16>, vector<16x128xf32> -> vector<16x128xf32>
    %c0_273 = arith.constant 0 : index
    %c0_274 = arith.constant 0 : index
    %508 = vector.load %arg18[%c0_273, %c0_274] : memref<1x128xf32, #tpu.memory_space<vmem>>, vector<1x128xf32>
    %509 = vector.broadcast %508 : vector<1x128xf32> to vector<16x128xf32>
    %510 = arith.addf %507, %509 : vector<16x128xf32>
    %511 = arith.addf %473, %510 : vector<16x128xf32>
    %512 = vector.shape_cast %511 : vector<16x128xf32> to vector<2x8x128xf32>
    %c0_275 = arith.constant 0 : index
    %c0_276 = arith.constant 0 : index
    %c0_277 = arith.constant 0 : index
    %513 = vector.load %arg19[%c0_275, %c0_276, %c0_277] : memref<2x8x128xf32, #tpu.memory_space<vmem>>, vector<2x8x128xf32>
    tpu.vector_store %arg19[%c0_275, %c0_276, %c0_277], %512 {strides = array<i32>} : memref<2x8x128xf32, #tpu.memory_space<vmem>>, vector<2x8x128xf32>,
    return
  }
  func.func @transform_0(%arg0: i32) -> (i32, i32, i32) {
    %c0_i32 = arith.constant 0 : i32
    %c0_i32_0 = arith.constant 0 : i32
    %c0_i32_1 = arith.constant 0 : i32
    return %arg0, %c0_i32, %c0_i32_0 : i32, i32, i32
  }
  func.func @transform_1(%arg0: i32) -> (i32, i32, i32) {
    %c0_i32 = arith.constant 0 : i32
    %c0_i32_0 = arith.constant 0 : i32
    %c0_i32_1 = arith.constant 0 : i32
    return %arg0, %c0_i32, %c0_i32_0 : i32, i32, i32
  }
  func.func @transform_2(%arg0: i32) -> (i32, i32, i32) {
    %c0_i32 = arith.constant 0 : i32
    %c0_i32_0 = arith.constant 0 : i32
    %c0_i32_1 = arith.constant 0 : i32
    %c0_i32_2 = arith.constant 0 : i32
    return %c0_i32, %c0_i32_0, %c0_i32_1 : i32, i32, i32
  }
  func.func @transform_3(%arg0: i32) -> (i32, i32, i32) {
    %c0_i32 = arith.constant 0 : i32
    %c0_i32_0 = arith.constant 0 : i32
    %c0_i32_1 = arith.constant 0 : i32
    return %arg0, %c0_i32, %c0_i32_0 : i32, i32, i32
  }
  func.func @transform_4(%arg0: i32) -> (i32, i32) {
    %c0_i32 = arith.constant 0 : i32
    %c0_i32_0 = arith.constant 0 : i32
    %c0_i32_1 = arith.constant 0 : i32
    return %c0_i32, %c0_i32_0 : i32, i32
  }
  func.func @transform_5(%arg0: i32) -> (i32, i32) {
    %c0_i32 = arith.constant 0 : i32
    %c0_i32_0 = arith.constant 0 : i32
    %c0_i32_1 = arith.constant 0 : i32
    return %c0_i32, %c0_i32_0 : i32, i32
  }
  func.func @transform_6(%arg0: i32) -> (i32, i32, i32) {
    %c0_i32 = arith.constant 0 : i32
    %c0_i32_0 = arith.constant 0 : i32
    %c0_i32_1 = arith.constant 0 : i32
    %c0_i32_2 = arith.constant 0 : i32
    return %c0_i32, %c0_i32_0, %c0_i32_1 : i32, i32, i32
  }
  func.func @transform_7(%arg0: i32) -> (i32, i32) {
    %c0_i32 = arith.constant 0 : i32
    %c0_i32_0 = arith.constant 0 : i32
    %c0_i32_1 = arith.constant 0 : i32
    return %c0_i32, %c0_i32_0 : i32, i32
  }
  func.func @transform_8(%arg0: i32) -> (i32, i32, i32) {
    %c0_i32 = arith.constant 0 : i32
    %c0_i32_0 = arith.constant 0 : i32
    %c0_i32_1 = arith.constant 0 : i32
    %c0_i32_2 = arith.constant 0 : i32
    return %c0_i32, %c0_i32_0, %c0_i32_1 : i32, i32, i32
  }
  func.func @transform_9(%arg0: i32) -> (i32, i32) {
    %c0_i32 = arith.constant 0 : i32
    %c0_i32_0 = arith.constant 0 : i32
    %c0_i32_1 = arith.constant 0 : i32
    return %c0_i32, %c0_i32_0 : i32, i32
  }
  func.func @transform_10(%arg0: i32) -> (i32, i32, i32) {
    %c0_i32 = arith.constant 0 : i32
    %c0_i32_0 = arith.constant 0 : i32
    %c0_i32_1 = arith.constant 0 : i32
    %c0_i32_2 = arith.constant 0 : i32
    return %c0_i32, %c0_i32_0, %c0_i32_1 : i32, i32, i32
  }
  func.func @transform_11(%arg0: i32) -> (i32, i32) {
    %c0_i32 = arith.constant 0 : i32
    %c0_i32_0 = arith.constant 0 : i32
    %c0_i32_1 = arith.constant 0 : i32
    return %c0_i32, %c0_i32_0 : i32, i32
  }
  func.func @transform_12(%arg0: i32) -> (i32, i32, i32) {
    %c0_i32 = arith.constant 0 : i32
    %c0_i32_0 = arith.constant 0 : i32
    %c0_i32_1 = arith.constant 0 : i32
    %c0_i32_2 = arith.constant 0 : i32
    return %c0_i32, %c0_i32_0, %c0_i32_1 : i32, i32, i32
  }
  func.func @transform_13(%arg0: i32) -> (i32, i32) {
    %c0_i32 = arith.constant 0 : i32
    %c0_i32_0 = arith.constant 0 : i32
    %c0_i32_1 = arith.constant 0 : i32
    return %c0_i32, %c0_i32_0 : i32, i32
  }
  func.func @transform_14(%arg0: i32) -> (i32, i32) {
    %c0_i32 = arith.constant 0 : i32
    %c0_i32_0 = arith.constant 0 : i32
    %c0_i32_1 = arith.constant 0 : i32
    return %c0_i32, %c0_i32_0 : i32, i32
  }
  func.func @transform_15(%arg0: i32) -> (i32, i32) {
    %c0_i32 = arith.constant 0 : i32
    %c0_i32_0 = arith.constant 0 : i32
    %c0_i32_1 = arith.constant 0 : i32
    return %c0_i32, %c0_i32_0 : i32, i32
  }
  func.func @transform_16(%arg0: i32) -> (i32, i32) {
    %c0_i32 = arith.constant 0 : i32
    %c0_i32_0 = arith.constant 0 : i32
    %c0_i32_1 = arith.constant 0 : i32
    return %c0_i32, %c0_i32_0 : i32, i32
  }
  func.func @transform_17(%arg0: i32) -> (i32, i32) {
    %c0_i32 = arith.constant 0 : i32
    %c0_i32_0 = arith.constant 0 : i32
    %c0_i32_1 = arith.constant 0 : i32
    return %c0_i32, %c0_i32_0 : i32, i32
  }
  func.func @transform_18(%arg0: i32) -> (i32, i32, i32) {
    %c0_i32 = arith.constant 0 : i32
    %c0_i32_0 = arith.constant 0 : i32
    %c0_i32_1 = arith.constant 0 : i32
    return %arg0, %c0_i32, %c0_i32_0 : i32, i32, i32
  }
}

</mosaic_0001>

<bundles_post_ra>
// kernel: tpu_custom_call.1
= control target key start
LH: loop header
LB: loop body
LE: loop exit
PB: predicated region body
PF: predicated region fallthrough
CT: control target
= control target key end

     0   :  { %s7011_s0 = inlined_call_operand.vmem [shape: f32[2,8,128], index: 0, kind: input, shape index: {}]   ;;  %s7012_s1 = inlined_call_operand.vmem [shape: f32[2,16,128], index: 1, kind: input, shape index: {}]   ;;  %s7013_s2 = inlined_call_operand.vmem [shape: f32[1,8,8], index: 2, kind: input, shape index: {}]   ;;  %s7014_s3 = inlined_call_operand.vmem [shape: f32[2,1,16], index: 3, kind: input, shape index: {}]   ;;  %s7015_s4 = inlined_call_operand.vmem [shape: f32[3,128], index: 4, kind: input, shape index: {}]   ;;  %s7016_s5 = inlined_call_operand.vmem [shape: f32[3,128], index: 5, kind: input, shape index: {}]   ;;  %s7017_s6 = inlined_call_operand.vmem [shape: bf16[12,128,32], index: 6, kind: input, shape index: {}]   ;;  %s7018_s7 = inlined_call_operand.vmem [shape: f32[12,32], index: 7, kind: input, shape index: {}]   ;;  %s7019_s8 = inlined_call_operand.vmem [shape: bf16[4,32,128], index: 8, kind: input, shape index: {}]   ;;  %s7020_s9 = inlined_call_operand.vmem [shape: f32[1,128], index: 9, kind: input, shape index: {}]   ;;  %s7021_s10 = inlined_call_operand.vmem [shape: bf16[12,128,32], index: 10, kind: input, shape index: {}]   ;;  %s7022_s11 = inlined_call_operand.vmem [shape: f32[12,32], index: 11, kind: input, shape index: {}]   ;;  %s7023_s12 = inlined_call_operand.vmem [shape: bf16[4,32,128], index: 12, kind: input, shape index: {}]   ;;  %s7024_s13 = inlined_call_operand.vmem [shape: f32[1,128], index: 13, kind: input, shape index: {}]   ;;  %s7025_s14 = inlined_call_operand.vmem [shape: bf16[128,256], index: 14, kind: input, shape index: {}]   ;;  %s7026_s15 = inlined_call_operand.vmem [shape: f32[1,256], index: 15, kind: input, shape index: {}]   ;;  %s7027_s16 = inlined_call_operand.vmem [shape: bf16[256,128], index: 16, kind: input, shape index: {}]   ;;  %s7028_s17 = inlined_call_operand.vmem [shape: f32[1,128], index: 17, kind: input, shape index: {}]   ;;  %s7029_s18 = inlined_call_operand.hbm [shape: f32[2,8,128], index: 18, kind: output, shape index: {}]  }
   0x1   :  { %7032 = sst [smem:[#allocation5_spill]] %s7011_s0 }
   0x2   :  { %7033 = sst [smem:[#allocation6_spill]] %s7012_s1 }
   0x3   :  { %7034 = sst [smem:[#allocation7_spill]] %s7013_s2 }
   0x4   :  { %s7035_s29 = sld [smem:[#allocation5_spill]] }
   0xa   :  { %v61_v0 = vld [vmem:[%s7035_s29] sm:$0xff]  ;;  %v62_v1 = vld [vmem:[%s7035_s29 + $0x8] sm:$0xff] }
   0xb   :  { %72 = vadd.xlane.f32.xlu0 %v61_v0 }
  0x13   :  { %74 = vadd.xlane.f32.xlu0 %v62_v1 }
  0x14   :  { %23 = vsyncpa [#allocation3], 0  ;;  %v5671_v2 = vmov 128.0   ;;  %v5290_v17 = vld [vmem:[%s7017_s6 + $0x138] sm:$0xff]  ;;  %v5289_v19 = vld [vmem:[%s7017_s6 + $0x130] sm:$0xff]  ;;  %vm406_vm13 = vcmask 261120  }
  0x15   :  { %5553 = vrcp.f32 %v5671_v2  ;;  %v5298_v18 = vld [vmem:[%s7017_s6 + $0x238] sm:$0xff]  ;;  %305 = vmatpush.bf16.msra.mxu1 %v5290_v17  ;;  %v5297_v20 = vld [vmem:[%s7017_s6 + $0x230] sm:$0xff]  ;;  %v5288_v21 = vld [vmem:[%s7017_s6 + $0x128] sm:$0xff]  ;;  %vm480_vm14 = vcmask 1043456   ;;  %s7036_s30 = sld [smem:[#allocation7_spill]]  ;;  %s5673_s0 = smov [#allocation2]  }
  0x16   :  { %386 = vmatpush.bf16.msra.mxu2 %v5298_v18  ;;  %v5296_v22 = vld [vmem:[%s7017_s6 + $0x228] sm:$0xff]  ;;  %v5287_v23 = vld [vmem:[%s7017_s6 + $0x120] sm:$0xff]  ;;  %v5282_v25 = vld [vmem:[%s7017_s6 + $0x38] sm:$0xff]  ;;  %s7037_s2 = sld [smem:[#allocation6_spill]]  ;;  %s3885_s19 = sshll.u32 %s5673_s0, 4  ;;  %s3886_s19 = int_to_ptr.vmem [resolvable:$true] %s3885_s19 }
  0x17   :  { %v5295_v24 = vld [vmem:[%s7017_s6 + $0x220] sm:$0xff]  ;;  %224 = vmatpush.bf16.msra.mxu0 %v5282_v25  ;;  %v5286_v26 = vld [vmem:[%s7017_s6 + $0x118] sm:$0xff]  ;;  %v5281_v29 = vld [vmem:[%s7017_s6 + $0x30] sm:$0xff]  ;;  %s3887_s20 = sshll.u32 %s7029_s18, 4  ;;  %s3888_s20 = int_to_ptr.hbm [resolvable:$true] %s3887_s20 }
  0x18   :  { %v5294_v27 = vld [vmem:[%s7017_s6 + $0x218] sm:$0xff]  ;;  %v5285_v31 = vld [vmem:[%s7017_s6 + $0x110] sm:$0xff]  ;;  %v5280_v33 = vld [vmem:[%s7017_s6 + $0x28] sm:$0xff] }
  0x19   :  { %306 = vmatpush.bf16.msra.mxu1 %v5289_v19  ;;  %v5293_v32 = vld [vmem:[%s7017_s6 + $0x210] sm:$0xff]  ;;  %v5284_v34 = vld [vmem:[%s7017_s6 + $0x108] sm:$0xff]  ;;  %v5279_v37 = vld [vmem:[%s7017_s6 + $0x20] sm:$0xff] }
  0x1a   :  { %387 = vmatpush.bf16.msra.mxu2 %v5297_v20  ;;  %v5292_v35 = vld [vmem:[%s7017_s6 + $0x208] sm:$0xff]  ;;  %v5283_v41 = vld [vmem:[%s7017_s6 + $0x100] sm:$0xff]  ;;  %v5278_v44 = vld [vmem:[%s7017_s6 + $0x18] sm:$0xff] }
  0x1b   :  { %v5554_v3 = vpop.eup %5553  ;;  %225 = vmatpush.bf16.msra.mxu0 %v5281_v29  ;;  %v5291_v42 = vld [vmem:[%s7017_s6 + $0x200] sm:$0xff]  ;;  %v5308_v45 = vld [vmem:[%s7017_s6 + $0x78] sm:$0xff]  ;;  %v5277_v49 = vld [vmem:[%s7017_s6 + $0x10] sm:$0xff] }
  0x1c   :  { %v77_v4 = vmul.f32 128.0, %v5554_v3  ;;  %vm81_vm0 = vweird.f32 %v5554_v3  ;;  %v5316_v46 = vld [vmem:[%s7017_s6 + $0x178] sm:$0xff]  ;;  %v5307_v50 = vld [vmem:[%s7017_s6 + $0x70] sm:$0xff]  ;;  %v5276_v57 = vld [vmem:[%s7017_s6 + $0x8] sm:$0xff] }
  0x1d   :  { %307 = vmatpush.bf16.msra.mxu1 %v5288_v21  ;;  %v5315_v51 = vld [vmem:[%s7017_s6 + $0x170] sm:$0xff]  ;;  %v5306_v58 = vld [vmem:[%s7017_s6 + $0x68] sm:$0xff]  ;;  %v5275_v2 = vld [vmem:[%s7017_s6] sm:$0xff] }
  0x1e   :  { %v78_v5 = vsub.f32 1.0, %v77_v4  ;;  %388 = vmatpush.bf16.msra.mxu2 %v5296_v22  ;;  %v5314_v59 = vld [vmem:[%s7017_s6 + $0x168] sm:$0xff]  ;;  %v5313_v4 = vld [vmem:[%s7017_s6 + $0x160] sm:$0xff] }
  0x1f   :  { %226 = vmatpush.bf16.msra.mxu0 %v5280_v33  ;;  %v5302_v20 = vld [vmem:[%s7017_s6 + $0x48] sm:$0xff] }
  0x20   :  { %v79_v6 = vmul.f32 %v5554_v3, %v78_v5  ;;  %v5310_v22 = vld [vmem:[%s7017_s6 + $0x148] sm:$0xff] }
  0x21   :  { %308 = vmatpush.bf16.msra.mxu1 %v5287_v23 }
  0x22   :  { %v80_v7 = vadd.f32 %v5554_v3, %v79_v6  ;;  %389 = vmatpush.bf16.msra.mxu2 %v5295_v24  ;;  %v5304_v6 = vld [vmem:[%s7017_s6 + $0x58] sm:$0xff]  ;;  %v5301_v24 = vld [vmem:[%s7017_s6 + $0x40] sm:$0xff] }
  0x23   :  { %227 = vmatpush.bf16.msra.mxu0 %v5279_v37 }
  0x24   :  { %v5777_v8 = vsel %vm81_vm0, %v5554_v3, %v80_v7  ;;  %v5305_v3 = vld [vmem:[%s7017_s6 + $0x60] sm:$0xff]  ;;  %v5312_v7 = vld [vmem:[%s7017_s6 + $0x158] sm:$0xff]  ;;  %vm452_vm0 = vcmask 64512  }
  0x25   :  { %309 = vmatpush.bf16.msra.mxu1 %v5286_v26 }
  0x26   :  { %390 = vmatpush.bf16.msra.mxu2 %v5294_v27  ;;  %v5309_v27 = vld [vmem:[%s7017_s6 + $0x140] sm:$0xff] }
  0x27   :  { %228 = vmatpush.bf16.msra.mxu0 %v5278_v44  ;;  %v5521_v44 = vld [vmem:[%s7016_s5] ss:$0 sm:$0xff] }
  0x29   :  { %310 = vmatpush.bf16.msra.mxu1 %v5285_v31 }
  0x2a   :  { %391 = vmatpush.bf16.msra.mxu2 %v5293_v32 }
  0x2b   :  { %229 = vmatpush.bf16.msra.mxu0 %v5277_v49 }
  0x2d   :  { %311 = vmatpush.bf16.msra.mxu1 %v5284_v34 }
  0x2e   :  { %392 = vmatpush.bf16.msra.mxu2 %v5292_v35 }
  0x2f   :  { %230 = vmatpush.bf16.msra.mxu0 %v5276_v57 }
  0x31   :  { %312 = vmatpush.bf16.msra.mxu1 %v5283_v41 }
  0x32   :  { %393 = vmatpush.bf16.msra.mxu2 %v5291_v42 }
  0x33   :  { %231 = vmatpush.bf16.msra.mxu0 %v5275_v2 }
  0x35   :  { %588 = vmatpush.bf16.msrb.mxu1 %v5308_v45 }
  0x36   :  { %669 = vmatpush.bf16.msrb.mxu2 %v5316_v46 }
  0x39   :  { %589 = vmatpush.bf16.msrb.mxu1 %v5307_v50 }
  0x3a   :  { %670 = vmatpush.bf16.msrb.mxu2 %v5315_v51 }
  0x3d   :  { %590 = vmatpush.bf16.msrb.mxu1 %v5306_v58 }
  0x3e   :  { %671 = vmatpush.bf16.msrb.mxu2 %v5314_v59 }
  0x41   :  { %591 = vmatpush.bf16.msrb.mxu1 %v5305_v3 }
  0x42   :  { %672 = vmatpush.bf16.msrb.mxu2 %v5313_v4 }
  0x45   :  { %592 = vmatpush.bf16.msrb.mxu1 %v5304_v6 }
  0x46   :  { %673 = vmatpush.bf16.msrb.mxu2 %v5312_v7 }
  0x7e   :  { %v73_v9 = vpop.xlane.xlu0 %72 }
  0x7f   :  { %v83_v10 = vmul.f32 %v5777_v8, %v73_v9 }
  0x81   :  { %v5780_v11 = vsub.f32 %v61_v0, %v83_v10 }
  0x83   :  { %v87_v12 = vmul.f32 %v5780_v11, %v5780_v11 }
  0x85   :  { %89 = vadd.xlane.f32.xlu1 %v87_v12  ;;  %v5303_v12 = vld [vmem:[%s7017_s6 + $0x50] sm:$0xff] }
  0x86   :  { %v75_v13 = vpop.xlane.xlu0 %74  ;;  %593 = vmatpush.bf16.msrb.mxu1 %v5303_v12 }
  0x87   :  { %v84_v14 = vmul.f32 %v5777_v8, %v75_v13 }
  0x89   :  { %v5785_v15 = vsub.f32 %v62_v1, %v84_v14  ;;  %v5311_v14 = vld [vmem:[%s7017_s6 + $0x150] sm:$0xff] }
  0x8a   :  { %674 = vmatpush.bf16.msrb.mxu2 %v5311_v14  ;;  %594 = vmatpush.bf16.msrb.mxu1 %v5302_v20 }
  0x8b   :  { %v88_v16 = vmul.f32 %v5785_v15, %v5785_v15 }
  0x8d   :  { %91 = vadd.xlane.f32.xlu1 %v88_v16 }
  0x8e   :  { %675 = vmatpush.bf16.msrb.mxu2 %v5310_v22  ;;  %595 = vmatpush.bf16.msrb.mxu1 %v5301_v24 }
  0x92   :  { %676 = vmatpush.bf16.msrb.mxu2 %v5309_v27 }
  0xf8   :  { %v90_v28 = vpop.xlane.xlu1 %89 }
  0xf9   :  { %v93_v30 = vmul.f32 0.007874016, %v90_v28 }
  0xfb   :  { %5555 = vrsqrt.f32 %v93_v30  ;;  %vm102_vm1 = vcmp.eq.f32.partialorder %v93_v30, inf  ;;  %v105_v60 = vand.u32 2147483648, %v93_v30  ;;  %vm104_vm2 = vcmp.eq.f32.partialorder %v93_v30, 0.0 }
 0x100   :  { %v92_v36 = vpop.xlane.xlu1 %91 }
 0x101   :  { %v5556_v38 = vpop.eup %5555  ;;  %v5843_v39 = vmul.f32 0.007874016, %v92_v36 }
 0x102   :  { %v96_v40 = vmul.f32 %v5556_v38, %v93_v30 }
 0x103   :  { %5557 = vrsqrt.f32 %v5843_v39  ;;  %vm114_vm3 = vcmp.eq.f32.partialorder %v5843_v39, inf  ;;  %v117_v10 = vand.u32 2147483648, %v5843_v39  ;;  %vm116_vm4 = vcmp.eq.f32.partialorder %v5843_v39, 0.0 }
 0x104   :  { %v97_v43 = vmul.f32 %v5556_v38, %v96_v40 }
 0x106   :  { %v98_v47 = vmul.f32 0.5, %v97_v43 }
 0x108   :  { %v99_v48 = vsub.f32 1.5, %v98_v47 }
 0x109   :  { %v5558_v52 = vpop.eup %5557 }
 0x10a   :  { %v100_v53 = vmul.f32 %v5556_v38, %v99_v48  ;;  %v108_v54 = vmul.f32 %v5558_v52, %v5843_v39  ;;  %v5520_v38 = vld [vmem:[%s7015_s4] ss:$0 sm:$0xff] }
 0x10c   :  { %v101_v55 = vmul.f32 %v100_v53, %v93_v30  ;;  %v109_v56 = vmul.f32 %v5558_v52, %v108_v54 }
 0x10e   :  { %v103_v61 = vsel %vm102_vm1, %v93_v30, %v101_v55  ;;  %v110_v62 = vmul.f32 0.5, %v109_v56  ;;  %v5524_v55 = vld [vmem:[%s7018_s7 + $0x8] ss:$0 sm:$0xff] }
 0x10f   :  { %v106_v63 = vsel %vm104_vm2, %v105_v60, %v103_v61 }
 0x110   :  { %v119_v0 = vadd.f32 1e-06, %v106_v63  ;;  %v111_v1 = vsub.f32 1.5, %v110_v62 }
 0x112   :  { %5559 = vrcp.f32 %v119_v0  ;;  %v112_v5 = vmul.f32 %v5558_v52, %v111_v1  ;;  %v132_v26 = vand.u32 2147483648, %v119_v0  ;;  %vm126_vm6 = vweird.f32 %v119_v0  ;;  %v5522_v52 = vld [vmem:[%s7018_s7] ss:$0 sm:$0xff] }
 0x113   :  { %v130_v28 = vand.u32 2147483647, %v119_v0 }
 0x114   :  { %v113_v9 = vmul.f32 %v112_v5, %v5843_v39  ;;  %v133_v32 = vor.u32 1.1754944e-38, %v132_v26  ;;  %v5526_v5 = vld [vmem:[%s7018_s7 + $0x5] ss:$0 sm:$0xff] }
 0x115   :  { %vm131_vm8 = vcmp.eq.f32.partialorder %v130_v28, 8.507059e+37 }
 0x116   :  { %v115_v13 = vsel %vm114_vm3, %v5843_v39, %v113_v9 }
 0x117   :  { %v118_v17 = vsel %vm116_vm4, %v117_v10, %v115_v13  ;;  %v5525_v13 = vld [vmem:[%s7018_s7 + $0x1] ss:$0 sm:$0xff] }
 0x118   :  { %v5560_v16 = vpop.eup %5559  ;;  %v120_v19 = vadd.f32 1e-06, %v118_v17 }
 0x119   :  { %v122_v18 = vmul.f32 %v5560_v16, %v119_v0  ;;  %vm127_vm5 = vweird.f32 %v5560_v16 }
 0x11a   :  { %5561 = vrcp.f32 %v120_v19  ;;  %vm128_vm7 = vmor %vm126_vm6, %vm127_vm5  ;;  %v146_v35 = vand.u32 2147483648, %v120_v19  ;;  %v144_v37 = vand.u32 2147483647, %v120_v19  ;;  %vm140_vm10 = vweird.f32 %v120_v19 }
 0x11b   :  { %v123_v21 = vsub.f32 1.0, %v122_v18 }
 0x11c   :  { %v147_v41 = vor.u32 1.1754944e-38, %v146_v35  ;;  %vm145_vm12 = vcmp.eq.f32.partialorder %v144_v37, 8.507059e+37 }
 0x11d   :  { %v124_v23 = vmul.f32 %v5560_v16, %v123_v21 }
 0x11f   :  { %v125_v25 = vadd.f32 %v5560_v16, %v124_v23 }
 0x120   :  { %v5562_v29 = vpop.eup %5561 }
 0x121   :  { %v129_v30 = vsel %vm128_vm7, %v5560_v16, %v125_v25  ;;  %v136_v31 = vmul.f32 %v5562_v29, %v120_v19  ;;  %vm141_vm9 = vweird.f32 %v5562_v29 }
 0x122   :  { %v134_v34 = vsel %vm131_vm8, %v133_v32, %v129_v30  ;;  %vm142_vm11 = vmor %vm140_vm10, %vm141_vm9 }
 0x123   :  { %v137_v33 = vsub.f32 1.0, %v136_v31  ;;  %v149_v39 = vmul.f32 %v134_v34, %v5780_v11  ;;  %v5523_v11 = vld [vmem:[%s7018_s7 + $0x4] ss:$0 sm:$0xff] }
 0x125   :  { %v138_v36 = vmul.f32 %v5562_v29, %v137_v33  ;;  %v152_v45 = vmul.f32 %v5520_v38, %v149_v39 }
 0x127   :  { %v139_v40 = vadd.f32 %v5562_v29, %v138_v36  ;;  %v155_v48 = vadd.f32 %v5521_v44, %v152_v45 }
 0x129   :  { %v143_v42 = vsel %vm142_vm11, %v5562_v29, %v139_v40  ;;  %v5961_v29 = vld [vmem:[%s7036_s30] sm:$0xff] }
 0x12a   :  { %v148_v43 = vsel %vm145_vm12, %v147_v41, %v143_v42  ;;  %vm447_vm15 = vcmp.ne.f32.partialorder %v5961_v29, 0.0 }
 0x12b   :  { %v150_v46 = vmul.f32 %v148_v43, %v5785_v15 }
 0x12d   :  { %v153_v47 = vmul.f32 %v5520_v38, %v150_v46 }
 0x12f   :  { %v156_v49 = vadd.f32 %v5521_v44, %v153_v47 }
 0x131   :  { %v5926_v50 = vpack.c.bf16 %v156_v49, %v155_v48 }
 0x133   :  { %232 = vmatmul.bf16.vlgmr.msra.gmra.mxu0 %v5926_v50  ;;  %313 = vmatmul.bf16.vlgmr.msra.gmra.mxu1 %v5926_v50 }
 0x134   :  { %394 = vmatmul.bf16.vlgmr.msra.gmra.mxu2 %v5926_v50 }
 0x143   :  { %596 = vmatmul.bf16.vlgmr.msrb.gmra.mxu1 %v5926_v50 }
 0x144   :  { %677 = vmatmul.bf16.vlgmr.msrb.gmra.mxu2 %v5926_v50 }
 0x1b0   :  { %v314_v15 = vpop.f32.mrf.mxu1  ;;  %v233_v54 = vpop.f32.mrf.mxu0 }
 0x1b1   :  { %v315_v51 = vadd.f32 %v5523_v11, %v314_v15  ;;  %v234_v57 = vadd.f32 %v5522_v52, %v233_v54 }
 0x1b3   :  { %v402_v53 = vpack.c.bf16 %v315_v51, %v315_v51  ;;  %v400_v63 = vpack.c.bf16 %v234_v57, %v234_v57 }
 0x1b5   :  { %v411_v56 = vsel %vm406_vm13, %v402_v53, 0 }
 0x1b6   :  { %420 = vmatpush.bf16.xpose.msra.mxu3 %v411_v56 }
 0x1b7   :  { %v395_v58 = vpop.f32.mrf.mxu2 }
 0x1b8   :  { %v396_v59 = vadd.f32 %v5524_v55, %v395_v58  ;;  %v316_v60 = vpop.f32.mrf.mxu1  ;;  %v235_v4 = vpop.f32.mrf.mxu0 }
 0x1b9   :  { %v317_v61 = vadd.f32 %v5523_v11, %v316_v60  ;;  %v236_v7 = vadd.f32 %v5522_v52, %v235_v4 }
 0x1ba   :  { %v404_v62 = vpack.c.bf16 %v396_v59, %v396_v59 }
 0x1bb   :  { %v403_v0 = vpack.c.bf16 %v317_v61, %v317_v61  ;;  %v401_v16 = vpack.c.bf16 %v236_v7, %v236_v7 }
 0x1bc   :  { %v482_v2 = vsel %vm480_vm14, %v404_v62, 0 }
 0x1bd   :  { %4027 = vmatmul.msk.bf16.vlgmr.msra.gmra.mxu3 %vm406_vm13, %v400_v63  ;;  %v430_v1 = vsel %vm406_vm13, %v403_v0, 0 }
 0x1be   :  { %439 = vmatpush.bf16.xpose.msrb.mxu3 %v430_v1 }
 0x1bf   :  { %v397_v3 = vpop.f32.mrf.mxu2 }
 0x1c0   :  { %v398_v6 = vadd.f32 %v5524_v55, %v397_v3  ;;  %v597_v17 = vpop.f32.mrf.mxu1 }
 0x1c1   :  { %v598_v20 = vadd.f32 %v5525_v13, %v597_v17 }
 0x1c2   :  { %v405_v12 = vpack.c.bf16 %v398_v6, %v398_v6 }
 0x1c3   :  { %v764_v23 = vpack.c.bf16 %v598_v20, %v598_v20 }
 0x1c4   :  { %v501_v19 = vsel %vm480_vm14, %v405_v12, 0  ;;  %v5322_v12 = vld [vmem:[%s7017_s6 + $0x268] sm:$0xff] }
 0x1c6   :  { %491 = vmatpush.bf16.msra.mxu3 %v482_v2 }
 0x1c7   :  { %v678_v9 = vpop.f32.mrf.mxu2 }
 0x1c8   :  { %v679_v10 = vadd.f32 %v5526_v5, %v678_v9  ;;  %v599_v26 = vpop.f32.mrf.mxu1  ;;  %v5323_v9 = vld [vmem:[%s7017_s6 + $0x270] sm:$0xff] }
 0x1c9   :  { %v600_v27 = vadd.f32 %v5525_v13, %v599_v26 }
 0x1ca   :  { %v766_v14 = vpack.c.bf16 %v679_v10, %v679_v10 }
 0x1cb   :  { %v765_v28 = vpack.c.bf16 %v600_v27, %v600_v27 }
 0x1cc   :  { %v774_v18 = vsel %vm406_vm13, %v766_v14, 0 }
 0x1cd   :  { %783 = vmatpush.bf16.xpose.msrb.mxu0 %v774_v18  ;;  %4028 = vmatmul.msk.bf16.vlgmr.msrb.gmra.mxu3 %vm406_vm13, %v401_v16  ;;  %v5321_v16 = vld [vmem:[%s7017_s6 + $0x260] sm:$0xff] }
 0x1ce   :  { %510 = vmatpush.bf16.msrb.mxu3 %v501_v19  ;;  %v5320_v19 = vld [vmem:[%s7017_s6 + $0x258] sm:$0xff] }
 0x1cf   :  { %v680_v21 = vpop.f32.mrf.mxu2 }
 0x1d0   :  { %v681_v22 = vadd.f32 %v5526_v5, %v680_v21  ;;  %v5324_v5 = vld [vmem:[%s7017_s6 + $0x278] sm:$0xff]  ;;  %v5319_v21 = vld [vmem:[%s7017_s6 + $0x250] sm:$0xff] }
 0x1d2   :  { %v767_v24 = vpack.c.bf16 %v681_v22, %v681_v22  ;;  %v5318_v22 = vld [vmem:[%s7017_s6 + $0x248] sm:$0xff] }
 0x1d4   :  { %4175 = vmatmul.msk.bf16.vlgmr.msrb.gmra.mxu0 %vm406_vm13, %v764_v23  ;;  %v793_v25 = vsel %vm406_vm13, %v767_v24, 0  ;;  %v5317_v23 = vld [vmem:[%s7017_s6 + $0x240] sm:$0xff]  ;;  %v5300_v24 = vld [vmem:[%s7019_s8 + $0x8] sm:$0xff] }
 0x1d5   :  { %802 = vmatpush.bf16.xpose.msra.mxu0 %v793_v25  ;;  %v5299_v25 = vld [vmem:[%s7019_s8] sm:$0xff] }
 0x1dd   :  { %930 = vmatpush.bf16.msrb.mxu0 %v5300_v24 }
 0x1e1   :  { %931 = vmatpush.bf16.msrb.mxu0 %v5299_v25 }
 0x1e4   :  { %4176 = vmatmul.msk.bf16.vlgmr.msra.gmra.mxu0 %vm406_vm13, %v765_v28 }
 0x240   :  { %v422_v30 = vpop.f32.mrf.mxu3 }
 0x241   :  { %v445_v31 = vmul.f32 0.17677669, %v422_v30 }
 0x243   :  { %v450_v32 = vsel %vm447_vm15, %v445_v31, -1e+09 }
 0x244   :  { %v453_v33 = vsel %vm452_vm0, %v450_v32, -inf }
 0x245   :  { %454 = vmax.xlane.f32.xlu2 %v453_v33  ;;  %v5527_v33 = vld [vmem:[%s7018_s7 + $0x9] ss:$0 sm:$0xff] }
 0x248   :  { %v424_v34 = vpop.f32.mrf.mxu3 }
 0x250   :  { %v441_v35 = vpop.f32.mrf.mxu3 }
 0x251   :  { %v446_v36 = vmul.f32 0.17677669, %v441_v35  ;;  %v785_v37 = vpop.f32.mrf.mxu0 }
 0x252   :  { %v808_v51 = vmul.f32 0.17677669, %v785_v37 }
 0x253   :  { %v451_v38 = vsel %vm447_vm15, %v446_v36, -1e+09 }
 0x254   :  { %v456_v39 = vsel %vm452_vm0, %v451_v38, -inf  ;;  %v810_v54 = vsel %vm447_vm15, %v808_v51, -1e+09 }
 0x255   :  { %457 = vmax.xlane.f32.xlu2 %v456_v39  ;;  %v812_v56 = vsel %vm452_vm0, %v810_v54, -inf }
 0x258   :  { %v443_v40 = vpop.f32.mrf.mxu3 }
 0x259   :  { %v787_v41 = vpop.f32.mrf.mxu0  ;;  %v5334_v40 = vld [vmem:[%s7017_s6 + $0xb8] sm:$0xff] }
 0x261   :  { %v804_v42 = vpop.f32.mrf.mxu0 }
 0x262   :  { %v809_v43 = vmul.f32 0.17677669, %v804_v42 }
 0x264   :  { %v811_v44 = vsel %vm447_vm15, %v809_v43, -1e+09  ;;  %v5333_v43 = vld [vmem:[%s7017_s6 + $0xb0] sm:$0xff] }
 0x265   :  { %v815_v45 = vsel %vm452_vm0, %v811_v44, -inf }
 0x266   :  { %816 = vmax.xlane.f32.xlu2 %v815_v45 }
 0x269   :  { %v806_v46 = vpop.f32.mrf.mxu0 }
 0x2b8   :  { %v455_v47 = vpop.xlane.xlu2 %454 }
 0x2b9   :  { %v459_v48 = vsub.f32 %v450_v32, %v455_v47 }
 0x2bb   :  { %v461_v49 = vmul.f32 1.442695, %v459_v48 }
 0x2bd   :  { %5563 = vpow2.f32 %v461_v49  ;;  %v5332_v49 = vld [vmem:[%s7017_s6 + $0xa8] sm:$0xff] }
 0x2c3   :  { %v5564_v11 = vpop.eup %5563 }
 0x2c4   :  { %v465_v15 = vsel %vm452_vm0, %v5564_v11, 0.0 }
 0x2c5   :  { %466 = vadd.xlane.f32.xlu0 %v465_v15 }
 0x2c8   :  { %v458_v52 = vpop.xlane.xlu2 %457 }
 0x2c9   :  { %v460_v53 = vsub.f32 %v451_v38, %v458_v52  ;;  %v5331_v52 = vld [vmem:[%s7017_s6 + $0xa0] sm:$0xff] }
 0x2cb   :  { %v463_v55 = vmul.f32 1.442695, %v460_v53  ;;  %v5341_v53 = vld [vmem:[%s7017_s6 + $0x1b0] sm:$0xff] }
 0x2cd   :  { %5565 = vpow2.f32 %v463_v55  ;;  %813 = vmax.xlane.f32.xlu0 %v812_v56  ;;  %v5340_v55 = vld [vmem:[%s7017_s6 + $0x1a8] sm:$0xff]  ;;  %v5329_v56 = vld [vmem:[%s7017_s6 + $0x90] sm:$0xff] }
 0x2d3   :  { %v5566_v57 = vpop.eup %5565 }
 0x2d4   :  { %v468_v58 = vsel %vm452_vm0, %v5566_v57, 0.0 }
 0x2d5   :  { %469 = vadd.xlane.f32.xlu1 %v468_v58  ;;  %v5328_v58 = vld [vmem:[%s7017_s6 + $0x88] sm:$0xff] }
 0x2d9   :  { %v817_v59 = vpop.xlane.xlu2 %816 }
 0x2da   :  { %v819_v60 = vsub.f32 %v811_v44, %v817_v59  ;;  %v5338_v59 = vld [vmem:[%s7017_s6 + $0x198] sm:$0xff] }
 0x2dc   :  { %v822_v61 = vmul.f32 1.442695, %v819_v60  ;;  %v5327_v60 = vld [vmem:[%s7017_s6 + $0x80] sm:$0xff] }
 0x2de   :  { %5567 = vpow2.f32 %v822_v61  ;;  %v5337_v61 = vld [vmem:[%s7017_s6 + $0x190] sm:$0xff] }
 0x2e4   :  { %v5978_v62 = vpop.eup %5567 }
 0x2e5   :  { %v827_v63 = vsel %vm452_vm0, %v5978_v62, 0.0 }
 0x2e6   :  { %828 = vadd.xlane.f32.xlu1 %v827_v63  ;;  %v5335_v63 = vld [vmem:[%s7017_s6 + $0x180] sm:$0xff] }
 0x338   :  { %v467_v0 = vpop.xlane.xlu0 %466 }
 0x339   :  { %5569 = vrcp.f32 %v467_v0  ;;  %v5326_v0 = vld [vmem:[%s7019_s8 + $0x18] sm:$0xff] }
 0x33f   :  { %v5570_v1 = vpop.eup %5569 }
 0x340   :  { %v473_v2 = vmul.f32 %v5570_v1, %v5564_v11  ;;  %v814_v3 = vpop.xlane.xlu0 %813  ;;  %v5342_v11 = vld [vmem:[%s7017_s6 + $0x1b8] sm:$0xff]  ;;  %v5325_v1 = vld [vmem:[%s7019_s8 + $0x10] sm:$0xff] }
 0x341   :  { %v818_v4 = vsub.f32 %v810_v54, %v814_v3  ;;  %v5330_v54 = vld [vmem:[%s7017_s6 + $0x98] sm:$0xff]  ;;  %v5349_v3 = vld [vmem:[%s7017_s6 + $0x2b0] sm:$0xff] }
 0x342   :  { %v475_v6 = vpack.c.bf16 %v473_v2, %v473_v2  ;;  %v5350_v2 = vld [vmem:[%s7017_s6 + $0x2b8] sm:$0xff] }
 0x343   :  { %v820_v7 = vmul.f32 1.442695, %v818_v4  ;;  %v5348_v4 = vld [vmem:[%s7017_s6 + $0x2a8] sm:$0xff] }
 0x344   :  { %4029 = vmatmul.msk.bf16.vlgmr.msra.gmra.mxu3 %vm452_vm0, %v475_v6  ;;  %v5346_v6 = vld [vmem:[%s7017_s6 + $0x298] sm:$0xff] }
 0x345   :  { %5571 = vpow2.f32 %v820_v7  ;;  %750 = vmatpush.bf16.msra.mxu3 %v5324_v5  ;;  %v5347_v5 = vld [vmem:[%s7017_s6 + $0x2a0] sm:$0xff]  ;;  %v5345_v7 = vld [vmem:[%s7017_s6 + $0x290] sm:$0xff] }
 0x348   :  { %v470_v10 = vpop.xlane.xlu1 %469 }
 0x349   :  { %5573 = vrcp.f32 %v470_v10  ;;  %751 = vmatpush.bf16.msra.mxu3 %v5323_v9  ;;  %v5344_v9 = vld [vmem:[%s7017_s6 + $0x288] sm:$0xff]  ;;  %v5343_v10 = vld [vmem:[%s7017_s6 + $0x280] sm:$0xff] }
 0x34b   :  { %v5572_v13 = vpop.eup %5571 }
 0x34c   :  { %v824_v14 = vsel %vm452_vm0, %v5572_v13, 0.0 }
 0x34d   :  { %752 = vmatpush.bf16.msra.mxu3 %v5322_v12  ;;  %825 = vadd.xlane.f32.xlu2 %v824_v14 }
 0x34f   :  { %v5574_v17 = vpop.eup %5573 }
 0x350   :  { %v474_v18 = vmul.f32 %v5574_v17, %v5566_v57  ;;  %v5339_v57 = vld [vmem:[%s7017_s6 + $0x1a0] sm:$0xff] }
 0x351   :  { %753 = vmatpush.bf16.msra.mxu3 %v5321_v16 }
 0x352   :  { %v476_v20 = vpack.c.bf16 %v474_v18, %v474_v18  ;;  %v5529_v18 = vld [vmem:[%s7018_s7 + $0x6] ss:$0 sm:$0xff] }
 0x354   :  { %4030 = vmatmul.msk.bf16.vlgmr.msrb.gmra.mxu3 %vm452_vm0, %v476_v20 }
 0x355   :  { %754 = vmatpush.bf16.msra.mxu3 %v5320_v19 }
 0x359   :  { %755 = vmatpush.bf16.msra.mxu3 %v5319_v21  ;;  %v829_v34 = vpop.xlane.xlu1 %828  ;;  %v5528_v21 = vld [vmem:[%s7018_s7 + $0x2] ss:$0 sm:$0xff] }
 0x35d   :  { %756 = vmatpush.bf16.msra.mxu3 %v5318_v22 }
 0x361   :  { %757 = vmatpush.bf16.msra.mxu3 %v5317_v23 }
 0x364   :  { %758 = vmatmul.bf16.vlgmr.msra.gmra.mxu3 %v5926_v50 }
 0x365   :  { %901 = vmatpush.bf16.msrb.mxu3 %v5326_v0 }
 0x369   :  { %902 = vmatpush.bf16.msrb.mxu3 %v5325_v1  ;;  %v5368_v1 = vld [vmem:[%s7017_s6 + $0x1f8] sm:$0xff] }
 0x36d   :  { %1167 = vmatpush.bf16.msra.mxu3 %v5350_v2 }
 0x371   :  { %1168 = vmatpush.bf16.msra.mxu3 %v5349_v3 }
 0x375   :  { %1169 = vmatpush.bf16.msra.mxu3 %v5348_v4 }
 0x379   :  { %1170 = vmatpush.bf16.msra.mxu3 %v5347_v5 }
 0x37d   :  { %1171 = vmatpush.bf16.msra.mxu3 %v5346_v6 }
 0x381   :  { %1172 = vmatpush.bf16.msra.mxu3 %v5345_v7 }
 0x385   :  { %1173 = vmatpush.bf16.msra.mxu3 %v5344_v9 }
 0x389   :  { %1174 = vmatpush.bf16.msra.mxu3 %v5343_v10 }
 0x3c0   :  { %v826_v31 = vpop.xlane.xlu2 %825 }
 0x3c1   :  { %5575 = vrcp.f32 %v826_v31  ;;  %v5360_v31 = vld [vmem:[%s7017_s6 + $0xf8] sm:$0xff] }
 0x3c2   :  { %5577 = vrcp.f32 %v829_v34  ;;  %v5358_v34 = vld [vmem:[%s7017_s6 + $0xe8] sm:$0xff] }
 0x3c7   :  { %v493_v26 = vpop.f32.mrf.mxu3  ;;  %v5576_v35 = vpop.eup %5575 }
 0x3c8   :  { %v832_v38 = vmul.f32 %v5576_v35, %v5572_v13  ;;  %v5578_v44 = vpop.eup %5577 }
 0x3c9   :  { %v833_v47 = vmul.f32 %v5578_v44, %v5978_v62  ;;  %v5336_v62 = vld [vmem:[%s7017_s6 + $0x188] sm:$0xff] }
 0x3ca   :  { %v834_v42 = vpack.c.bf16 %v832_v38, %v832_v38 }
 0x3cb   :  { %v835_v51 = vpack.c.bf16 %v833_v47, %v833_v47 }
 0x3cf   :  { %v495_v27 = vpop.f32.mrf.mxu3 }
 0x3d7   :  { %v512_v28 = vpop.f32.mrf.mxu3 }
 0x3d8   :  { %v516_v30 = vpack.c.bf16 %v512_v28, %v493_v26 }
 0x3da   :  { %4200 = vmatmul.msk.bf16.vlgmr.msrb.gmra.mxu0 %vm406_vm13, %v516_v30 }
 0x3df   :  { %v514_v32 = vpop.f32.mrf.mxu3 }
 0x3e7   :  { %v759_v36 = vpop.f32.mrf.mxu3 }
 0x3e8   :  { %v760_v37 = vadd.f32 %v5527_v33, %v759_v36 }
 0x3ea   :  { %v768_v39 = vpack.c.bf16 %v760_v37, %v760_v37  ;;  %v5357_v37 = vld [vmem:[%s7017_s6 + $0xe0] sm:$0xff] }
 0x3ec   :  { %v840_v41 = vsel %vm480_vm14, %v768_v39, 0  ;;  %v5356_v39 = vld [vmem:[%s7017_s6 + $0xd8] sm:$0xff] }
 0x3ed   :  { %849 = vmatpush.bf16.msra.mxu1 %v840_v41  ;;  %v5354_v41 = vld [vmem:[%s7017_s6 + $0xc8] sm:$0xff] }
 0x3ef   :  { %v761_v45 = vpop.f32.mrf.mxu3 }
 0x3f0   :  { %v762_v46 = vadd.f32 %v5527_v33, %v761_v45  ;;  %4177 = vmatmul.msk.bf16.vlgmr.msra.gmra.mxu1 %vm452_vm0, %v834_v42  ;;  %v5359_v33 = vld [vmem:[%s7017_s6 + $0xf0] sm:$0xff]  ;;  %v5353_v42 = vld [vmem:[%s7017_s6 + $0xc0] sm:$0xff]  ;;  %v5530_v45 = vld [vmem:[%s7018_s7 + $0xa] ss:$0 sm:$0xff] }
 0x3f1   :  { %1005 = vmatpush.bf16.msrb.mxu1 %v5334_v40  ;;  %v5355_v40 = vld [vmem:[%s7017_s6 + $0xd0] sm:$0xff] }
 0x3f2   :  { %v769_v48 = vpack.c.bf16 %v762_v46, %v762_v46 }
 0x3f4   :  { %v859_v15 = vsel %vm480_vm14, %v769_v48, 0 }
 0x3f5   :  { %1006 = vmatpush.bf16.msrb.mxu1 %v5333_v43  ;;  %868 = vmatpush.bf16.msra.mxu2 %v859_v15 }
 0x3f8   :  { %4178 = vmatmul.msk.bf16.vlgmr.msra.gmra.mxu2 %vm452_vm0, %v835_v51 }
 0x3f9   :  { %1007 = vmatpush.bf16.msrb.mxu1 %v5332_v49  ;;  %1086 = vmatpush.bf16.msrb.mxu2 %v5342_v11 }
 0x3fd   :  { %1008 = vmatpush.bf16.msrb.mxu1 %v5331_v52  ;;  %1087 = vmatpush.bf16.msrb.mxu2 %v5341_v53 }
 0x401   :  { %1009 = vmatpush.bf16.msrb.mxu1 %v5330_v54  ;;  %1088 = vmatpush.bf16.msrb.mxu2 %v5340_v55 }
 0x405   :  { %1010 = vmatpush.bf16.msrb.mxu1 %v5329_v56  ;;  %1089 = vmatpush.bf16.msrb.mxu2 %v5339_v57 }
 0x409   :  { %1011 = vmatpush.bf16.msrb.mxu1 %v5328_v58  ;;  %1090 = vmatpush.bf16.msrb.mxu2 %v5338_v59 }
 0x40d   :  { %1012 = vmatpush.bf16.msrb.mxu1 %v5327_v60  ;;  %1091 = vmatpush.bf16.msrb.mxu2 %v5337_v61 }
 0x410   :  { %1013 = vmatmul.bf16.vlgmr.msrb.gmra.mxu1 %v5926_v50 }
 0x411   :  { %1092 = vmatpush.bf16.msrb.mxu2 %v5336_v62 }
 0x415   :  { %1093 = vmatpush.bf16.msrb.mxu2 %v5335_v63 }
 0x418   :  { %1094 = vmatmul.bf16.vlgmr.msrb.gmra.mxu2 %v5926_v50 }
 0x457   :  { %v6149_v46 = vpop.f32.mrf.mxu0 }
 0x45f   :  { %v6152_v51 = vpop.f32.mrf.mxu0 }
 0x46d   :  { %v851_v12 = vpop.f32.mrf.mxu1 }
 0x475   :  { %v853_v13 = vpop.f32.mrf.mxu1 }
 0x47b   :  { %v870_v14 = vpop.f32.mrf.mxu2 }
 0x47c   :  { %v874_v16 = vpack.c.bf16 %v870_v14, %v851_v12  ;;  %v5367_v14 = vld [vmem:[%s7017_s6 + $0x1f0] sm:$0xff] }
 0x47e   :  { %4191 = vmatmul.msk.bf16.vlgmr.msrb.gmra.mxu3 %vm406_vm13, %v874_v16  ;;  %v5366_v16 = vld [vmem:[%s7017_s6 + $0x1e8] sm:$0xff] }
 0x483   :  { %v872_v17 = vpop.f32.mrf.mxu2 }
 0x484   :  { %v5365_v17 = vld [vmem:[%s7017_s6 + $0x1e0] sm:$0xff] }
 0x48d   :  { %v1014_v23 = vpop.f32.mrf.mxu1 }
 0x48e   :  { %1175 = vmatmul.bf16.vlgmr.msra.gmra.mxu3 %v5926_v50  ;;  %v1015_v25 = vadd.f32 %v5528_v21, %v1014_v23  ;;  %v5374_v23 = vld [vmem:[%s7017_s6 + $0x2e8] sm:$0xff] }
 0x490   :  { %v1181_v28 = vpack.c.bf16 %v1015_v25, %v1015_v25  ;;  %v5373_v25 = vld [vmem:[%s7017_s6 + $0x2e0] sm:$0xff] }
 0x495   :  { %v1016_v35 = vpop.f32.mrf.mxu1 }
 0x496   :  { %v1017_v36 = vadd.f32 %v5528_v21, %v1016_v35  ;;  %v5375_v21 = vld [vmem:[%s7017_s6 + $0x2f0] sm:$0xff] }
 0x498   :  { %v1182_v38 = vpack.c.bf16 %v1017_v36, %v1017_v36 }
 0x49b   :  { %v1095_v19 = vpop.f32.mrf.mxu2 }
 0x49c   :  { %v1096_v20 = vadd.f32 %v5529_v18, %v1095_v19  ;;  %v5376_v19 = vld [vmem:[%s7017_s6 + $0x2f8] sm:$0xff] }
 0x49e   :  { %v1183_v22 = vpack.c.bf16 %v1096_v20, %v1096_v20  ;;  %v5363_v20 = vld [vmem:[%s7017_s6 + $0x1d0] sm:$0xff] }
 0x4a0   :  { %v1191_v24 = vsel %vm406_vm13, %v1183_v22, 0  ;;  %v5362_v22 = vld [vmem:[%s7017_s6 + $0x1c8] sm:$0xff] }
 0x4a1   :  { %1200 = vmatpush.bf16.xpose.msra.mxu0 %v1191_v24  ;;  %v5361_v24 = vld [vmem:[%s7017_s6 + $0x1c0] sm:$0xff] }
 0x4a3   :  { %v1097_v26 = vpop.f32.mrf.mxu2 }
 0x4a4   :  { %v1098_v27 = vadd.f32 %v5529_v18, %v1097_v26  ;;  %v5364_v18 = vld [vmem:[%s7017_s6 + $0x1d8] sm:$0xff] }
 0x4a5   :  { %v5372_v26 = vld [vmem:[%s7017_s6 + $0x2d8] sm:$0xff] }
 0x4a6   :  { %v1184_v30 = vpack.c.bf16 %v1098_v27, %v1098_v27  ;;  %v5371_v27 = vld [vmem:[%s7017_s6 + $0x2d0] sm:$0xff] }
 0x4a8   :  { %4345 = vmatmul.msk.bf16.vlgmr.msra.gmra.mxu0 %vm406_vm13, %v1181_v28  ;;  %v1210_v32 = vsel %vm406_vm13, %v1184_v30, 0  ;;  %v5370_v30 = vld [vmem:[%s7017_s6 + $0x2c8] sm:$0xff] }
 0x4a9   :  { %1219 = vmatpush.bf16.xpose.msrb.mxu0 %v1210_v32 }
 0x4b1   :  { %1395 = vmatpush.bf16.msra.mxu0 %v5360_v31  ;;  %v5369_v31 = vld [vmem:[%s7017_s6 + $0x2c0] sm:$0xff] }
 0x4b5   :  { %1396 = vmatpush.bf16.msra.mxu0 %v5359_v33 }
 0x4b8   :  { %4346 = vmatmul.msk.bf16.vlgmr.msrb.gmra.mxu0 %vm406_vm13, %v1182_v38 }
 0x4b9   :  { %1397 = vmatpush.bf16.msra.mxu0 %v5358_v34 }
 0x4bd   :  { %1398 = vmatpush.bf16.msra.mxu0 %v5357_v37 }
 0x4c1   :  { %1399 = vmatpush.bf16.msra.mxu0 %v5356_v39  ;;  %v5352_v39 = vld [vmem:[%s7019_s8 + $0x28] sm:$0xff] }
 0x4c2   :  { %1318 = vmatpush.bf16.msrb.mxu3 %v5352_v39 }
 0x4c5   :  { %1400 = vmatpush.bf16.msra.mxu0 %v5355_v40  ;;  %v5351_v40 = vld [vmem:[%s7019_s8 + $0x20] sm:$0xff] }
 0x4c6   :  { %1319 = vmatpush.bf16.msrb.mxu3 %v5351_v40 }
 0x4c9   :  { %1401 = vmatpush.bf16.msra.mxu0 %v5354_v41 }
 0x4cd   :  { %1402 = vmatpush.bf16.msra.mxu0 %v5353_v42 }
 0x4d0   :  { %1403 = vmatmul.bf16.vlgmr.msra.gmra.mxu0 %v5926_v50 }
 0x501   :  { %v6142_v43 = vpop.f32.mrf.mxu3 }
 0x509   :  { %v6144_v44 = vpop.f32.mrf.mxu3 }
 0x511   :  { %v1176_v47 = vpop.f32.mrf.mxu3 }
 0x512   :  { %v1177_v48 = vadd.f32 %v5530_v45, %v1176_v47 }
 0x514   :  { %v1185_v49 = vpack.c.bf16 %v1177_v48, %v1177_v48 }
 0x516   :  { %v1257_v11 = vsel %vm480_vm14, %v1185_v49, 0 }
 0x517   :  { %1266 = vmatpush.bf16.msra.mxu1 %v1257_v11 }
 0x519   :  { %v1178_v15 = vpop.f32.mrf.mxu3 }
 0x51a   :  { %v1179_v52 = vadd.f32 %v5530_v45, %v1178_v15  ;;  %v5532_v45 = vld [vmem:[%s7018_s7 + $0x7] ss:$0 sm:$0xff] }
 0x51b   :  { %1476 = vmatpush.bf16.msrb.mxu1 %v5368_v1 }
 0x51c   :  { %v1186_v53 = vpack.c.bf16 %v1179_v52, %v1179_v52 }
 0x51e   :  { %v1276_v54 = vsel %vm480_vm14, %v1186_v53, 0 }
 0x51f   :  { %1285 = vmatpush.bf16.msra.mxu2 %v1276_v54  ;;  %1477 = vmatpush.bf16.msrb.mxu1 %v5367_v14 }
 0x523   :  { %1478 = vmatpush.bf16.msrb.mxu1 %v5366_v16  ;;  %1557 = vmatpush.bf16.msrb.mxu2 %v5376_v19 }
 0x525   :  { %v1202_v55 = vpop.f32.mrf.mxu0 }
 0x526   :  { %v1225_v56 = vmul.f32 0.17677669, %v1202_v55 }
 0x527   :  { %1479 = vmatpush.bf16.msrb.mxu1 %v5365_v17  ;;  %1558 = vmatpush.bf16.msrb.mxu2 %v5375_v21 }
 0x528   :  { %v1227_v57 = vsel %vm447_vm15, %v1225_v56, -1e+09 }
 0x529   :  { %v1229_v58 = vsel %vm452_vm0, %v1227_v57, -inf }
 0x52a   :  { %1230 = vmax.xlane.f32.xlu0 %v1229_v58 }
 0x52b   :  { %1480 = vmatpush.bf16.msrb.mxu1 %v5364_v18  ;;  %1559 = vmatpush.bf16.msrb.mxu2 %v5374_v23 }
 0x52d   :  { %v1204_v59 = vpop.f32.mrf.mxu0 }
 0x52f   :  { %1481 = vmatpush.bf16.msrb.mxu1 %v5363_v20  ;;  %1560 = vmatpush.bf16.msrb.mxu2 %v5373_v25 }
 0x533   :  { %1482 = vmatpush.bf16.msrb.mxu1 %v5362_v22  ;;  %1561 = vmatpush.bf16.msrb.mxu2 %v5372_v26 }
 0x535   :  { %v1221_v60 = vpop.f32.mrf.mxu0 }
 0x536   :  { %v1226_v61 = vmul.f32 0.17677669, %v1221_v60  ;;  %v5533_v60 = vld [vmem:[%s7018_s7 + $0xb] ss:$0 sm:$0xff] }
 0x537   :  { %1483 = vmatpush.bf16.msrb.mxu1 %v5361_v24  ;;  %1562 = vmatpush.bf16.msrb.mxu2 %v5371_v27 }
 0x538   :  { %v1228_v62 = vsel %vm447_vm15, %v1226_v61, -1e+09 }
 0x539   :  { %v1232_v63 = vsel %vm452_vm0, %v1228_v62, -inf }
 0x53a   :  { %1233 = vmax.xlane.f32.xlu1 %v1232_v63 }
 0x53b   :  { %1563 = vmatpush.bf16.msrb.mxu2 %v5370_v30 }
 0x53d   :  { %v1223_v0 = vpop.f32.mrf.mxu0 }
 0x53f   :  { %1564 = vmatpush.bf16.msrb.mxu2 %v5369_v31 }
 0x54d   :  { %v1404_v58 = vpop.f32.mrf.mxu0 }
 0x59d   :  { %v1231_v2 = vpop.xlane.xlu0 %1230 }
 0x59e   :  { %v1235_v3 = vsub.f32 %v1227_v57, %v1231_v2  ;;  %v5531_v57 = vld [vmem:[%s7018_s7 + $0x3] ss:$0 sm:$0xff] }
 0x59f   :  { %v1405_v59 = vadd.f32 %v5531_v57, %v1404_v58 }
 0x5a0   :  { %v1237_v4 = vmul.f32 1.442695, %v1235_v3 }
 0x5a2   :  { %5579 = vpow2.f32 %v1237_v4  ;;  %v1406_v4 = vpop.f32.mrf.mxu0 }
 0x5a8   :  { %v5580_v5 = vpop.eup %5579 }
 0x5a9   :  { %v1241_v6 = vsel %vm452_vm0, %v5580_v5, 0.0 }
 0x5aa   :  { %1242 = vadd.xlane.f32.xlu2 %v1241_v6  ;;  %v1407_v6 = vadd.f32 %v5531_v57, %v1406_v4  ;;  %v5398_v4 = vld [vmem:[%s7021_s10 + $0x218] sm:$0xff] }
 0x5ad   :  { %v1234_v7 = vpop.xlane.xlu1 %1233 }
 0x5ae   :  { %v1236_v9 = vsub.f32 %v1228_v62, %v1234_v7  ;;  %v1571_v62 = vpack.c.bf16 %v1405_v59, %v1405_v59 }
 0x5b0   :  { %v1239_v10 = vmul.f32 1.442695, %v1236_v9  ;;  %v1572_v9 = vpack.c.bf16 %v1407_v6, %v1407_v6 }
 0x5b2   :  { %5581 = vpow2.f32 %v1239_v10  ;;  %v934_v10 = vadd.f32 %v6149_v46, %v6142_v43 }
 0x5b8   :  { %v5582_v12 = vpop.eup %5581 }
 0x5b9   :  { %v1244_v13 = vsel %vm452_vm0, %v5582_v12, 0.0 }
 0x5ba   :  { %1245 = vadd.xlane.f32.xlu0 %v1244_v13 }
 0x61d   :  { %v1243_v28 = vpop.xlane.xlu2 %1242 }
 0x61e   :  { %5583 = vrcp.f32 %v1243_v28 }
 0x624   :  { %v5584_v32 = vpop.eup %5583 }
 0x625   :  { %v1249_v33 = vmul.f32 %v5584_v32, %v5580_v5 }
 0x627   :  { %v1251_v34 = vpack.c.bf16 %v1249_v33, %v1249_v33 }
 0x629   :  { %4347 = vmatmul.msk.bf16.vlgmr.msra.gmra.mxu1 %vm452_vm0, %v1251_v34 }
 0x62d   :  { %v1246_v35 = vpop.xlane.xlu0 %1245 }
 0x62e   :  { %5585 = vrcp.f32 %v1246_v35 }
 0x634   :  { %v5586_v36 = vpop.eup %5585 }
 0x635   :  { %v1250_v37 = vmul.f32 %v5586_v36, %v5582_v12 }
 0x637   :  { %v1252_v38 = vpack.c.bf16 %v1250_v37, %v1250_v37 }
 0x639   :  { %4348 = vmatmul.msk.bf16.vlgmr.msra.gmra.mxu2 %vm452_vm0, %v1252_v38  ;;  %1484 = vmatmul.bf16.vlgmr.msrb.gmra.mxu1 %v5926_v50 }
 0x649   :  { %1565 = vmatmul.bf16.vlgmr.msrb.gmra.mxu2 %v5926_v50 }
 0x6a6   :  { %v1268_v41 = vpop.f32.mrf.mxu1 }
 0x6ae   :  { %v1270_v42 = vpop.f32.mrf.mxu1 }
 0x6af   :  { %v5378_v42 = vld [vmem:[%s7019_s8 + $0x38] sm:$0xff] }
 0x6b0   :  { %1708 = vmatpush.bf16.msra.mxu2 %v5378_v42 }
 0x6b6   :  { %v1485_v47 = vpop.f32.mrf.mxu1 }
 0x6b7   :  { %v1486_v48 = vadd.f32 %v5532_v45, %v1485_v47 }
 0x6b9   :  { %v1573_v49 = vpack.c.bf16 %v1486_v48, %v1486_v48 }
 0x6bb   :  { %v1581_v50 = vsel %vm406_vm13, %v1573_v49, 0 }
 0x6bc   :  { %v1287_v11 = vpop.f32.mrf.mxu2  ;;  %1590 = vmatpush.bf16.xpose.msra.mxu3 %v1581_v50 }
 0x6bd   :  { %v1291_v15 = vpack.c.bf16 %v1287_v11, %v1268_v41 }
 0x6be   :  { %v1487_v52 = vpop.f32.mrf.mxu1 }
 0x6bf   :  { %v1488_v53 = vadd.f32 %v5532_v45, %v1487_v52  ;;  %4361 = vmatmul.msk.bf16.vlgmr.msrb.gmra.mxu3 %vm406_vm13, %v1291_v15  ;;  %v5377_v45 = vld [vmem:[%s7019_s8 + $0x30] sm:$0xff]  ;;  %v5534_v15 = vld [vmem:[%s7020_s9] ss:$0 sm:$0xff]  ;;  %s5675_s9 = smov 8  }
 0x6c0   :  { %1709 = vmatpush.bf16.msra.mxu2 %v5377_v45  ;;  %v5384_v45 = vld [vmem:[%s7021_s10 + $0x28] sm:$0xff] }
 0x6c1   :  { %v1574_v54 = vpack.c.bf16 %v1488_v53, %v1488_v53 }
 0x6c3   :  { %v1600_v55 = vsel %vm406_vm13, %v1574_v54, 0 }
 0x6c4   :  { %v1289_v56 = vpop.f32.mrf.mxu2  ;;  %1609 = vmatpush.bf16.xpose.msrb.mxu3 %v1600_v55  ;;  %v936_v55 = vadd.f32 %v6152_v51, %v6144_v44  ;;  %v5402_v44 = vld [vmem:[%s7021_s10 + $0x238] sm:$0xff]  ;;  %v5401_v51 = vld [vmem:[%s7021_s10 + $0x230] sm:$0xff] }
 0x6c5   :  { %v5643_v56 = vld [vmem:[%s7035_s29] sm:$0xff] }
 0x6cc   :  { %v1566_v61 = vpop.f32.mrf.mxu2 }
 0x6cd   :  { %v1567_v63 = vadd.f32 %v5533_v60, %v1566_v61 }
 0x6cf   :  { %v1575_v0 = vpack.c.bf16 %v1567_v63, %v1567_v63  ;;  %4506 = vmatmul.msk.bf16.vlgmr.msra.gmra.mxu3 %vm406_vm13, %v1571_v62  ;;  %v5644_v62 = vld [vmem:[%s7035_s29 + $0x8] sm:$0xff] }
 0x6d1   :  { %v1647_v1 = vsel %vm480_vm14, %v1575_v0, 0  ;;  %v5394_v0 = vld [vmem:[%s7021_s10 + $0x138] sm:$0xff] }
 0x6d2   :  { %1656 = vmatpush.bf16.msrb.mxu0 %v1647_v1  ;;  %v5393_v1 = vld [vmem:[%s7021_s10 + $0x130] sm:$0xff] }
 0x6d4   :  { %v1568_v2 = vpop.f32.mrf.mxu2 }
 0x6d5   :  { %v1569_v3 = vadd.f32 %v5533_v60, %v1568_v2  ;;  %v5400_v2 = vld [vmem:[%s7021_s10 + $0x228] sm:$0xff] }
 0x6d6   :  { %1956 = vmatpush.bf16.msra.mxu0 %v5394_v0  ;;  %v5406_v0 = vld [vmem:[%s7021_s10 + $0x48] sm:$0xff] }
 0x6d7   :  { %v1576_v5 = vpack.c.bf16 %v1569_v3, %v1569_v3  ;;  %v5399_v3 = vld [vmem:[%s7021_s10 + $0x220] sm:$0xff] }
 0x6d9   :  { %v1666_v7 = vsel %vm480_vm14, %v1576_v5, 0 }
 0x6da   :  { %1675 = vmatpush.bf16.msra.mxu1 %v1666_v7  ;;  %1957 = vmatpush.bf16.msra.mxu0 %v5393_v1  ;;  %v5397_v7 = vld [vmem:[%s7021_s10 + $0x210] sm:$0xff] }
 0x6de   :  { %2042 = vmatpush.bf16.msrb.mxu1 %v5402_v44 }
 0x6df   :  { %4507 = vmatmul.msk.bf16.vlgmr.msrb.gmra.mxu3 %vm406_vm13, %v1572_v9 }
 0x6e2   :  { %2043 = vmatpush.bf16.msrb.mxu1 %v5401_v51 }
 0x6e6   :  { %2044 = vmatpush.bf16.msrb.mxu1 %v5400_v2 }
 0x6ea   :  { %2045 = vmatpush.bf16.msrb.mxu1 %v5399_v3 }
 0x6ee   :  { %2046 = vmatpush.bf16.msrb.mxu1 %v5398_v4  ;;  %v5379_v4 = vld [vmem:[%s7021_s10] sm:$0xff] }
 0x6f2   :  { %2047 = vmatpush.bf16.msrb.mxu1 %v5397_v7  ;;  %v5405_v7 = vld [vmem:[%s7021_s10 + $0x40] sm:$0xff] }
 0x742   :  { %v1321_v12 = vpop.f32.mrf.mxu3 }
 0x743   :  { %v1326_v13 = vadd.f32 %v1321_v12, %v934_v10  ;;  %v5396_v12 = vld [vmem:[%s7021_s10 + $0x208] sm:$0xff] }
 0x744   :  { %2048 = vmatpush.bf16.msrb.mxu1 %v5396_v12 }
 0x74a   :  { %v1323_v14 = vpop.f32.mrf.mxu3 }
 0x74b   :  { %v1327_v58 = vadd.f32 %v1323_v14, %v936_v55 }
 0x752   :  { %v1592_v16 = vpop.f32.mrf.mxu3 }
 0x753   :  { %v1615_v17 = vmul.f32 0.17677669, %v1592_v16  ;;  %v5395_v16 = vld [vmem:[%s7021_s10 + $0x200] sm:$0xff] }
 0x754   :  { %2049 = vmatpush.bf16.msrb.mxu1 %v5395_v16  ;;  %v5537_v16 = vld [vmem:[%s7022_s11 + $0x8] ss:$0 sm:$0xff] }
 0x755   :  { %v1617_v18 = vsel %vm447_vm15, %v1615_v17, -1e+09  ;;  %v63_v17 = vld [vmem:[%s7037_s2] sm:$0xff] }
 0x756   :  { %v1619_v19 = vsel %vm452_vm0, %v1617_v18, -inf }
 0x757   :  { %1620 = vmax.xlane.f32.xlu1 %v1619_v19  ;;  %v5420_v19 = vld [vmem:[%s7021_s10 + $0x178] sm:$0xff] }
 0x75a   :  { %v1594_v20 = vpop.f32.mrf.mxu3 }
 0x762   :  { %v1611_v21 = vpop.f32.mrf.mxu3 }
 0x763   :  { %v1616_v22 = vmul.f32 0.17677669, %v1611_v21 }
 0x765   :  { %v1618_v23 = vsel %vm447_vm15, %v1616_v22, -1e+09 }
 0x766   :  { %v1622_v24 = vsel %vm452_vm0, %v1618_v23, -inf }
 0x767   :  { %1623 = vmax.xlane.f32.xlu2 %v1622_v24  ;;  %v5419_v24 = vld [vmem:[%s7021_s10 + $0x170] sm:$0xff] }
 0x76a   :  { %v1613_v43 = vpop.f32.mrf.mxu3 }
 0x76b   :  { %v5391_v43 = vld [vmem:[%s7021_s10 + $0x120] sm:$0xff] }
 0x7ca   :  { %v1621_v46 = vpop.xlane.xlu1 %1620 }
 0x7cb   :  { %v1625_v25 = vsub.f32 %v1617_v18, %v1621_v46  ;;  %v64_v18 = vld [vmem:[%s7037_s2 + $0x8] sm:$0xff] }
 0x7cc   :  { %v6322_v21 = vpack.c.bf16 %v64_v18, %v63_v17  ;;  %v5418_v46 = vld [vmem:[%s7021_s10 + $0x168] sm:$0xff] }
 0x7cd   :  { %v1627_v26 = vmul.f32 1.442695, %v1625_v25  ;;  %v5390_v25 = vld [vmem:[%s7021_s10 + $0x118] sm:$0xff] }
 0x7cf   :  { %5587 = vpow2.f32 %v1627_v26  ;;  %v5417_v26 = vld [vmem:[%s7021_s10 + $0x160] sm:$0xff] }
 0x7d5   :  { %v5588_v27 = vpop.eup %5587 }
 0x7d6   :  { %v1631_v28 = vsel %vm452_vm0, %v5588_v27, 0.0 }
 0x7d7   :  { %1632 = vadd.xlane.f32.xlu0 %v1631_v28  ;;  %v66_v28 = vld [vmem:[%s7037_s2 + $0x18] sm:$0xff] }
 0x7da   :  { %v1624_v30 = vpop.xlane.xlu2 %1623 }
 0x7db   :  { %v1626_v31 = vsub.f32 %v1618_v23, %v1624_v30  ;;  %v5392_v23 = vld [vmem:[%s7021_s10 + $0x128] sm:$0xff] }
 0x7dc   :  { %1958 = vmatpush.bf16.msra.mxu0 %v5392_v23 }
 0x7dd   :  { %v1629_v32 = vmul.f32 1.442695, %v1626_v31  ;;  %v5389_v31 = vld [vmem:[%s7021_s10 + $0x110] sm:$0xff] }
 0x7df   :  { %5589 = vpow2.f32 %v1629_v32  ;;  %v5416_v32 = vld [vmem:[%s7021_s10 + $0x158] sm:$0xff] }
 0x7e0   :  { %1959 = vmatpush.bf16.msra.mxu0 %v5391_v43 }
 0x7e4   :  { %1960 = vmatpush.bf16.msra.mxu0 %v5390_v25 }
 0x7e5   :  { %v5590_v33 = vpop.eup %5589 }
 0x7e6   :  { %v1634_v29 = vsel %vm452_vm0, %v5590_v33, 0.0 }
 0x7e7   :  { %1635 = vadd.xlane.f32.xlu1 %v1634_v29  ;;  %v5415_v29 = vld [vmem:[%s7021_s10 + $0x150] sm:$0xff] }
 0x7e8   :  { %1961 = vmatpush.bf16.msra.mxu0 %v5389_v31 }
 0x84a   :  { %v1633_v34 = vpop.xlane.xlu0 %1632 }
 0x84b   :  { %5591 = vrcp.f32 %v1633_v34  ;;  %v5387_v34 = vld [vmem:[%s7021_s10 + $0x100] sm:$0xff] }
 0x851   :  { %v5592_v35 = vpop.eup %5591 }
 0x852   :  { %v1639_v36 = vmul.f32 %v5592_v35, %v5588_v27  ;;  %v65_v27 = vld [vmem:[%s7037_s2 + $0x10] sm:$0xff]  ;;  %v5414_v35 = vld [vmem:[%s7021_s10 + $0x148] sm:$0xff] }
 0x853   :  { %v6351_v30 = vpack.c.bf16 %v66_v28, %v65_v27 }
 0x854   :  { %v1641_v37 = vpack.c.bf16 %v1639_v36, %v1639_v36  ;;  %v5386_v36 = vld [vmem:[%s7021_s10 + $0x38] sm:$0xff] }
 0x855   :  { %1875 = vmatpush.bf16.msra.mxu3 %v5386_v36 }
 0x856   :  { %4508 = vmatmul.msk.bf16.vlgmr.msrb.gmra.mxu0 %vm452_vm0, %v1641_v37  ;;  %v5412_v37 = vld [vmem:[%s7021_s10 + $0x78] sm:$0xff] }
 0x85a   :  { %v1636_v38 = vpop.xlane.xlu1 %1635 }
 0x85b   :  { %5593 = vrcp.f32 %v1636_v38  ;;  %v5413_v38 = vld [vmem:[%s7021_s10 + $0x140] sm:$0xff] }
 0x861   :  { %v5594_v39 = vpop.eup %5593 }
 0x862   :  { %v1640_v40 = vmul.f32 %v5594_v39, %v5590_v33  ;;  %v5388_v33 = vld [vmem:[%s7021_s10 + $0x108] sm:$0xff]  ;;  %v5385_v39 = vld [vmem:[%s7021_s10 + $0x30] sm:$0xff] }
 0x863   :  { %1962 = vmatpush.bf16.msra.mxu0 %v5388_v33  ;;  %1876 = vmatpush.bf16.msra.mxu3 %v5385_v39 }
 0x864   :  { %v1642_v41 = vpack.c.bf16 %v1640_v40, %v1640_v40  ;;  %v5411_v40 = vld [vmem:[%s7021_s10 + $0x70] sm:$0xff] }
 0x866   :  { %4509 = vmatmul.msk.bf16.vlgmr.msra.gmra.mxu1 %vm452_vm0, %v1642_v41  ;;  %vm2131_vm0 = vcmask 130048  }
 0x867   :  { %2353 = vmatpush.bf16.msra.mxu1 %v5420_v19  ;;  %1963 = vmatpush.bf16.msra.mxu0 %v5387_v34 }
 0x868   :  { %1877 = vmatpush.bf16.msra.mxu3 %v5384_v45 }
 0x86a   :  { %1964 = vmatmul.bf16.vlgmr.msra.gmra.mxu0 %v6322_v21 }
 0x86b   :  { %2354 = vmatpush.bf16.msra.mxu1 %v5419_v24  ;;  %2272 = vmatpush.bf16.msrb.mxu0 %v5412_v37 }
 0x86f   :  { %2355 = vmatpush.bf16.msra.mxu1 %v5418_v46  ;;  %2273 = vmatpush.bf16.msrb.mxu0 %v5411_v40 }
 0x873   :  { %2356 = vmatpush.bf16.msra.mxu1 %v5417_v26 }
 0x876   :  { %2050 = vmatmul.bf16.vlgmr.msrb.gmra.mxu1 %v6322_v21 }
 0x877   :  { %2357 = vmatpush.bf16.msra.mxu1 %v5416_v32 }
 0x87a   :  { %1969 = vmatmul.bf16.gmra.mxu0 %v6351_v30 }
 0x87b   :  { %2358 = vmatpush.bf16.msra.mxu1 %v5415_v29 }
 0x87f   :  { %2359 = vmatpush.bf16.msra.mxu1 %v5414_v35 }
 0x883   :  { %2360 = vmatpush.bf16.msra.mxu1 %v5413_v38 }
 0x886   :  { %2055 = vmatmul.bf16.gmra.mxu1 %v6351_v30 }
 0x896   :  { %2361 = vmatmul.bf16.vlgmr.msra.gmra.mxu1 %v6322_v21 }
 0x8a6   :  { %2366 = vmatmul.bf16.gmra.mxu1 %v6351_v30 }
 0x8d3   :  { %v1658_v47 = vpop.f32.mrf.mxu0 }
 0x8db   :  { %v1660_v48 = vpop.f32.mrf.mxu0 }
 0x8dc   :  { %v5383_v48 = vld [vmem:[%s7021_s10 + $0x20] sm:$0xff] }
 0x8dd   :  { %1878 = vmatpush.bf16.msra.mxu3 %v5383_v48 }
 0x8e3   :  { %v1677_v49 = vpop.f32.mrf.mxu1 }
 0x8e4   :  { %v1681_v50 = vpack.c.bf16 %v1677_v49, %v1658_v47  ;;  %v5410_v47 = vld [vmem:[%s7021_s10 + $0x68] sm:$0xff]  ;;  %v5409_v49 = vld [vmem:[%s7021_s10 + $0x60] sm:$0xff] }
 0x8e5   :  { %2274 = vmatpush.bf16.msrb.mxu0 %v5410_v47 }
 0x8e6   :  { %4522 = vmatmul.msk.bf16.vlgmr.msra.gmra.mxu2 %vm406_vm13, %v1681_v50 }
 0x8e9   :  { %2275 = vmatpush.bf16.msrb.mxu0 %v5409_v49 }
 0x8eb   :  { %v1679_v11 = vpop.f32.mrf.mxu1 }
 0x8f3   :  { %v2051_v17 = vpop.f32.mrf.mxu1 }
 0x8f4   :  { %v2052_v23 = vadd.f32 %v5537_v16, %v2051_v17 }
 0x8f6   :  { %v2067_v26 = vpack.c.bf16 %v2052_v23, %v2052_v23 }
 0x8f8   :  { %v2158_v29 = vunpack.c.l.b16 %v2067_v26 }
 0x8fb   :  { %v2053_v28 = vpop.f32.mrf.mxu1 }
 0x8fc   :  { %v2054_v31 = vadd.f32 %v5537_v16, %v2053_v28 }
 0x8fe   :  { %v2068_v34 = vpack.c.bf16 %v2054_v31, %v2054_v31 }
 0x900   :  { %v2159_v38 = vunpack.c.l.b16 %v2068_v34 }
 0x969   :  { %v1711_v52 = vpop.f32.mrf.mxu2 }
 0x96a   :  { %v1716_v53 = vadd.f32 %v1711_v52, %v1326_v13  ;;  %v5382_v52 = vld [vmem:[%s7021_s10 + $0x18] sm:$0xff] }
 0x96b   :  { %1879 = vmatpush.bf16.msra.mxu3 %v5382_v52  ;;  %v5535_v52 = vld [vmem:[%s7015_s4 + $0x1] ss:$0 sm:$0xff] }
 0x96c   :  { %v1722_v54 = vadd.f32 %v5534_v15, %v1716_v53 }
 0x96e   :  { %v6264_v57 = vadd.f32 %v5643_v56, %v1722_v54  ;;  %v5408_v54 = vld [vmem:[%s7021_s10 + $0x58] sm:$0xff]  ;;  %v5381_v56 = vld [vmem:[%s7021_s10 + $0x10] sm:$0xff] }
 0x96f   :  { %2276 = vmatpush.bf16.msrb.mxu0 %v5408_v54  ;;  %1880 = vmatpush.bf16.msra.mxu3 %v5381_v56 }
 0x970   :  { %1728 = vadd.xlane.f32.xlu2 %v6264_v57 }
 0x971   :  { %v1713_v59 = vpop.f32.mrf.mxu2 }
 0x972   :  { %v1717_v60 = vadd.f32 %v1713_v59, %v1327_v58  ;;  %v5407_v59 = vld [vmem:[%s7021_s10 + $0x50] sm:$0xff] }
 0x973   :  { %2277 = vmatpush.bf16.msrb.mxu0 %v5407_v59  ;;  %v5536_v59 = vld [vmem:[%s7016_s5 + $0x1] ss:$0 sm:$0xff] }
 0x974   :  { %v1723_v61 = vadd.f32 %v5534_v15, %v1717_v60 }
 0x976   :  { %v6270_v63 = vadd.f32 %v5644_v62, %v1723_v61  ;;  %v5380_v62 = vld [vmem:[%s7021_s10 + $0x8] sm:$0xff] }
 0x977   :  { %1881 = vmatpush.bf16.msra.mxu3 %v5380_v62  ;;  %2278 = vmatpush.bf16.msrb.mxu0 %v5406_v0 }
 0x978   :  { %1730 = vadd.xlane.f32.xlu0 %v6270_v63 }
 0x97b   :  { %1882 = vmatpush.bf16.msra.mxu3 %v5379_v4  ;;  %2279 = vmatpush.bf16.msrb.mxu0 %v5405_v7  ;;  %v5538_v4 = vld [vmem:[%s7022_s11 + $0x4] ss:$0 sm:$0xff] }
 0x9e3   :  { %v1729_v5 = vpop.xlane.xlu2 %1728 }
 0x9e4   :  { %v1732_v6 = vmul.f32 %v1729_v5, %v5777_v8 }
 0x9e6   :  { %v6299_v9 = vsub.f32 %v6264_v57, %v1732_v6 }
 0x9e8   :  { %v1736_v10 = vmul.f32 %v6299_v9, %v6299_v9 }
 0x9ea   :  { %1738 = vadd.xlane.f32.xlu1 %v1736_v10 }
 0x9eb   :  { %v1731_v13 = vpop.xlane.xlu0 %1730 }
 0x9ec   :  { %v1733_v14 = vmul.f32 %v1731_v13, %v5777_v8 }
 0x9ee   :  { %v6320_v20 = vsub.f32 %v6270_v63, %v1733_v14 }
 0x9f0   :  { %v1737_v22 = vmul.f32 %v6320_v20, %v6320_v20 }
 0x9f2   :  { %1740 = vadd.xlane.f32.xlu2 %v1737_v22 }
 0xa5d   :  { %v1739_v41 = vpop.xlane.xlu1 %1738 }
 0xa5e   :  { %v1742_v42 = vmul.f32 0.007874016, %v1739_v41 }
 0xa60   :  { %5595 = vrsqrt.f32 %v1742_v42  ;;  %vm1751_vm1 = vcmp.eq.f32.partialorder %v1742_v42, inf  ;;  %v1754_v3 = vand.u32 2147483648, %v1742_v42  ;;  %vm1753_vm2 = vcmp.eq.f32.partialorder %v1742_v42, 0.0 }
 0xa65   :  { %v1741_v50 = vpop.xlane.xlu2 %1740 }
 0xa66   :  { %v5596_v11 = vpop.eup %5595  ;;  %v1743_v15 = vmul.f32 0.007874016, %v1741_v50 }
 0xa67   :  { %v1745_v53 = vmul.f32 %v5596_v11, %v1742_v42 }
 0xa68   :  { %5597 = vrsqrt.f32 %v1743_v15  ;;  %vm1763_vm3 = vcmp.eq.f32.partialorder %v1743_v15, inf  ;;  %v1766_v19 = vand.u32 2147483648, %v1743_v15  ;;  %vm1765_vm4 = vcmp.eq.f32.partialorder %v1743_v15, 0.0 }
 0xa69   :  { %v1746_v55 = vmul.f32 %v5596_v11, %v1745_v53 }
 0xa6b   :  { %v1747_v58 = vmul.f32 0.5, %v1746_v55 }
 0xa6d   :  { %v1748_v60 = vsub.f32 1.5, %v1747_v58 }
 0xa6e   :  { %v5598_v61 = vpop.eup %5597 }
 0xa6f   :  { %v1749_v44 = vmul.f32 %v5596_v11, %v1748_v60  ;;  %v1757_v51 = vmul.f32 %v5598_v61, %v1743_v15 }
 0xa71   :  { %v1750_v1 = vmul.f32 %v1749_v44, %v1742_v42  ;;  %v1758_v2 = vmul.f32 %v5598_v61, %v1757_v51  ;;  %v2056_v44 = vpop.f32.mrf.mxu1 }
 0xa72   :  { %v2057_v51 = vadd.f32 %v5537_v16, %v2056_v44 }
 0xa73   :  { %v1752_v5 = vsel %vm1751_vm1, %v1742_v42, %v1750_v1  ;;  %v1759_v6 = vmul.f32 0.5, %v1758_v2  ;;  %v2160_v42 = vpack.c.b16 %v2159_v38, %v2158_v29 }
 0xa74   :  { %v1755_v10 = vsel %vm1753_vm2, %v1754_v3, %v1752_v5  ;;  %v2069_v0 = vpack.c.bf16 %v2057_v51, %v2057_v51  ;;  %v1965_v5 = vpop.f32.mrf.mxu0 }
 0xa75   :  { %v1768_v12 = vadd.f32 1e-06, %v1755_v10  ;;  %v1760_v13 = vsub.f32 1.5, %v1759_v6  ;;  %2172 = vmatpush.bf16.msrb.mxu3 %v2160_v42  ;;  %v1966_v10 = vadd.f32 %v5538_v4, %v1965_v5 }
 0xa77   :  { %5599 = vrcp.f32 %v1768_v12  ;;  %v1761_v14 = vmul.f32 %v5598_v61, %v1760_v13  ;;  %v1781_v33 = vand.u32 2147483648, %v1768_v12  ;;  %vm1775_vm6 = vweird.f32 %v1768_v12 }
 0xa78   :  { %v1779_v36 = vand.u32 2147483647, %v1768_v12  ;;  %v2063_v17 = vpack.c.bf16 %v1966_v10, %v1966_v10 }
 0xa79   :  { %v1762_v18 = vmul.f32 %v1761_v14, %v1743_v15  ;;  %v1782_v41 = vor.u32 1.1754944e-38, %v1781_v33  ;;  %v2058_v1 = vpop.f32.mrf.mxu1 }
 0xa7a   :  { %vm1780_vm8 = vcmp.eq.f32.partialorder %v1779_v36, 8.507059e+37  ;;  %v2059_v2 = vadd.f32 %v5537_v16, %v2058_v1  ;;  %v2073_v16 = vunpack.c.l.b16 %v2063_v17 }
 0xa7b   :  { %v1764_v22 = vsel %vm1763_vm3, %v1743_v15, %v1762_v18 }
 0xa7c   :  { %v1767_v24 = vsel %vm1765_vm4, %v1766_v19, %v1764_v22  ;;  %v2070_v3 = vpack.c.bf16 %v2059_v2, %v2059_v2  ;;  %v1967_v18 = vpop.f32.mrf.mxu0 }
 0xa7d   :  { %v5600_v43 = vpop.eup %5599  ;;  %v1769_v46 = vadd.f32 1e-06, %v1767_v24  ;;  %v1968_v19 = vadd.f32 %v5538_v4, %v1967_v18 }
 0xa7e   :  { %v1771_v25 = vmul.f32 %v5600_v43, %v1768_v12  ;;  %vm1776_vm5 = vweird.f32 %v5600_v43  ;;  %v2181_v6 = vunpack.c.l.b16 %v2070_v3  ;;  %v5539_v12 = vld [vmem:[%s7022_s11 + $0x5] ss:$0 sm:$0xff]  ;;  %v5672_v3 = vmov 0  }
 0xa7f   :  { %5601 = vrcp.f32 %v1769_v46  ;;  %vm1777_vm7 = vmor %vm1775_vm6, %vm1776_vm5  ;;  %v1795_v48 = vand.u32 2147483648, %v1769_v46  ;;  %v1793_v50 = vand.u32 2147483647, %v1769_v46  ;;  %vm1789_vm10 = vweird.f32 %v1769_v46 }
 0xa80   :  { %v1772_v27 = vsub.f32 1.0, %v1771_v25  ;;  %v2064_v22 = vpack.c.bf16 %v1968_v19, %v1968_v19  ;;  %v69_v19 = vld [vmem:[%s7014_s3 + $0x1] sm:$0x1] }
 0xa81   :  { %v1796_v53 = vor.u32 1.1754944e-38, %v1795_v48  ;;  %vm1794_vm12 = vcmp.eq.f32.partialorder %v1793_v50, 8.507059e+37  ;;  %v2362_v13 = vpop.f32.mrf.mxu1  ;;  %vm2122_vm1 = vcmp.ne.f32.partialorder %v69_v19, 0.0 }
 0xa82   :  { %v1773_v32 = vmul.f32 %v5600_v43, %v1772_v27  ;;  %v2363_v14 = vadd.f32 %v5539_v12, %v2362_v13  ;;  %v2074_v24 = vunpack.c.l.b16 %v2064_v22  ;;  %v2124_v22 = vsel %vm2122_vm1, 1, %v5672_v3 }
 0xa84   :  { %v1774_v35 = vadd.f32 %v5600_v43, %v1773_v32  ;;  %v2460_v23 = vpack.c.bf16 %v2363_v14, %v2363_v14  ;;  %v2075_v25 = vpack.c.b16 %v2074_v24, %v2073_v16  ;;  %v1970_v28 = vpop.f32.mrf.mxu0 }
 0xa85   :  { %v5602_v37 = vpop.eup %5601  ;;  %v1971_v36 = vadd.f32 %v5538_v4, %v1970_v28 }
 0xa86   :  { %v1778_v39 = vsel %vm1777_vm7, %v5600_v43, %v1774_v35  ;;  %v1785_v40 = vmul.f32 %v5602_v37, %v1769_v46  ;;  %vm1790_vm9 = vweird.f32 %v5602_v37  ;;  %v2470_v26 = vunpack.c.l.b16 %v2460_v23 }
 0xa87   :  { %v1783_v47 = vsel %vm1780_vm8, %v1782_v41, %v1778_v39  ;;  %vm1791_vm11 = vmor %vm1789_vm10, %vm1790_vm9  ;;  %v2080_v31 = vsel %vm406_vm13, %v2075_v25, 0  ;;  %v2126_v23 = vperm.slane %v2124_v22, 0  ;;  %v5542_v22 = vld [vmem:[%s7022_s11 + $0x9] ss:$0 sm:$0xff] }
 0xa88   :  { %v1786_v45 = vsub.f32 1.0, %v1785_v40  ;;  %v1798_v15 = vmul.f32 %v1783_v47, %v6299_v9  ;;  %2089 = vmatpush.bf16.xpose.msrb.mxu2 %v2080_v31  ;;  %v2065_v40 = vpack.c.bf16 %v1971_v36, %v1971_v36 }
 0xa89   :  { %v2364_v43 = vpop.f32.mrf.mxu1  ;;  %vm6476_vm2 = vcmp.eq.s32.totalorder %v2126_v23, 1 }
 0xa8a   :  { %v1787_v49 = vmul.f32 %v5602_v37, %v1786_v45  ;;  %v1801_v58 = vmul.f32 %v5535_v52, %v1798_v15  ;;  %v2365_v46 = vadd.f32 %v5539_v12, %v2364_v43  ;;  %v2097_v48 = vunpack.c.l.b16 %v2065_v40 }
 0xa8c   :  { %v1788_v11 = vadd.f32 %v5602_v37, %v1787_v49  ;;  %v1804_v61 = vadd.f32 %v5536_v59, %v1801_v58  ;;  %v2461_v27 = vpack.c.bf16 %v2365_v46, %v2365_v46  ;;  %v1972_v35 = vpop.f32.mrf.mxu0  ;;  %v5541_v58 = vld [vmem:[%s7022_s11] ss:$0 sm:$0xff]  ;;  %v5479_v46 = vld [vmem:[%s7021_s10 + $0x2f0] sm:$0xff] }
 0xa8e   :  { %v1792_v54 = vsel %vm1791_vm11, %v5602_v37, %v1788_v11  ;;  %v2471_v32 = vunpack.c.l.b16 %v2461_v27  ;;  %v1973_v37 = vadd.f32 %v5538_v4, %v1972_v35  ;;  %v5428_v35 = vld [vmem:[%s7021_s10 + $0x278] sm:$0xff] }
 0xa8f   :  { %v1797_v55 = vsel %vm1794_vm12, %v1796_v53, %v1792_v54  ;;  %v5540_v54 = vld [vmem:[%s7022_s11 + $0x1] ss:$0 sm:$0xff] }
 0xa90   :  { %v1799_v56 = vmul.f32 %v1797_v55, %v6320_v20  ;;  %v2180_v20 = vunpack.c.l.b16 %v2069_v0  ;;  %v2472_v33 = vpack.c.b16 %v2471_v32, %v2470_v26  ;;  %v2066_v41 = vpack.c.bf16 %v1973_v37, %v1973_v37 }
 0xa91   :  { %v2367_v29 = vpop.f32.mrf.mxu1 }
 0xa92   :  { %v1802_v60 = vmul.f32 %v5535_v52, %v1799_v56  ;;  %v2182_v7 = vpack.c.b16 %v2181_v6, %v2180_v20  ;;  %v2368_v34 = vadd.f32 %v5539_v12, %v2367_v29  ;;  %v2098_v49 = vunpack.c.l.b16 %v2066_v41  ;;  %v68_v20 = vld [vmem:[%s7014_s3] sm:$0x1] }
 0xa93   :  { %vm2121_vm14 = vcmp.ne.f32.partialorder %v68_v20, 0.0  ;;  %v2477_v10 = vsel %vm406_vm13, %v2472_v33, 0 }
 0xa94   :  { %v1805_v62 = vadd.f32 %v5536_v59, %v1802_v60  ;;  %v2462_v38 = vpack.c.bf16 %v2368_v34, %v2368_v34  ;;  %v2099_v15 = vpack.c.b16 %v2098_v49, %v2097_v48  ;;  %v2123_v4 = vsel %vm2121_vm14, 1, %v5672_v3 }
 0xa95   :  { %v2125_v6 = vperm.slane %v2123_v4, 0  ;;  %v5434_v4 = vld [vmem:[%s7021_s10 + $0x98] sm:$0xff] }
 0xa96   :  { %v6438_v9 = vpack.c.bf16 %v1805_v62, %v1804_v61  ;;  %v2494_v45 = vunpack.c.l.b16 %v2462_v38  ;;  %v2104_v53 = vsel %vm406_vm13, %v2099_v15, 0  ;;  %v5426_v15 = vld [vmem:[%s7021_s10 + $0x268] sm:$0xff] }
 0xa97   :  { %2113 = vmatpush.bf16.xpose.msra.mxu2 %v2104_v53  ;;  %vm6466_vm15 = vcmp.eq.s32.totalorder %v2125_v6, 1  ;;  %v5424_v53 = vld [vmem:[%s7021_s10 + $0x258] sm:$0xff]  ;;  %v5433_v6 = vld [vmem:[%s7021_s10 + $0x90] sm:$0xff] }
 0xa98   :  { %1883 = vmatmul.bf16.vlgmr.msra.gmra.mxu3 %v6438_v9  ;;  %2280 = vmatmul.bf16.vlgmr.msrb.gmra.mxu0 %v6438_v9 }
 0xa99   :  { %v2369_v39 = vpop.f32.mrf.mxu1  ;;  %2439 = vmatpush.bf16.msra.mxu3 %v5428_v35 }
 0xa9a   :  { %v2370_v42 = vadd.f32 %v5539_v12, %v2369_v39 }
 0xa9c   :  { %v2463_v47 = vpack.c.bf16 %v2370_v42, %v2370_v42 }
 0xa9e   :  { %v2495_v50 = vunpack.c.l.b16 %v2463_v47 }
 0xaa0   :  { %v2496_v11 = vpack.c.b16 %v2495_v50, %v2494_v45 }
 0xaa2   :  { %v2501_v52 = vsel %vm406_vm13, %v2496_v11, 0  ;;  %v5427_v11 = vld [vmem:[%s7021_s10 + $0x270] sm:$0xff] }
 0xaa3   :  { %2510 = vmatpush.bf16.xpose.msra.mxu0 %v2501_v52  ;;  %2440 = vmatpush.bf16.msra.mxu3 %v5427_v11  ;;  %v5425_v52 = vld [vmem:[%s7021_s10 + $0x260] sm:$0xff] }
 0xaa7   :  { %2441 = vmatpush.bf16.msra.mxu3 %v5426_v15  ;;  %v5446_v15 = vld [vmem:[%s7021_s10 + $0x1b8] sm:$0xff] }
 0xaab   :  { %2442 = vmatpush.bf16.msra.mxu3 %v5425_v52 }
 0xaaf   :  { %2443 = vmatpush.bf16.msra.mxu3 %v5424_v53 }
 0xb15   :  { %v2281_v55 = vpop.f32.mrf.mxu0 }
 0xb16   :  { %v6454_v56 = vadd.f32 %v5540_v54, %v2281_v55  ;;  %v5422_v55 = vld [vmem:[%s7021_s10 + $0x248] sm:$0xff] }
 0xb1b   :  { %v1884_v59 = vpop.f32.mrf.mxu3 }
 0xb1c   :  { %v1885_v60 = vadd.f32 %v5541_v58, %v1884_v59 }
 0xb1d   :  { %v2283_v61 = vpop.f32.mrf.mxu0 }
 0xb1e   :  { %v2061_v62 = vpack.c.bf16 %v1885_v60, %v1885_v60  ;;  %v2284_v44 = vadd.f32 %v5540_v54, %v2283_v61  ;;  %v5423_v54 = vld [vmem:[%s7021_s10 + $0x250] sm:$0xff] }
 0xb1f   :  { %2444 = vmatpush.bf16.msra.mxu3 %v5423_v54 }
 0xb20   :  { %v2459_v51 = vpack.c.bf16 %v2284_v44, %v2284_v44  ;;  %4651 = vmatmul.msk.bf16.vlgmr.msrb.gmra.mxu2 %vm406_vm13, %v2061_v62  ;;  %v5438_v62 = vld [vmem:[%s7021_s10 + $0xb8] sm:$0xff] }
 0xb21   :  { %2194 = vmatpush.bf16.msrb.mxu2 %v2182_v7 }
 0xb22   :  { %4800 = vmatmul.msk.bf16.vlgmr.msra.gmra.mxu0 %vm406_vm13, %v2459_v51  ;;  %v5437_v51 = vld [vmem:[%s7021_s10 + $0xb0] sm:$0xff] }
 0xb23   :  { %v1886_v0 = vpop.f32.mrf.mxu3  ;;  %2445 = vmatpush.bf16.msra.mxu3 %v5422_v55 }
 0xb24   :  { %v1887_v1 = vadd.f32 %v5541_v58, %v1886_v0  ;;  %v5421_v58 = vld [vmem:[%s7021_s10 + $0x240] sm:$0xff] }
 0xb26   :  { %v2062_v2 = vpack.c.bf16 %v1887_v1, %v1887_v1  ;;  %v5436_v1 = vld [vmem:[%s7021_s10 + $0xa8] sm:$0xff] }
 0xb27   :  { %2446 = vmatpush.bf16.msra.mxu3 %v5421_v58  ;;  %v5445_v58 = vld [vmem:[%s7021_s10 + $0x1b0] sm:$0xff] }
 0xb30   :  { %4652 = vmatmul.msk.bf16.vlgmr.msra.gmra.mxu2 %vm406_vm13, %v2062_v2  ;;  %v5435_v2 = vld [vmem:[%s7021_s10 + $0xa0] sm:$0xff] }
 0xb31   :  { %2486 = vmatpush.bf16.xpose.msra.mxu2 %v2477_v10  ;;  %v5432_v10 = vld [vmem:[%s7021_s10 + $0x88] sm:$0xff] }
 0xb9f   :  { %v2512_v5 = vpop.f32.mrf.mxu0 }
 0xba0   :  { %v2517_v27 = vmul.f32 0.17677669, %v2512_v5 }
 0xba2   :  { %v2519_v31 = vsel %vm6476_vm2, %v2517_v27, -1e+09 }
 0xba3   :  { %v2091_v7 = vpop.f32.mrf.mxu2  ;;  %v2523_v32 = vsel %vm2131_vm0, %v2519_v31, -inf }
 0xba4   :  { %v2119_v13 = vmul.f32 0.17677669, %v2091_v7  ;;  %v5431_v7 = vld [vmem:[%s7021_s10 + $0x80] sm:$0xff] }
 0xba6   :  { %v2129_v14 = vsel %vm6466_vm15, %v2119_v13, -1e+09  ;;  %v2458_v13 = vpack.c.bf16 %v6454_v56, %v6454_v56 }
 0xba7   :  { %v2514_v17 = vpop.f32.mrf.mxu0  ;;  %v2132_v18 = vsel %vm2131_vm0, %v2129_v14, -inf }
 0xba8   :  { %2133 = vmax.xlane.f32.xlu0 %v2132_v18 }
 0xbab   :  { %v2093_v16 = vpop.f32.mrf.mxu2 }
 0xbb3   :  { %v2115_v24 = vpop.f32.mrf.mxu2 }
 0xbb4   :  { %v2120_v43 = vmul.f32 0.17677669, %v2115_v24 }
 0xbb6   :  { %v2130_v25 = vsel %vm6476_vm2, %v2120_v43, -1e+09 }
 0xbb7   :  { %v2135_v26 = vsel %vm2131_vm0, %v2130_v25, -inf }
 0xbb8   :  { %2136 = vmax.xlane.f32.xlu1 %v2135_v26 }
 0xbbb   :  { %v2117_v28 = vpop.f32.mrf.mxu2 }
 0xbc0   :  { %2524 = vmax.xlane.f32.xlu1 %v2523_v32 }
 0xc1b   :  { %v2134_v33 = vpop.xlane.xlu0 %2133 }
 0xc1c   :  { %v2138_v29 = vsub.f32 %v2129_v14, %v2134_v33 }
 0xc1e   :  { %v2140_v34 = vmul.f32 1.442695, %v2138_v29 }
 0xc20   :  { %5603 = vpow2.f32 %v2140_v34 }
 0xc26   :  { %v5604_v36 = vpop.eup %5603 }
 0xc27   :  { %v2144_v37 = vsel %vm2131_vm0, %v5604_v36, 0.0 }
 0xc28   :  { %2145 = vadd.xlane.f32.xlu2 %v2144_v37 }
 0xc2b   :  { %v2137_v38 = vpop.xlane.xlu1 %2136 }
 0xc2c   :  { %v2139_v39 = vsub.f32 %v2130_v25, %v2137_v38 }
 0xc2e   :  { %v2142_v40 = vmul.f32 1.442695, %v2139_v39 }
 0xc30   :  { %5605 = vpow2.f32 %v2142_v40 }
 0xc33   :  { %v2525_v41 = vpop.xlane.xlu1 %2524 }
 0xc34   :  { %v2527_v42 = vsub.f32 %v2519_v31, %v2525_v41 }
 0xc36   :  { %v5606_v45 = vpop.eup %5605  ;;  %v2530_v47 = vmul.f32 1.442695, %v2527_v42 }
 0xc37   :  { %v2147_v48 = vsel %vm2131_vm0, %v5606_v45, 0.0 }
 0xc38   :  { %5607 = vpow2.f32 %v2530_v47  ;;  %2148 = vadd.xlane.f32.xlu0 %v2147_v48 }
 0xc3e   :  { %v6491_v49 = vpop.eup %5607 }
 0xc3f   :  { %v2535_v50 = vsel %vm2131_vm0, %v6491_v49, 0.0 }
 0xc40   :  { %2536 = vadd.xlane.f32.xlu2 %v2535_v50  ;;  %v6563_v50 = vld [vmem:[%s7022_s11 + $0x2] ss:$0 sm:$0xff] }
 0xc9b   :  { %v2146_v59 = vpop.xlane.xlu2 %2145 }
 0xc9c   :  { %5609 = vrcp.f32 %v2146_v59  ;;  %v5443_v59 = vld [vmem:[%s7021_s10 + $0x1a0] sm:$0xff] }
 0xca2   :  { %v5610_v60 = vpop.eup %5609 }
 0xca3   :  { %v2152_v61 = vmul.f32 %v5610_v60, %v5604_v36  ;;  %v5442_v60 = vld [vmem:[%s7021_s10 + $0x198] sm:$0xff] }
 0xca5   :  { %v2154_v44 = vpack.c.bf16 %v2152_v61, %v2152_v61  ;;  %v5441_v61 = vld [vmem:[%s7021_s10 + $0x190] sm:$0xff] }
 0xca7   :  { %4653 = vmatmul.msk.bf16.vlgmr.msrb.gmra.mxu3 %vm2131_vm0, %v2154_v44  ;;  %v5439_v44 = vld [vmem:[%s7021_s10 + $0x180] sm:$0xff] }
 0xca8   :  { %2719 = vmatpush.bf16.msrb.mxu3 %v5438_v62  ;;  %v5440_v62 = vld [vmem:[%s7021_s10 + $0x188] sm:$0xff] }
 0xcab   :  { %v2149_v0 = vpop.xlane.xlu0 %2148 }
 0xcac   :  { %5611 = vrcp.f32 %v2149_v0  ;;  %2720 = vmatpush.bf16.msrb.mxu3 %v5437_v51  ;;  %v5464_v51 = vld [vmem:[%s7021_s10 + $0xf8] sm:$0xff]  ;;  %v5463_v0 = vld [vmem:[%s7021_s10 + $0xf0] sm:$0xff] }
 0xcb0   :  { %2721 = vmatpush.bf16.msrb.mxu3 %v5436_v1  ;;  %v5462_v1 = vld [vmem:[%s7021_s10 + $0xe8] sm:$0xff] }
 0xcb2   :  { %v5612_v20 = vpop.eup %5611 }
 0xcb3   :  { %v2153_v3 = vmul.f32 %v5612_v20, %v5606_v45  ;;  %v2537_v34 = vpop.xlane.xlu2 %2536  ;;  %v5460_v20 = vld [vmem:[%s7021_s10 + $0xd8] sm:$0xff] }
 0xcb4   :  { %2722 = vmatpush.bf16.msrb.mxu3 %v5435_v2  ;;  %5613 = vrcp.f32 %v2537_v34  ;;  %v5461_v2 = vld [vmem:[%s7021_s10 + $0xe0] sm:$0xff] }
 0xcb5   :  { %v2155_v5 = vpack.c.bf16 %v2153_v3, %v2153_v3  ;;  %v5459_v3 = vld [vmem:[%s7021_s10 + $0xd0] sm:$0xff] }
 0xcb7   :  { %4654 = vmatmul.msk.bf16.vlgmr.msrb.gmra.mxu2 %vm2131_vm0, %v2155_v5  ;;  %2447 = vmatmul.bf16.vlgmr.msra.gmra.mxu3 %v6322_v21  ;;  %v5457_v5 = vld [vmem:[%s7021_s10 + $0xc0] sm:$0xff] }
 0xcb8   :  { %2723 = vmatpush.bf16.msrb.mxu3 %v5434_v4  ;;  %v5458_v4 = vld [vmem:[%s7021_s10 + $0xc8] sm:$0xff] }
 0xcba   :  { %v5614_v42 = vpop.eup %5613 }
 0xcbb   :  { %v2541_v11 = vmul.f32 %v5614_v42, %v6491_v49  ;;  %v5444_v49 = vld [vmem:[%s7021_s10 + $0x1a8] sm:$0xff] }
 0xcbc   :  { %2724 = vmatpush.bf16.msrb.mxu3 %v5433_v6 }
 0xcbd   :  { %v2543_v55 = vpack.c.bf16 %v2541_v11, %v2541_v11 }
 0xcc0   :  { %2725 = vmatpush.bf16.msrb.mxu3 %v5432_v10 }
 0xcc4   :  { %2726 = vmatpush.bf16.msrb.mxu3 %v5431_v7 }
 0xcc7   :  { %2452 = vmatmul.bf16.gmra.mxu3 %v6351_v30  ;;  %4799 = vmatmul.msk.bf16.vlgmr.msra.gmra.mxu2 %vm406_vm13, %v2458_v13 }
 0xcd7   :  { %2727 = vmatmul.bf16.vlgmr.msrb.gmra.mxu3 %v6438_v9 }
 0xd2a   :  { %v6548_v14 = vpop.f32.mrf.mxu3 }
 0xd32   :  { %v2176_v17 = vpop.f32.mrf.mxu3 }
 0xd3a   :  { %v6550_v18 = vpop.f32.mrf.mxu2  ;;  %v2448_v19 = vpop.f32.mrf.mxu3 }
 0xd3b   :  { %v2200_v16 = vpack.c.bf16 %v6550_v18, %v6548_v14  ;;  %v2449_v56 = vadd.f32 %v5542_v22, %v2448_v19  ;;  %v5454_v14 = vld [vmem:[%s7021_s10 + $0x2b8] sm:$0xff]  ;;  %v5453_v18 = vld [vmem:[%s7021_s10 + $0x2b0] sm:$0xff] }
 0xd3d   :  { %v2464_v23 = vpack.c.bf16 %v2449_v56, %v2449_v56 }
 0xd3f   :  { %v2546_v26 = vunpack.c.l.b16 %v2464_v23  ;;  %v5544_v23 = vld [vmem:[%s7022_s11 + $0x6] ss:$0 sm:$0xff] }
 0xd42   :  { %v2198_v24 = vpop.f32.mrf.mxu2  ;;  %v2450_v43 = vpop.f32.mrf.mxu3 }
 0xd43   :  { %v2451_v25 = vadd.f32 %v5542_v22, %v2450_v43 }
 0xd45   :  { %v2465_v27 = vpack.c.bf16 %v2451_v25, %v2451_v25 }
 0xd47   :  { %v2547_v28 = vunpack.c.l.b16 %v2465_v27 }
 0xd49   :  { %v2548_v31 = vpack.c.b16 %v2547_v28, %v2546_v26 }
 0xd4a   :  { %v2453_v32 = vpop.f32.mrf.mxu3  ;;  %v2488_v33 = vpop.f32.mrf.mxu2 }
 0xd4b   :  { %v2516_v29 = vmul.f32 0.17677669, %v2488_v33  ;;  %2560 = vmatpush.bf16.msrb.mxu2 %v2548_v31  ;;  %v2454_v35 = vadd.f32 %v5542_v22, %v2453_v32 }
 0xd4d   :  { %v2518_v36 = vsel %vm6466_vm15, %v2516_v29, -1e+09  ;;  %v2466_v38 = vpack.c.bf16 %v2454_v35, %v2454_v35 }
 0xd4e   :  { %v2520_v37 = vsel %vm2131_vm0, %v2518_v36, -inf }
 0xd4f   :  { %2521 = vmax.xlane.f32.xlu0 %v2520_v37  ;;  %v2568_v45 = vunpack.c.l.b16 %v2466_v38 }
 0xd52   :  { %v2455_v39 = vpop.f32.mrf.mxu3  ;;  %v2490_v40 = vpop.f32.mrf.mxu2 }
 0xd53   :  { %v2456_v41 = vadd.f32 %v5542_v22, %v2455_v39  ;;  %v6630_v39 = vld [vmem:[%s7022_s11 + $0x3] ss:$0 sm:$0xff] }
 0xd55   :  { %v2467_v47 = vpack.c.bf16 %v2456_v41, %v2456_v41 }
 0xd57   :  { %v2569_v48 = vunpack.c.l.b16 %v2467_v47 }
 0xd59   :  { %v2570_v52 = vpack.c.b16 %v2569_v48, %v2568_v45 }
 0xd5a   :  { %v2728_v53 = vpop.f32.mrf.mxu3 }
 0xd5b   :  { %v6570_v54 = vadd.f32 %v6563_v50, %v2728_v53  ;;  %2582 = vmatpush.bf16.msrb.mxu0 %v2570_v52  ;;  %v5403_v52 = vld [vmem:[%s7023_s12] sm:$0xff] }
 0xd5e   :  { %4802 = vmatmul.msk.bf16.vlgmr.msrb.gmra.mxu0 %vm2131_vm0, %v2543_v55 }
 0xd5f   :  { %2800 = vmatpush.bf16.msra.mxu0 %v5446_v15  ;;  %v5404_v15 = vld [vmem:[%s7023_s12 + $0x8] sm:$0xff] }
 0xd60   :  { %2644 = vmatpush.bf16.msra.mxu2 %v5404_v15 }
 0xd62   :  { %v2730_v41 = vpop.f32.mrf.mxu3 }
 0xd63   :  { %2801 = vmatpush.bf16.msra.mxu0 %v5445_v58  ;;  %v2731_v48 = vadd.f32 %v6563_v50, %v2730_v41 }
 0xd64   :  { %2645 = vmatpush.bf16.msra.mxu2 %v5403_v52 }
 0xd65   :  { %v2906_v11 = vpack.c.bf16 %v2731_v48, %v2731_v48 }
 0xd67   :  { %2802 = vmatpush.bf16.msra.mxu0 %v5444_v49 }
 0xd6b   :  { %2803 = vmatpush.bf16.msra.mxu0 %v5443_v59  ;;  %v2905_v59 = vpack.c.bf16 %v6570_v54, %v6570_v54 }
 0xd6f   :  { %2804 = vmatpush.bf16.msra.mxu0 %v5442_v60  ;;  %v5430_v60 = vld [vmem:[%s7023_s12 + $0x18] sm:$0xff] }
 0xd70   :  { %2615 = vmatpush.bf16.msrb.mxu1 %v5430_v60 }
 0xd73   :  { %2805 = vmatpush.bf16.msra.mxu0 %v5441_v61  ;;  %v5429_v61 = vld [vmem:[%s7023_s12 + $0x10] sm:$0xff] }
 0xd74   :  { %2616 = vmatpush.bf16.msrb.mxu1 %v5429_v61 }
 0xd77   :  { %2806 = vmatpush.bf16.msra.mxu0 %v5440_v62 }
 0xd78   :  { %2886 = vmatpush.bf16.msra.mxu1 %v5454_v14 }
 0xd7b   :  { %2807 = vmatpush.bf16.msra.mxu0 %v5439_v44 }
 0xd7c   :  { %2887 = vmatpush.bf16.msra.mxu1 %v5453_v18 }
 0xd7e   :  { %2808 = vmatmul.bf16.vlgmr.msra.gmra.mxu0 %v6322_v21 }
 0xd7f   :  { %3139 = vmatpush.bf16.msrb.mxu0 %v5464_v51 }
 0xd83   :  { %3140 = vmatpush.bf16.msrb.mxu0 %v5463_v0 }
 0xd87   :  { %3141 = vmatpush.bf16.msrb.mxu0 %v5462_v1  ;;  %v5451_v1 = vld [vmem:[%s7021_s10 + $0x2a0] sm:$0xff] }
 0xd8b   :  { %3142 = vmatpush.bf16.msrb.mxu0 %v5461_v2  ;;  %v5450_v2 = vld [vmem:[%s7021_s10 + $0x298] sm:$0xff] }
 0xd8e   :  { %2813 = vmatmul.bf16.gmra.mxu0 %v6351_v30 }
 0xd8f   :  { %3143 = vmatpush.bf16.msrb.mxu0 %v5460_v20  ;;  %v5449_v20 = vld [vmem:[%s7021_s10 + $0x290] sm:$0xff] }
 0xd93   :  { %3144 = vmatpush.bf16.msrb.mxu0 %v5459_v3  ;;  %v5448_v3 = vld [vmem:[%s7021_s10 + $0x288] sm:$0xff] }
 0xd97   :  { %3145 = vmatpush.bf16.msrb.mxu0 %v5458_v4  ;;  %v5447_v4 = vld [vmem:[%s7021_s10 + $0x280] sm:$0xff] }
 0xd9b   :  { %3146 = vmatpush.bf16.msrb.mxu0 %v5457_v5 }
 0xd9e   :  { %3147 = vmatmul.bf16.vlgmr.msrb.gmra.mxu0 %v6438_v9 }
 0xdc2   :  { %v2522_v6 = vpop.xlane.xlu0 %2521 }
 0xdc3   :  { %v2526_v10 = vsub.f32 %v2518_v36, %v2522_v6  ;;  %v5472_v6 = vld [vmem:[%s7021_s10 + $0x1f8] sm:$0xff] }
 0xdc5   :  { %v2528_v7 = vmul.f32 1.442695, %v2526_v10 }
 0xdc7   :  { %5615 = vpow2.f32 %v2528_v7  ;;  %v5471_v7 = vld [vmem:[%s7021_s10 + $0x1f0] sm:$0xff] }
 0xdcd   :  { %v5616_v13 = vpop.eup %5615 }
 0xdce   :  { %v2532_v17 = vsel %vm2131_vm0, %v5616_v13, 0.0 }
 0xdcf   :  { %2533 = vadd.xlane.f32.xlu1 %v2532_v17  ;;  %v5470_v17 = vld [vmem:[%s7021_s10 + $0x1e8] sm:$0xff] }
 0xddb   :  { %v6622_v19 = vpop.f32.mrf.mxu0 }
 0xde3   :  { %v2586_v22 = vpop.f32.mrf.mxu0 }
 0xde4   :  { %v5469_v22 = vld [vmem:[%s7021_s10 + $0x1e0] sm:$0xff] }
 0xdfb   :  { %v2809_v56 = vpop.f32.mrf.mxu0 }
 0xdfc   :  { %v2810_v24 = vadd.f32 %v5544_v23, %v2809_v56 }
 0xdfe   :  { %v2907_v43 = vpack.c.bf16 %v2810_v24, %v2810_v24 }
 0xe00   :  { %v2917_v26 = vunpack.c.l.b16 %v2907_v43  ;;  %v5466_v43 = vld [vmem:[%s7021_s10 + $0x1c8] sm:$0xff] }
 0xe03   :  { %v2811_v25 = vpop.f32.mrf.mxu0 }
 0xe04   :  { %v2812_v9 = vadd.f32 %v5544_v23, %v2811_v25  ;;  %v5465_v25 = vld [vmem:[%s7021_s10 + $0x1c0] sm:$0xff] }
 0xe06   :  { %v2908_v27 = vpack.c.bf16 %v2812_v9, %v2812_v9 }
 0xe08   :  { %v2918_v28 = vunpack.c.l.b16 %v2908_v27 }
 0xe0a   :  { %v2919_v31 = vpack.c.b16 %v2918_v28, %v2917_v26 }
 0xe0b   :  { %v2814_v32 = vpop.f32.mrf.mxu0 }
 0xe0c   :  { %v2815_v33 = vadd.f32 %v5544_v23, %v2814_v32  ;;  %v2924_v50 = vsel %vm406_vm13, %v2919_v31, 0 }
 0xe0e   :  { %v2909_v29 = vpack.c.bf16 %v2815_v33, %v2815_v33 }
 0xe10   :  { %v2941_v36 = vunpack.c.l.b16 %v2909_v29 }
 0xe13   :  { %v2816_v34 = vpop.f32.mrf.mxu0 }
 0xe14   :  { %v2817_v35 = vadd.f32 %v5544_v23, %v2816_v34  ;;  %v5467_v23 = vld [vmem:[%s7021_s10 + $0x1d0] sm:$0xff] }
 0xe16   :  { %v2910_v37 = vpack.c.bf16 %v2817_v35, %v2817_v35 }
 0xe18   :  { %v2942_v38 = vunpack.c.l.b16 %v2910_v37 }
 0xe1a   :  { %v2943_v40 = vpack.c.b16 %v2942_v38, %v2941_v36 }
 0xe1b   :  { %v3148_v42 = vpop.f32.mrf.mxu0 }
 0xe1c   :  { %v6633_v45 = vadd.f32 %v6630_v39, %v3148_v42  ;;  %v2948_v47 = vsel %vm406_vm13, %v2943_v40, 0  ;;  %v5546_v40 = vld [vmem:[%s7022_s11 + $0xa] ss:$0 sm:$0xff] }
 0xe1d   :  { %2957 = vmatpush.bf16.xpose.msra.mxu3 %v2948_v47 }
 0xe24   :  { %4970 = vmatmul.msk.bf16.vlgmr.msra.gmra.mxu3 %vm406_vm13, %v2906_v11 }
 0xe42   :  { %v2534_v53 = vpop.xlane.xlu1 %2533 }
 0xe43   :  { %5617 = vrcp.f32 %v2534_v53 }
 0xe49   :  { %v5618_v55 = vpop.eup %5617 }
 0xe4a   :  { %v2540_v58 = vmul.f32 %v5618_v55, %v5616_v13 }
 0xe4c   :  { %v2542_v49 = vpack.c.bf16 %v2540_v58, %v2540_v58 }
 0xe4e   :  { %4801 = vmatmul.msk.bf16.vlgmr.msrb.gmra.mxu2 %vm2131_vm0, %v2542_v49 }
 0xe4f   :  { %2933 = vmatpush.bf16.xpose.msrb.mxu2 %v2924_v50 }
 0xe5e   :  { %4824 = vmatmul.msk.bf16.vlgmr.msra.gmra.mxu2 %vm406_vm13, %v2200_v16  ;;  %v5452_v16 = vld [vmem:[%s7021_s10 + $0x2a8] sm:$0xff] }
 0xe5f   :  { %2888 = vmatpush.bf16.msra.mxu1 %v5452_v16 }
 0xe63   :  { %2889 = vmatpush.bf16.msra.mxu1 %v5451_v1 }
 0xe67   :  { %2890 = vmatpush.bf16.msra.mxu1 %v5450_v2 }
 0xe6b   :  { %2891 = vmatpush.bf16.msra.mxu1 %v5449_v20 }
 0xe6e   :  { %4969 = vmatmul.msk.bf16.vlgmr.msrb.gmra.mxu2 %vm406_vm13, %v2905_v59 }
 0xe6f   :  { %2892 = vmatpush.bf16.msra.mxu1 %v5448_v3 }
 0xe73   :  { %2893 = vmatpush.bf16.msra.mxu1 %v5447_v4 }
 0xea7   :  { %v2959_v54 = vpop.f32.mrf.mxu3 }
 0xea8   :  { %v2964_v62 = vmul.f32 0.17677669, %v2959_v54 }
 0xeaa   :  { %v2966_v44 = vsel %vm6476_vm2, %v2964_v62, -1e+09 }
 0xeab   :  { %v2970_v51 = vsel %vm2131_vm0, %v2966_v44, -inf }
 0xeac   :  { %2971 = vmax.xlane.f32.xlu0 %v2970_v51 }
 0xeaf   :  { %v2961_v0 = vpop.f32.mrf.mxu3 }
 0xeb0   :  { %v5547_v0 = vld [vmem:[%s7022_s11 + $0x7] ss:$0 sm:$0xff] }
 0xed1   :  { %v2562_v5 = vpop.f32.mrf.mxu2 }
 0xed2   :  { %v2588_v10 = vpack.c.bf16 %v6622_v19, %v2562_v5  ;;  %v5468_v19 = vld [vmem:[%s7021_s10 + $0x1d8] sm:$0xff] }
 0xed4   :  { %4815 = vmatmul.msk.bf16.vlgmr.msrb.gmra.mxu1 %vm406_vm13, %v2588_v10 }
 0xed5   :  { %3220 = vmatpush.bf16.msrb.mxu1 %v5472_v6 }
 0xed9   :  { %v2564_v13 = vpop.f32.mrf.mxu2  ;;  %3221 = vmatpush.bf16.msrb.mxu1 %v5471_v7 }
 0xedd   :  { %3222 = vmatpush.bf16.msrb.mxu1 %v5470_v17 }
 0xee1   :  { %v6700_v56 = vpop.f32.mrf.mxu2  ;;  %3223 = vmatpush.bf16.msrb.mxu1 %v5469_v22 }
 0xee4   :  { %2894 = vmatmul.bf16.vlgmr.msra.gmra.mxu1 %v6322_v21 }
 0xee5   :  { %3224 = vmatpush.bf16.msrb.mxu1 %v5468_v19 }
 0xee9   :  { %v6709_v24 = vpop.f32.mrf.mxu2  ;;  %3225 = vmatpush.bf16.msrb.mxu1 %v5467_v23 }
 0xeed   :  { %3226 = vmatpush.bf16.msrb.mxu1 %v5466_v43 }
 0xef1   :  { %v2935_v9 = vpop.f32.mrf.mxu2  ;;  %3227 = vmatpush.bf16.msrb.mxu1 %v5465_v25 }
 0xef2   :  { %v2963_v26 = vmul.f32 0.17677669, %v2935_v9 }
 0xef4   :  { %2899 = vmatmul.bf16.gmra.mxu1 %v6351_v30  ;;  %v2965_v27 = vsel %vm6466_vm15, %v2963_v26, -1e+09 }
 0xef5   :  { %v2967_v28 = vsel %vm2131_vm0, %v2965_v27, -inf }
 0xef6   :  { %2968 = vmax.xlane.f32.xlu2 %v2967_v28  ;;  %v3150_v28 = vpop.f32.mrf.mxu0 }
 0xef9   :  { %v2937_v31 = vpop.f32.mrf.mxu2 }
 0xf04   :  { %3228 = vmatmul.bf16.vlgmr.msrb.gmra.mxu1 %v6322_v21 }
 0xf14   :  { %3233 = vmatmul.bf16.gmra.mxu1 %v6351_v30 }
 0xf1f   :  { %v2972_v32 = vpop.xlane.xlu0 %2971 }
 0xf20   :  { %v2974_v33 = vsub.f32 %v2966_v44, %v2972_v32 }
 0xf22   :  { %v2977_v29 = vmul.f32 1.442695, %v2974_v33  ;;  %v3151_v33 = vadd.f32 %v6630_v39, %v3150_v28  ;;  %v5455_v39 = vld [vmem:[%s7023_s12 + $0x20] sm:$0xff] }
 0xf24   :  { %5619 = vpow2.f32 %v2977_v29 }
 0xf2a   :  { %v5620_v34 = vpop.eup %5619 }
 0xf2b   :  { %v2982_v35 = vsel %vm2131_vm0, %v5620_v34, 0.0 }
 0xf2c   :  { %2983 = vadd.xlane.f32.xlu2 %v2982_v35 }
 0xf51   :  { %v6724_v36 = vpop.f32.mrf.mxu1 }
 0xf59   :  { %v6726_v37 = vpop.f32.mrf.mxu1 }
 0xf61   :  { %v2895_v38 = vpop.f32.mrf.mxu1 }
 0xf62   :  { %v2896_v41 = vadd.f32 %v5546_v40, %v2895_v38  ;;  %v3326_v38 = vpack.c.bf16 %v3151_v33, %v3151_v33 }
 0xf64   :  { %v2911_v42 = vpack.c.bf16 %v2896_v41, %v2896_v41 }
 0xf66   :  { %v2993_v52 = vunpack.c.l.b16 %v2911_v42 }
 0xf69   :  { %v2897_v47 = vpop.f32.mrf.mxu1  ;;  %v2969_v48 = vpop.xlane.xlu2 %2968 }
 0xf6a   :  { %v2898_v11 = vadd.f32 %v5546_v40, %v2897_v47  ;;  %v2973_v15 = vsub.f32 %v2965_v27, %v2969_v48  ;;  %v5456_v48 = vld [vmem:[%s7023_s12 + $0x28] sm:$0xff] }
 0xf6c   :  { %v2912_v53 = vpack.c.bf16 %v2898_v11, %v2898_v11  ;;  %v2975_v55 = vmul.f32 1.442695, %v2973_v15 }
 0xf6e   :  { %v2994_v58 = vunpack.c.l.b16 %v2912_v53  ;;  %5621 = vpow2.f32 %v2975_v55 }
 0xf70   :  { %v2995_v49 = vpack.c.b16 %v2994_v58, %v2993_v52 }
 0xf71   :  { %v2900_v50 = vpop.f32.mrf.mxu1 }
 0xf72   :  { %3007 = vmatpush.bf16.msra.mxu2 %v2995_v49  ;;  %v2901_v60 = vadd.f32 %v5546_v40, %v2900_v50 }
 0xf74   :  { %v5622_v59 = vpop.eup %5621  ;;  %v2913_v14 = vpack.c.bf16 %v2901_v60, %v2901_v60 }
 0xf75   :  { %v2979_v61 = vsel %vm2131_vm0, %v5622_v59, 0.0 }
 0xf76   :  { %2980 = vadd.xlane.f32.xlu1 %v2979_v61  ;;  %v3015_v54 = vunpack.c.l.b16 %v2913_v14  ;;  %3062 = vmatpush.bf16.msrb.mxu2 %v5456_v48  ;;  %v5480_v61 = vld [vmem:[%s7021_s10 + $0x2f8] sm:$0xff]  ;;  %v3325_v14 = vpack.c.bf16 %v6633_v45, %v6633_v45  ;;  %v5475_v45 = vld [vmem:[%s7021_s10 + $0x2d0] sm:$0xff] }
 0xf79   :  { %v2902_v18 = vpop.f32.mrf.mxu1 }
 0xf7a   :  { %v2903_v16 = vadd.f32 %v5546_v40, %v2902_v18  ;;  %3063 = vmatpush.bf16.msrb.mxu2 %v5455_v39  ;;  %v5478_v18 = vld [vmem:[%s7021_s10 + $0x2e8] sm:$0xff] }
 0xf7c   :  { %v2914_v62 = vpack.c.bf16 %v2903_v16, %v2903_v16  ;;  %v5477_v16 = vld [vmem:[%s7021_s10 + $0x2e0] sm:$0xff] }
 0xf7e   :  { %v3016_v44 = vunpack.c.l.b16 %v2914_v62  ;;  %v5474_v62 = vld [vmem:[%s7021_s10 + $0x2c8] sm:$0xff] }
 0xf80   :  { %v3017_v51 = vpack.c.b16 %v3016_v44, %v3015_v54  ;;  %v5476_v54 = vld [vmem:[%s7021_s10 + $0x2d8] sm:$0xff]  ;;  %v5473_v44 = vld [vmem:[%s7021_s10 + $0x2c0] sm:$0xff] }
 0xf81   :  { %v3229_v1 = vpop.f32.mrf.mxu1 }
 0xf82   :  { %v3230_v2 = vadd.f32 %v5547_v0, %v3229_v1  ;;  %3029 = vmatpush.bf16.msrb.mxu3 %v3017_v51  ;;  %v2648_v51 = vadd.f32 %v6700_v56, %v6724_v36 }
 0xf84   :  { %v3327_v20 = vpack.c.bf16 %v3230_v2, %v3230_v2  ;;  %v2650_v2 = vadd.f32 %v6709_v24, %v6726_v37  ;;  %v5548_v37 = vld [vmem:[%s7022_s11 + $0xb] ss:$0 sm:$0xff] }
 0xf86   :  { %v3337_v5 = vunpack.c.l.b16 %v3327_v20  ;;  %3306 = vmatpush.bf16.msra.mxu3 %v5480_v61 }
 0xf89   :  { %v3231_v3 = vpop.f32.mrf.mxu1 }
 0xf8a   :  { %v3232_v4 = vadd.f32 %v5547_v0, %v3231_v3  ;;  %3307 = vmatpush.bf16.msra.mxu3 %v5479_v46 }
 0xf8c   :  { %v3328_v6 = vpack.c.bf16 %v3232_v4, %v3232_v4 }
 0xf8e   :  { %v3338_v10 = vunpack.c.l.b16 %v3328_v6  ;;  %3308 = vmatpush.bf16.msra.mxu3 %v5478_v18  ;;  %v5549_v18 = vld [vmem:[%s7024_s13] ss:$0 sm:$0xff] }
 0xf90   :  { %v3339_v7 = vpack.c.b16 %v3338_v10, %v3337_v5 }
 0xf91   :  { %v3234_v13 = vpop.f32.mrf.mxu1 }
 0xf92   :  { %v3235_v17 = vadd.f32 %v5547_v0, %v3234_v13  ;;  %v3344_v49 = vsel %vm406_vm13, %v3339_v7, 0  ;;  %3309 = vmatpush.bf16.msra.mxu3 %v5477_v16 }
 0xf94   :  { %v3329_v22 = vpack.c.bf16 %v3235_v17, %v3235_v17 }
 0xf96   :  { %v3361_v43 = vunpack.c.l.b16 %v3329_v22  ;;  %3310 = vmatpush.bf16.msra.mxu3 %v5476_v54 }
 0xf99   :  { %v3236_v19 = vpop.f32.mrf.mxu1 }
 0xf9a   :  { %v3237_v23 = vadd.f32 %v5547_v0, %v3236_v19  ;;  %3311 = vmatpush.bf16.msra.mxu3 %v5475_v45 }
 0xf9c   :  { %v3330_v25 = vpack.c.bf16 %v3237_v23, %v3237_v23 }
 0xf9e   :  { %v3362_v26 = vunpack.c.l.b16 %v3330_v25  ;;  %3312 = vmatpush.bf16.msra.mxu3 %v5474_v62 }
 0xf9f   :  { %v2984_v9 = vpop.xlane.xlu2 %2983 }
 0xfa0   :  { %5623 = vrcp.f32 %v2984_v9  ;;  %v3363_v27 = vpack.c.b16 %v3362_v26, %v3361_v43 }
 0xfa2   :  { %v3368_v31 = vsel %vm406_vm13, %v3363_v27, 0  ;;  %3313 = vmatpush.bf16.msra.mxu3 %v5473_v44 }
 0xfa3   :  { %3377 = vmatpush.bf16.xpose.msra.mxu0 %v3368_v31 }
 0xfa6   :  { %v5624_v32 = vpop.eup %5623 }
 0xfa7   :  { %v2988_v29 = vmul.f32 %v5624_v32, %v5620_v34 }
 0xfa9   :  { %v2990_v35 = vpack.c.bf16 %v2988_v29, %v2988_v29 }
 0xfaa   :  { %5131 = vmatmul.msk.bf16.vlgmr.msra.gmra.mxu0 %vm406_vm13, %v3326_v38 }
 0xfab   :  { %4972 = vmatmul.msk.bf16.vlgmr.msrb.gmra.mxu3 %vm2131_vm0, %v2990_v35 }
 0xfbb   :  { %3314 = vmatmul.bf16.vlgmr.msra.gmra.mxu3 %v6322_v21 }
 0xfcb   :  { %3319 = vmatmul.bf16.gmra.mxu3 %v6351_v30 }
 0xfe9   :  { %v2981_v40 = vpop.xlane.xlu1 %2980 }
 0xfea   :  { %5625 = vrcp.f32 %v2981_v40 }
 0xff0   :  { %v5626_v41 = vpop.eup %5625 }
 0xff1   :  { %v2987_v42 = vmul.f32 %v5626_v41, %v5622_v59 }
 0xff3   :  { %v2989_v47 = vpack.c.bf16 %v2987_v42, %v2987_v42 }
 0xff5   :  { %4971 = vmatmul.msk.bf16.vlgmr.msra.gmra.mxu2 %vm2131_vm0, %v2989_v47 }
 0xff6   :  { %3353 = vmatpush.bf16.xpose.msra.mxu2 %v3344_v49 }
0x1027   :  { %v3379_v34 = vpop.f32.mrf.mxu0 }
0x1028   :  { %v3384_v11 = vmul.f32 0.17677669, %v3379_v34 }
0x102a   :  { %v3386_v15 = vsel %vm6476_vm2, %v3384_v11, -1e+09 }
0x102b   :  { %v3390_v53 = vsel %vm2131_vm0, %v3386_v15, -inf }
0x102c   :  { %3391 = vmax.xlane.f32.xlu1 %v3390_v53  ;;  %v5481_v53 = vld [vmem:[%s7023_s12 + $0x30] sm:$0xff] }
0x102e   :  { %v3031_v52 = vpop.f32.mrf.mxu3 }
0x102f   :  { %v3381_v55 = vpop.f32.mrf.mxu0 }
0x1036   :  { %v3033_v58 = vpop.f32.mrf.mxu3 }
0x103e   :  { %v3315_v24 = vpop.f32.mrf.mxu3 }
0x103f   :  { %v3316_v17 = vadd.f32 %v5548_v37, %v3315_v24  ;;  %v5495_v24 = vld [vmem:[%s7025_s14 + $0x64] sm:$0xf] }
0x1041   :  { %v3331_v22 = vpack.c.bf16 %v3316_v17, %v3316_v17  ;;  %v5199_v17 = vld [vmem:[%s7025_s14 + $0x68] sm:$0xf0] }
0x1043   :  { %v3413_v43 = vunpack.c.l.b16 %v3331_v22 }
0x1046   :  { %v3317_v19 = vpop.f32.mrf.mxu3 }
0x1047   :  { %v3318_v23 = vadd.f32 %v5548_v37, %v3317_v19  ;;  %v5202_v19 = vor.u32 %v5495_v24, %v5199_v17  ;;  %v5514_v17 = vld [vmem:[%s7027_s16 + $0x78] sm:$0xff] }
0x1049   :  { %v3332_v12 = vpack.c.bf16 %v3318_v23, %v3318_v23 }
0x104b   :  { %v3414_v25 = vunpack.c.l.b16 %v3332_v12  ;;  %v5494_v12 = vld [vmem:[%s7025_s14 + $0x54] sm:$0xf0] }
0x104d   :  { %v3415_v9 = vpack.c.b16 %v3414_v25, %v3413_v43  ;;  %v5189_v43 = vld [vmem:[%s7025_s14 + $0x50] sm:$0xf]  ;;  %v5493_v25 = vld [vmem:[%s7025_s14 + $0x54] sm:$0xf] }
0x104e   :  { %v3320_v26 = vpop.f32.mrf.mxu3 }
0x104f   :  { %v3321_v27 = vadd.f32 %v5548_v37, %v3320_v26  ;;  %v5190_v26 = vor.u32 %v5494_v12, %v5189_v43  ;;  %v5513_v43 = vld [vmem:[%s7027_s16 + $0x70] sm:$0xff] }
0x1051   :  { %v3333_v28 = vpack.c.bf16 %v3321_v27, %v3321_v27 }
0x1053   :  { %v3435_v33 = vunpack.c.l.b16 %v3333_v28  ;;  %v5181_v28 = vld [vmem:[%s7025_s14 + $0x40] sm:$0xf] }
0x1056   :  { %v3322_v31 = vpop.f32.mrf.mxu3 }
0x1057   :  { %v3323_v32 = vadd.f32 %v5548_v37, %v3322_v31  ;;  %v5492_v31 = vld [vmem:[%s7025_s14 + $0x44] sm:$0xf0] }
0x1059   :  { %v3334_v29 = vpack.c.bf16 %v3323_v32, %v3323_v32  ;;  %v5491_v32 = vld [vmem:[%s7025_s14 + $0x44] sm:$0xf] }
0x105b   :  { %v3436_v35 = vunpack.c.l.b16 %v3334_v29  ;;  %v5182_v29 = vor.u32 %v5492_v31, %v5181_v28  ;;  %v5504_v28 = vld [vmem:[%s7027_s16 + $0x28] sm:$0xff] }
0x105c   :  { %v5512_v31 = vld [vmem:[%s7027_s16 + $0x68] sm:$0xff] }
0x105d   :  { %v3437_v38 = vpack.c.b16 %v3436_v35, %v3435_v33  ;;  %v5183_v33 = vld [vmem:[%s7025_s14 + $0x48] sm:$0xf0] }
0x105e   :  { %v5186_v35 = vor.u32 %v5491_v32, %v5183_v33 }
0x105f   :  { %3449 = vmatpush.bf16.msrb.mxu0 %v3437_v38  ;;  %v5173_v38 = vld [vmem:[%s7025_s14 + $0x30] sm:$0xf] }
0x1078   :  { %v3009_v50 = vpop.f32.mrf.mxu2 }
0x1079   :  { %v3035_v59 = vpack.c.bf16 %v3031_v52, %v3009_v50  ;;  %v5482_v52 = vld [vmem:[%s7023_s12 + $0x38] sm:$0xff] }
0x107a   :  { %3482 = vmatpush.bf16.msra.mxu1 %v5482_v52  ;;  %v5165_v52 = vld [vmem:[%s7025_s14 + $0x20] sm:$0xf] }
0x107b   :  { %4985 = vmatmul.msk.bf16.vlgmr.msrb.gmra.mxu2 %vm406_vm13, %v3035_v59 }
0x107c   :  { %3427 = vmatpush.bf16.msrb.mxu2 %v3415_v9  ;;  %v5191_v9 = vld [vmem:[%s7025_s14 + $0x58] sm:$0xf0] }
0x107d   :  { %v5194_v27 = vor.u32 %v5493_v25, %v5191_v9 }
0x107e   :  { %3483 = vmatpush.bf16.msra.mxu1 %v5481_v53  ;;  %v5488_v53 = vld [vmem:[%s7025_s14 + $0x24] sm:$0xf0] }
0x1080   :  { %v3011_v60 = vpop.f32.mrf.mxu2 }
0x1082   :  { %3863 = vmatpush.bf16.msrb.mxu1 %v5514_v17 }
0x1086   :  { %3864 = vmatpush.bf16.msrb.mxu1 %v5513_v43  ;;  %v5552_v43 = vld [vmem:[%s7028_s17] ss:$0 sm:$0xff]  ;;  %s5674_s17 = smov 128  }
0x108a   :  { %3865 = vmatpush.bf16.msrb.mxu1 %v5512_v31 }
0x108b   :  { %5130 = vmatmul.msk.bf16.vlgmr.msra.gmra.mxu2 %vm406_vm13, %v3325_v14 }
0x109f   :  { %v3392_v20 = vpop.xlane.xlu1 %3391 }
0x10a0   :  { %v3394_v5 = vsub.f32 %v3386_v15, %v3392_v20 }
0x10a2   :  { %v3397_v6 = vmul.f32 1.442695, %v3394_v5 }
0x10a4   :  { %5627 = vpow2.f32 %v3397_v6 }
0x10aa   :  { %v5628_v36 = vpop.eup %5627 }
0x10ab   :  { %v3402_v13 = vsel %vm2131_vm0, %v5628_v36, 0.0 }
0x10fe   :  { %v3065_v0 = vpop.f32.mrf.mxu2 }
0x10ff   :  { %v6782_v1 = vadd.f32 %v3065_v0, %v2648_v51 }
0x1106   :  { %v3067_v3 = vpop.f32.mrf.mxu2 }
0x1107   :  { %v6786_v4 = vadd.f32 %v3067_v3, %v2650_v2 }
0x110e   :  { %v3355_v10 = vpop.f32.mrf.mxu2 }
0x110f   :  { %v3383_v7 = vmul.f32 0.17677669, %v3355_v10  ;;  %v5205_v10 = vld [vmem:[%s7025_s14 + $0x70] sm:$0xf] }
0x1111   :  { %v3385_v21 = vsel %vm6466_vm15, %v3383_v7, -1e+09  ;;  %v5498_v7 = vld [vmem:[%s7025_s14 + $0x74] sm:$0xf0] }
0x1112   :  { %v3387_v30 = vsel %vm2131_vm0, %v3385_v21, -inf }
0x1113   :  { %3388 = vmax.xlane.f32.xlu0 %v3387_v30  ;;  %v5207_v30 = vld [vmem:[%s7025_s14 + $0x78] sm:$0xf0] }
0x1116   :  { %v3357_v56 = vpop.f32.mrf.mxu2 }
0x111b   :  { %3403 = vadd.xlane.f32.xlu0 %v3402_v13  ;;  %v5496_v13 = vld [vmem:[%s7025_s14 + $0x64] sm:$0xf0] }
0x1186   :  { %v3389_v40 = vpop.xlane.xlu0 %3388 }
0x1187   :  { %v3393_v41 = vsub.f32 %v3385_v21, %v3389_v40  ;;  %v5497_v21 = vld [vmem:[%s7025_s14 + $0x74] sm:$0xf]  ;;  %v5490_v40 = vld [vmem:[%s7025_s14 + $0x34] sm:$0xf0] }
0x1188   :  { %v5210_v56 = vor.u32 %v5497_v21, %v5207_v30 }
0x1189   :  { %v3395_v42 = vmul.f32 1.442695, %v3393_v41  ;;  %v5489_v41 = vld [vmem:[%s7025_s14 + $0x34] sm:$0xf] }
0x118a   :  { %3697 = vmatpush.bf16.msra.mxu2 %v5210_v56 }
0x118b   :  { %5629 = vpow2.f32 %v3395_v42  ;;  %v5175_v42 = vld [vmem:[%s7025_s14 + $0x38] sm:$0xf0] }
0x118e   :  { %v3404_v47 = vpop.xlane.xlu0 %3403  ;;  %3698 = vmatpush.bf16.msra.mxu2 %v5202_v19 }
0x118f   :  { %5631 = vrcp.f32 %v3404_v47 }
0x1191   :  { %v5630_v48 = vpop.eup %5629 }
0x1192   :  { %v3399_v39 = vsel %vm2131_vm0, %v5630_v48, 0.0  ;;  %3699 = vmatpush.bf16.msra.mxu2 %v5194_v27 }
0x1193   :  { %3400 = vadd.xlane.f32.xlu2 %v3399_v39 }
0x1195   :  { %v5632_v34 = vpop.eup %5631 }
0x1196   :  { %v3408_v11 = vmul.f32 %v5632_v34, %v5628_v36  ;;  %v5197_v36 = vld [vmem:[%s7025_s14 + $0x60] sm:$0xf]  ;;  %3700 = vmatpush.bf16.msra.mxu2 %v5186_v35 }
0x1197   :  { %v5198_v37 = vor.u32 %v5496_v13, %v5197_v36  ;;  %v5511_v35 = vld [vmem:[%s7027_s16 + $0x60] sm:$0xff] }
0x1198   :  { %v3410_v15 = vpack.c.bf16 %v3408_v11, %v3408_v11  ;;  %v5174_v11 = vor.u32 %v5490_v40, %v5173_v38  ;;  %3866 = vmatpush.bf16.msrb.mxu1 %v5511_v35 }
0x119a   :  { %5133 = vmatmul.msk.bf16.vlgmr.msrb.gmra.mxu0 %vm2131_vm0, %v3410_v15  ;;  %v5178_v15 = vor.u32 %v5489_v41, %v5175_v42 }
0x119c   :  { %3701 = vmatpush.bf16.msra.mxu2 %v5178_v15 }
0x1206   :  { %v3401_v55 = vpop.xlane.xlu2 %3400 }
0x1207   :  { %5633 = vrcp.f32 %v3401_v55  ;;  %v5487_v55 = vld [vmem:[%s7025_s14 + $0x24] sm:$0xf] }
0x120d   :  { %v5634_v58 = vpop.eup %5633 }
0x120e   :  { %v3407_v49 = vmul.f32 %v5634_v58, %v5630_v48  ;;  %v5167_v58 = vld [vmem:[%s7025_s14 + $0x28] sm:$0xf0] }
0x1210   :  { %v3409_v50 = vpack.c.bf16 %v3407_v49, %v3407_v49 }
0x1212   :  { %5132 = vmatmul.msk.bf16.vlgmr.msrb.gmra.mxu2 %vm2131_vm0, %v3409_v50 }
0x1217   :  { %v3451_v59 = vpop.f32.mrf.mxu0 }
0x121f   :  { %v3453_v60 = vpop.f32.mrf.mxu0 }
0x1220   :  { %v5170_v60 = vor.u32 %v5487_v55, %v5167_v58 }
0x1222   :  { %3702 = vmatpush.bf16.msra.mxu2 %v5170_v60 }
0x1295   :  { %v3429_v61 = vpop.f32.mrf.mxu2 }
0x1296   :  { %v3455_v46 = vpack.c.bf16 %v3451_v59, %v3429_v61  ;;  %v5166_v59 = vor.u32 %v5488_v53, %v5165_v52  ;;  %v5157_v61 = vld [vmem:[%s7025_s14 + $0x10] sm:$0xf] }
0x1298   :  { %5146 = vmatmul.msk.bf16.vlgmr.msra.gmra.mxu1 %vm406_vm13, %v3455_v46  ;;  %v5486_v46 = vld [vmem:[%s7025_s14 + $0x14] sm:$0xf0] }
0x129d   :  { %v3431_v14 = vpop.f32.mrf.mxu2 }
0x129e   :  { %v5485_v14 = vld [vmem:[%s7025_s14 + $0x14] sm:$0xf] }
0x1315   :  { %v3485_v16 = vpop.f32.mrf.mxu1 }
0x1316   :  { %v3490_v54 = vadd.f32 %v3485_v16, %v6782_v1 }
0x1318   :  { %v3496_v45 = vadd.f32 %v5549_v18, %v3490_v54 }
0x131a   :  { %v6810_v62 = vadd.f32 %v3496_v45, %v6264_v57  ;;  %v5158_v45 = vor.u32 %v5486_v46, %v5157_v61 }
0x131c   :  { %3502 = vadd.xlane.f32.xlu1 %v6810_v62 }
0x131d   :  { %v3487_v44 = vpop.f32.mrf.mxu1 }
0x131e   :  { %v3491_v51 = vadd.f32 %v3487_v44, %v6786_v4 }
0x1320   :  { %v3497_v0 = vadd.f32 %v5549_v18, %v3491_v51  ;;  %v5159_v18 = vld [vmem:[%s7025_s14 + $0x18] sm:$0xf0] }
0x1322   :  { %v6815_v2 = vadd.f32 %v3497_v0, %v6270_v63  ;;  %v5162_v0 = vor.u32 %v5485_v14, %v5159_v18  ;;  %v5551_v14 = vld [vmem:[%s7016_s5 + $0x2] ss:$0 sm:$0xff] }
0x1324   :  { %3504 = vadd.xlane.f32.xlu2 %v6815_v2  ;;  %3703 = vmatpush.bf16.msra.mxu2 %v5162_v0  ;;  %v5500_v0 = vld [vmem:[%s7027_s16 + $0x8] sm:$0xff] }
0x138f   :  { %v3503_v20 = vpop.xlane.xlu1 %3502 }
0x1390   :  { %v3506_v3 = vmul.f32 %v3503_v20, %v5777_v8  ;;  %v5149_v20 = vld [vmem:[%s7025_s14] sm:$0xf] }
0x1392   :  { %v6820_v1 = vsub.f32 %v6810_v62, %v3506_v3  ;;  %v5484_v3 = vld [vmem:[%s7025_s14 + $0x4] sm:$0xf0] }
0x1394   :  { %v3510_v57 = vmul.f32 %v6820_v1, %v6820_v1 }
0x1396   :  { %3512 = vadd.xlane.f32.xlu0 %v3510_v57  ;;  %v5483_v57 = vld [vmem:[%s7025_s14 + $0x4] sm:$0xf] }
0x1397   :  { %v3505_v5 = vpop.xlane.xlu2 %3504 }
0x1398   :  { %v3507_v6 = vmul.f32 %v3505_v5, %v5777_v8  ;;  %v5206_v8 = vor.u32 %v5498_v7, %v5205_v10  ;;  %v5151_v5 = vld [vmem:[%s7025_s14 + $0x8] sm:$0xf0] }
0x1399   :  { %v5154_v30 = vor.u32 %v5483_v57, %v5151_v5  ;;  %v5507_v57 = vld [vmem:[%s7027_s16 + $0x40] sm:$0xff] }
0x139a   :  { %v6826_v4 = vsub.f32 %v6815_v2, %v3507_v6  ;;  %3683 = vmatpush.bf16.msrb.mxu3 %v5206_v8  ;;  %v5150_v8 = vor.u32 %v5484_v3, %v5149_v20  ;;  %v5508_v20 = vld [vmem:[%s7027_s16 + $0x48] sm:$0xff]  ;;  %v5499_v3 = vld [vmem:[%s7027_s16] sm:$0xff] }
0x139b   :  { %3704 = vmatpush.bf16.msra.mxu2 %v5154_v30  ;;  %v3597_v5 = vld [vmem:[%s7026_s15] sm:$0x3] }
0x139c   :  { %v3511_v63 = vmul.f32 %v6826_v4, %v6826_v4 }
0x139e   :  { %3514 = vadd.xlane.f32.xlu1 %v3511_v63  ;;  %3684 = vmatpush.bf16.msrb.mxu3 %v5198_v37  ;;  %v5506_v37 = vld [vmem:[%s7027_s16 + $0x38] sm:$0xff] }
0x139f   :  { %3849 = vmatpush.bf16.msra.mxu0 %v5506_v37 }
0x13a2   :  { %3685 = vmatpush.bf16.msrb.mxu3 %v5190_v26 }
0x13a6   :  { %3686 = vmatpush.bf16.msrb.mxu3 %v5182_v29  ;;  %v5503_v29 = vld [vmem:[%s7027_s16 + $0x20] sm:$0xff] }
0x13aa   :  { %3687 = vmatpush.bf16.msrb.mxu3 %v5174_v11 }
0x13ae   :  { %3688 = vmatpush.bf16.msrb.mxu3 %v5166_v59 }
0x13b2   :  { %3689 = vmatpush.bf16.msrb.mxu3 %v5158_v45  ;;  %v5502_v45 = vld [vmem:[%s7027_s16 + $0x18] sm:$0xff] }
0x13b6   :  { %3690 = vmatpush.bf16.msrb.mxu3 %v5150_v8 }
0x1409   :  { %v3513_v22 = vpop.xlane.xlu0 %3512 }
0x140a   :  { %v6854_v23 = vmul.f32 0.007874016, %v3513_v22 }
0x140c   :  { %5635 = vrsqrt.f32 %v6854_v23  ;;  %vm3525_vm13 = vcmp.eq.f32.partialorder %v6854_v23, inf  ;;  %vm3527_vm3 = vcmp.eq.f32.partialorder %v6854_v23, 0.0  ;;  %v3528_v10 = vand.u32 2147483648, %v6854_v23 }
0x1411   :  { %v3515_v47 = vpop.xlane.xlu1 %3514 }
0x1412   :  { %v5636_v48 = vpop.eup %5635  ;;  %v6893_v39 = vmul.f32 0.007874016, %v3515_v47 }
0x1413   :  { %v3519_v34 = vmul.f32 %v5636_v48, %v6854_v23 }
0x1414   :  { %5637 = vrsqrt.f32 %v6893_v39  ;;  %vm3537_vm4 = vcmp.eq.f32.partialorder %v6893_v39, inf  ;;  %v3540_v19 = vand.u32 2147483648, %v6893_v39  ;;  %vm3539_vm5 = vcmp.eq.f32.partialorder %v6893_v39, 0.0 }
0x1415   :  { %v3520_v49 = vmul.f32 %v5636_v48, %v3519_v34 }
0x1417   :  { %v3521_v50 = vmul.f32 0.5, %v3520_v49  ;;  %v5550_v49 = vld [vmem:[%s7015_s4 + $0x2] ss:$0 sm:$0xff] }
0x1419   :  { %v3522_v16 = vsub.f32 1.5, %v3521_v50 }
0x141a   :  { %v5638_v54 = vpop.eup %5637 }
0x141b   :  { %v3523_v44 = vmul.f32 %v5636_v48, %v3522_v16  ;;  %v3531_v51 = vmul.f32 %v5638_v54, %v6893_v39 }
0x141d   :  { %v3524_v6 = vmul.f32 %v3523_v44, %v6854_v23  ;;  %v3532_v63 = vmul.f32 %v5638_v54, %v3531_v51  ;;  %v5510_v44 = vld [vmem:[%s7027_s16 + $0x58] sm:$0xff]  ;;  %v5509_v51 = vld [vmem:[%s7027_s16 + $0x50] sm:$0xff] }
0x141e   :  { %3867 = vmatpush.bf16.msrb.mxu1 %v5510_v44 }
0x141f   :  { %v3526_v7 = vsel %vm3525_vm13, %v6854_v23, %v3524_v6  ;;  %v3533_v21 = vmul.f32 0.5, %v3532_v63  ;;  %v5505_v23 = vld [vmem:[%s7027_s16 + $0x30] sm:$0xff] }
0x1420   :  { %v3529_v56 = vsel %vm3527_vm3, %v3528_v10, %v3526_v7  ;;  %3850 = vmatpush.bf16.msra.mxu0 %v5505_v23  ;;  %v3599_v10 = vperm.slane %v3597_v5, 0  ;;  %v3600_v7 = vperm.slane %v3597_v5, 1 }
0x1421   :  { %v3542_v36 = vadd.f32 1e-06, %v3529_v56  ;;  %v3534_v13 = vsub.f32 1.5, %v3533_v21 }
0x1422   :  { %3868 = vmatpush.bf16.msrb.mxu1 %v5509_v51 }
0x1423   :  { %5639 = vrcp.f32 %v3542_v36  ;;  %v3535_v24 = vmul.f32 %v5638_v54, %v3534_v13  ;;  %v3555_v38 = vand.u32 2147483648, %v3542_v36  ;;  %vm3549_vm7 = vweird.f32 %v3542_v36 }
0x1424   :  { %3851 = vmatpush.bf16.msra.mxu0 %v5504_v28  ;;  %v3553_v41 = vand.u32 2147483647, %v3542_v36 }
0x1425   :  { %v3536_v22 = vmul.f32 %v3535_v24, %v6893_v39 }
0x1426   :  { %vm3554_vm9 = vcmp.eq.f32.partialorder %v3553_v41, 8.507059e+37  ;;  %3869 = vmatpush.bf16.msrb.mxu1 %v5508_v20 }
0x1427   :  { %v3538_v12 = vsel %vm3537_vm4, %v6893_v39, %v3536_v22  ;;  %v3556_v39 = vor.u32 1.1754944e-38, %v3555_v38 }
0x1428   :  { %v3541_v25 = vsel %vm3539_vm5, %v3540_v19, %v3538_v12  ;;  %3852 = vmatpush.bf16.msra.mxu0 %v5503_v29 }
0x1429   :  { %v5640_v9 = vpop.eup %5639  ;;  %v3543_v26 = vadd.f32 1e-06, %v3541_v25 }
0x142a   :  { %v3545_v27 = vmul.f32 %v5640_v9, %v3542_v36  ;;  %vm3550_vm6 = vweird.f32 %v5640_v9  ;;  %3870 = vmatpush.bf16.msrb.mxu1 %v5507_v57 }
0x142b   :  { %5641 = vrcp.f32 %v3543_v26  ;;  %vm3551_vm8 = vmor %vm3549_vm7, %vm3550_vm6  ;;  %v3569_v15 = vand.u32 2147483648, %v3543_v26  ;;  %v3567_v53 = vand.u32 2147483647, %v3543_v26  ;;  %vm3563_vm11 = vweird.f32 %v3543_v26 }
0x142c   :  { %v3546_v32 = vsub.f32 1.0, %v3545_v27  ;;  %3853 = vmatpush.bf16.msra.mxu0 %v5502_v45 }
0x142d   :  { %v3570_v50 = vor.u32 1.1754944e-38, %v3569_v15  ;;  %vm3568_vm14 = vcmp.eq.f32.partialorder %v3567_v53, 8.507059e+37 }
0x142e   :  { %v3547_v33 = vmul.f32 %v5640_v9, %v3546_v32 }
0x1430   :  { %v3548_v40 = vadd.f32 %v5640_v9, %v3547_v33 }
0x1431   :  { %v5642_v42 = vpop.eup %5641 }
0x1432   :  { %v3552_v47 = vsel %vm3551_vm8, %v5640_v9, %v3548_v40  ;;  %v3559_v48 = vmul.f32 %v5642_v42, %v3543_v26  ;;  %vm3564_vm10 = vweird.f32 %v5642_v42 }
0x1433   :  { %v3557_v11 = vsel %vm3554_vm9, %v3556_v39, %v3552_v47  ;;  %vm3565_vm12 = vmor %vm3563_vm11, %vm3564_vm10 }
0x1434   :  { %v3560_v34 = vsub.f32 1.0, %v3559_v48  ;;  %v3572_v58 = vmul.f32 %v3557_v11, %v6820_v1 }
0x1436   :  { %v3561_v52 = vmul.f32 %v5642_v42, %v3560_v34  ;;  %v3575_v46 = vmul.f32 %v5550_v49, %v3572_v58 }
0x1438   :  { %v3562_v55 = vadd.f32 %v5642_v42, %v3561_v52  ;;  %v3578_v16 = vadd.f32 %v5551_v14, %v3575_v46 }
0x143a   :  { %v3566_v59 = vsel %vm3565_vm12, %v5642_v42, %v3562_v55 }
0x143b   :  { %v3571_v60 = vsel %vm3568_vm14, %v3570_v50, %v3566_v59 }
0x143c   :  { %v3573_v61 = vmul.f32 %v3571_v60, %v6826_v4  ;;  %v5501_v4 = vld [vmem:[%s7027_s16 + $0x10] sm:$0xff] }
0x143d   :  { %3854 = vmatpush.bf16.msra.mxu0 %v5501_v4 }
0x143e   :  { %v3576_v18 = vmul.f32 %v5550_v49, %v3573_v61 }
0x1440   :  { %v3579_v54 = vadd.f32 %v5551_v14, %v3576_v18 }
0x1441   :  { %3855 = vmatpush.bf16.msra.mxu0 %v5500_v0 }
0x1442   :  { %v3580_v1 = vpack.c.bf16 %v3579_v54, %v3578_v16 }
0x1444   :  { %3691 = vmatmul.bf16.vlgmr.msrb.gmra.mxu3 %v3580_v1  ;;  %3705 = vmatmul.bf16.vlgmr.msra.gmra.mxu2 %v3580_v1 }
0x1445   :  { %3856 = vmatpush.bf16.msra.mxu0 %v5499_v3 }
0x14c7   :  { %v3692_v6 = vpop.f32.mrf.mxu3  ;;  %v3706_v63 = vpop.f32.mrf.mxu2 }
0x14c8   :  { %v3693_v21 = vadd.f32 %v3692_v6, %v3599_v10  ;;  %v3707_v8 = vadd.f32 %v3706_v63, %v3600_v7 }
0x14ca   :  { %v3711_v24 = vmax.f32 %v3693_v21, 0.0  ;;  %v3712_v37 = vmax.f32 %v3707_v8, 0.0 }
0x14cf   :  { %v3694_v30 = vpop.f32.mrf.mxu3  ;;  %v3708_v56 = vpop.f32.mrf.mxu2 }
0x14d0   :  { %v3695_v36 = vadd.f32 %v3694_v30, %v3599_v10  ;;  %v3709_v13 = vadd.f32 %v3708_v56, %v3600_v7 }
0x14d2   :  { %v3713_v17 = vmax.f32 %v3695_v36, 0.0  ;;  %v3714_v22 = vmax.f32 %v3709_v13, 0.0 }
0x14d4   :  { %v3715_v19 = vpack.c.bf16 %v3713_v17, %v3711_v24  ;;  %v3716_v23 = vpack.c.bf16 %v3714_v22, %v3712_v37 }
0x14d6   :  { %3857 = vmatmul.bf16.vlgmr.msra.gmra.mxu0 %v3715_v19  ;;  %3871 = vmatmul.bf16.vlgmr.msrb.gmra.mxu1 %v3716_v23 }
0x1553   :  { %v3858_v12 = vpop.f32.mrf.mxu0  ;;  %v3872_v25 = vpop.f32.mrf.mxu1 }
0x1554   :  { %v3859_v9 = vadd.f32 %v5552_v43, %v3858_v12 }
0x1556   :  { %v3873_v26 = vadd.f32 %v3872_v25, %v3859_v9 }
0x1558   :  { %v3877_v27 = vadd.f32 %v3873_v26, %v6810_v62 }
0x155a   :  { %3879 = vst [vmem:[#allocation2] sm:$0xff] %v3877_v27 }
0x155b   :  { %v3860_v28 = vpop.f32.mrf.mxu0  ;;  %v3874_v32 = vpop.f32.mrf.mxu1 }
0x155c   :  { %v3861_v31 = vadd.f32 %v5552_v43, %v3860_v28 }
0x155e   :  { %v3875_v33 = vadd.f32 %v3874_v32, %v3861_v31 }
0x1560   :  { %v3878_v29 = vadd.f32 %v3875_v33, %v6815_v2 }
0x1562   :  { %3880 = vst [vmem:[#allocation2 + $0x8] sm:$0xff] %v3878_v29 }
0x1563   :  { %3893 = dma.vmem_to_hbm [thread:$0]  %s3886_s19, 256, %s3888_s20, [#allocation3], %s5674_s17, %s5674_s17, %s5675_s9  }
0x1564   :  { %5669 = dma.done.wait [#allocation3], 256  }
0x1565   :  { %5670 = vsyncadd [#allocation3], 4294967040 }
0x1566   :  { %3898 = vsyncpa [#allocation3], 1 }

</bundles_post_ra>
